<compile_context>
chip_gen: v7x
topology: tpu7x:2x2x1
jax: 0.10.0
libtpu: 0.0.40
codegen_flags: <defaults>
</compile_context>

<pallas_src>
import math

import jax
import jax.numpy as jnp
import numpy as np
from jax import lax
from jax.experimental import pallas as pl
from jax.experimental.pallas import tpu as pltpu

SOFTMAX_TEMPERATURE = 1.0  # config.softmax_temperature


# --------------------------------------------------------------------------
# One-time parameter prep: (in, out) layout, bf16 weights, fused LSTM weight,
# folded softmax scale, f32 biases shaped as broadcastable rows.
# --------------------------------------------------------------------------
def prepare_emulator_params(params, softmax_temperature=SOFTMAX_TEMPERATURE):
    H = params["wq"].shape[0]
    scale = 1.0 / (math.sqrt(H) * softmax_temperature)
    bf16, f32 = jnp.bfloat16, jnp.float32
    return dict(
        mix_emb=params["mix_emb"].astype(bf16),                               # (M, H)
        wq_t=(params["wq"] * scale).T.astype(bf16),                           # (H, H)   scale folded
        bq=(params["bq"] * scale)[None, :].astype(f32),                       # (1, H)
        wk_t=params["wk"].T.astype(bf16),                                     # (H, H)
        bk=params["bk"][None, :].astype(f32),                                 # (1, H)
        wo_t=params["wo"].T.astype(bf16),                                     # (2H, H)
        bo=params["bo"][None, :].astype(f32),                                 # (1, H)
        w_lstm_t=jnp.concatenate([params["w_ih"], params["w_hh"]],
                                 axis=1).T.astype(bf16),                      # (2H, 4H)
        b_lstm=(params["b_ih"] + params["b_hh"])[None, :].astype(f32),        # (1, 4H)
        mlp_w1_t=jnp.swapaxes(params["mlp_w1"], 1, 2).astype(bf16),           # (L, 2H, 4H)
        mlp_b1=params["mlp_b1"][:, None, :].astype(f32),                      # (L, 1, 4H)
        mlp_w2_t=jnp.swapaxes(params["mlp_w2"], 1, 2).astype(bf16),           # (L, 4H, H)
        mlp_b2=params["mlp_b2"][:, None, :].astype(f32),                      # (L, 1, H)
    )


# --------------------------------------------------------------------------
# VMEM bookkeeping (per-generation capacity aware; v7x = 64 MiB per TC).
# --------------------------------------------------------------------------
def _vmem_capacity_bytes():
    try:
        cap = int(pltpu.get_tpu_info().vmem_capacity_bytes)
        if cap > 0:
            return cap
    except Exception:
        pass
    return 64 << 20  # conservative fallback (v7x per-TensorCore VMEM)


def _resident_vmem_need(L, B, H, M):
    bf, f4 = 2, 4
    weights = (M * H + (2 + 2 + 8 + 12 * L) * H * H) * bf
    biases = (7 * H + 5 * L * H) * f4
    acts = 2 * L * B * H * f4                 # zs + out, whole arrays in VMEM
    scratch = B * 2 * H * bf
    return weights + biases + acts + scratch + (4 << 20)


def _streamed_vmem_need(B, H, M, n_chunks, use_buffered):
    bf, f4 = 2, 4
    Tc = (4 * H) // n_chunks
    # double-buffered per-grid-step streamed blocks (mlp chunk + zs/out blocks)
    stream = 2 * ((2 * H * Tc + Tc * H) * bf + (Tc + H) * f4 + 2 * B * H * f4)
    res_mult = 1 if use_buffered else 2       # Buffered(1) residents vs default 2
    resident = res_mult * ((M * H + 12 * H * H) * bf + 7 * H * f4)
    scratch = 2 * B * H * f4 + B * 2 * H * bf
    return stream + resident + scratch + (4 << 20)


# --------------------------------------------------------------------------
# Shared kernel pieces (operate on the persistent (B, 2H) bf16 staging scratch).
# --------------------------------------------------------------------------
def _mixture_attention(z0, emb_ref, wq_ref, bq_ref, wk_ref, bk_ref,
                       wo_ref, bo_ref, xh_scr, H):
    """Writes x_0 = out_proj([z0, softmax(qK^T) @ E]) into xh_scr[:, :H]; returns it."""
    f32, bf16 = jnp.float32, jnp.bfloat16
    E = emb_ref[...]                                                        # (M, H) bf16
    q = jnp.dot(z0.astype(bf16), wq_ref[...], preferred_element_type=f32) + bq_ref[...]
    k = jnp.dot(E, wk_ref[...], preferred_element_type=f32) + bk_ref[...]
    s = lax.dot_general(q, k, (((1,), (1,)), ((), ())),
                        preferred_element_type=f32)                         # (B, M)
    s = s - jnp.max(s, axis=-1, keepdims=True)
    p = jnp.exp(s)
    p = p * pl.reciprocal(jnp.sum(p, axis=-1, keepdims=True), approx=True)
    mix = jnp.dot(p.astype(bf16), E, preferred_element_type=f32)            # (B, H)
    xh_scr[:, :H] = z0.astype(bf16)
    xh_scr[:, H:] = mix.astype(bf16)
    x0 = jnp.dot(xh_scr[...], wo_ref[...], preferred_element_type=f32) + bo_ref[...]
    xh_scr[:, :H] = x0.astype(bf16)
    return x0


def _lstm_step(h_prev, c_prev, wl_ref, bl_ref, xh_scr, H):
    """One LSTM step; expects x in xh_scr[:, :H]; leaves h_new in xh_scr[:, H:]."""
    f32, bf16 = jnp.float32, jnp.bfloat16
    xh_scr[:, H:] = h_prev.astype(bf16)
    gates = jnp.dot(xh_scr[...], wl_ref[...], preferred_element_type=f32) + bl_ref[...]
    i_g = jax.nn.sigmoid(gates[:, 0 * H:1 * H])
    f_g = jax.nn.sigmoid(gates[:, 1 * H:2 * H])
    g_g = jnp.tanh(gates[:, 2 * H:3 * H])
    o_g = jax.nn.sigmoid(gates[:, 3 * H:4 * H])
    c_new = f_g * c_prev + i_g * g_g
    h_new = o_g * jnp.tanh(c_new)
    xh_scr[:, H:] = h_new.astype(bf16)
    return h_new, c_new


# --------------------------------------------------------------------------
# Path A: fully VMEM-resident, single invocation, fori_loop over layers.
# --------------------------------------------------------------------------
def _resident_kernel(zs_ref, emb_ref, wq_ref, bq_ref, wk_ref, bk_ref, wo_ref, bo_ref,
                     wl_ref, bl_ref, w1_ref, b1_ref, w2_ref, b2_ref, out_ref, xh_scr):
    L, B, H = zs_ref.shape
    f32, bf16 = jnp.float32, jnp.bfloat16

    x0 = _mixture_attention(zs_ref[0], emb_ref, wq_ref, bq_ref, wk_ref, bk_ref,
                            wo_ref, bo_ref, xh_scr, H)

    def layer(l, carry):
        h, c = carry
        x = jnp.where(l == 0, x0, zs_ref[l])                                # rnn input x_l
        xh_scr[:, :H] = x.astype(bf16)
        h_new, c_new = _lstm_step(h, c, wl_ref, bl_ref, xh_scr, H)
        # verticle MLP on [x_l, h_l]
        h1 = jnp.maximum(
            jnp.dot(xh_scr[...], w1_ref[l], preferred_element_type=f32) + b1_ref[l], 0.0)
        out_ref[l] = (jnp.dot(h1.astype(bf16), w2_ref[l], preferred_element_type=f32)
                      + b2_ref[l])
        return h_new, c_new

    lax.fori_loop(0, L, layer,
                  (jnp.zeros((B, H), f32), jnp.zeros((B, H), f32)), unroll=True)


def _resident_forward(zs, prep, cap):
    L, B, H = zs.shape
    need = _resident_vmem_need(L, B, H, prep["mix_emb"].shape[0])
    vmem = lambda: pl.BlockSpec(memory_space=pltpu.MemorySpace.VMEM)
    return pl.pallas_call(
        _resident_kernel,
        out_shape=jax.ShapeDtypeStruct((L, B, H), jnp.float32),
        in_specs=[vmem() for _ in range(14)],
        out_specs=vmem(),
        scratch_shapes=[pltpu.VMEM((B, 2 * H), jnp.bfloat16)],
        compiler_params=pltpu.CompilerParams(
            vmem_limit_bytes=int(min(max(need, 32 << 20), int(cap * 0.9)))),
    )(zs, prep["mix_emb"], prep["wq_t"], prep["bq"], prep["wk_t"], prep["bk"],
      prep["wo_t"], prep["bo"], prep["w_lstm_t"], prep["b_lstm"],
      prep["mlp_w1_t"], prep["mlp_b1"], prep["mlp_w2_t"], prep["mlp_b2"])


# --------------------------------------------------------------------------
# Path B: streamed grid = (layers, 4H-chunks).  Per-layer MLP weights are
# streamed & double-buffered; attention/LSTM weights resident (Buffered(1));
# the MLP partial products accumulate directly in the resident output block.
# --------------------------------------------------------------------------
def _streamed_kernel(zs_ref, emb_ref, wq_ref, bq_ref, wk_ref, bk_ref, wo_ref, bo_ref,
                     wl_ref, bl_ref, w1_ref, b1_ref, w2_ref, b2_ref, out_ref,
                     h_scr, c_scr, xh_scr):
    t = pl.program_id(0)
    c = pl.program_id(1)
    _, H = h_scr.shape
    f32, bf16 = jnp.float32, jnp.bfloat16

    # --- once per layer (first chunk): layer input + one LSTM step ----------
    @pl.when(c == 0)
    def _layer_prologue():
        xh_scr[:, :H] = zs_ref[...].astype(bf16)        # x_l = z_l for l > 0

        @pl.when(t == 0)
        def _():                                        # x_0 from mixture attention
            h_scr[...] = jnp.zeros_like(h_scr)
            c_scr[...] = jnp.zeros_like(c_scr)
            _mixture_attention(zs_ref[...], emb_ref, wq_ref, bq_ref, wk_ref, bk_ref,
                               wo_ref, bo_ref, xh_scr, H)

        h_new, c_new = _lstm_step(h_scr[...], c_scr[...], wl_ref, bl_ref, xh_scr, H)
        h_scr[...] = h_new
        c_scr[...] = c_new

    # --- partial verticle MLP for this 4H chunk ------------------------------
    h1 = jnp.maximum(
        jnp.dot(xh_scr[...], w1_ref[...], preferred_element_type=f32) + b1_ref[...], 0.0)
    partial = jnp.dot(h1.astype(bf16), w2_ref[...], preferred_element_type=f32)

    @pl.when(c == 0)
    def _(): out_ref[...] = partial + b2_ref[...]

    @pl.when(c > 0)
    def _(): out_ref[...] = out_ref[...] + partial


def _build_streamed_call(L, B, H, M, n_chunks, use_buffered, vmem_budget):
    Tc = (4 * H) // n_chunks

    def res_spec(shape):
        if use_buffered:
            return pl.BlockSpec(shape, lambda t, c: (0,) * len(shape),
                                pipeline_mode=pl.Buffered(1))
        return pl.BlockSpec(shape, lambda t, c: (0,) * len(shape))

    per_layer = lambda t, c: (t, 0, 0)
    in_specs = [
        pl.BlockSpec((None, B, H), per_layer),                 # zs[t]
        res_spec((M, H)),                                      # mixture embeddings
        res_spec((H, H)), res_spec((1, H)),                    # wq_t, bq (scale folded)
        res_spec((H, H)), res_spec((1, H)),                    # wk_t, bk
        res_spec((2 * H, H)), res_spec((1, H)),                # wo_t, bo
        res_spec((2 * H, 4 * H)), res_spec((1, 4 * H)),        # [W_ih|W_hh]^T, b_ih+b_hh
        pl.BlockSpec((None, 2 * H, Tc), lambda t, c: (t, 0, c)),   # mlp_w1_t[t] chunk
        pl.BlockSpec((None, 1, Tc), lambda t, c: (t, 0, c)),       # mlp_b1[t] chunk
        pl.BlockSpec((None, Tc, H), lambda t, c: (t, c, 0)),       # mlp_w2_t[t] chunk
        pl.BlockSpec((None, 1, H), per_layer),                     # mlp_b2[t]
    ]
    need = _streamed_vmem_need(B, H, M, n_chunks, use_buffered)
    return pl.pallas_call(
        _streamed_kernel,
        out_shape=jax.ShapeDtypeStruct((L, B, H), jnp.float32),
        grid=(L, n_chunks),
        in_specs=in_specs,
        out_specs=pl.BlockSpec((None, B, H), per_layer),
        scratch_shapes=[pltpu.VMEM((B, H), jnp.float32),       # h carry
                        pltpu.VMEM((B, H), jnp.float32),       # c carry
                        pltpu.VMEM((B, 2 * H), jnp.bfloat16)], # [x, h] staging
        compiler_params=pltpu.CompilerParams(
            dimension_semantics=("arbitrary", "arbitrary"),    # carry across both axes
            vmem_limit_bytes=int(min(max(need, 32 << 20), vmem_budget))),
    )


def _streamed_forward(zs, prep, cap, mlp_chunks=None):
    L, B, H = zs.shape
    M = prep["mix_emb"].shape[0]
    budget = int(cap * 0.9)
    if mlp_chunks is None:
        mlp_chunks = 1
        # double the 4H-chunk count until the double-buffered stream fits VMEM
        while (_streamed_vmem_need(B, H, M, mlp_chunks, use_buffered=True) > budget
               and (4 * H) % (2 * mlp_chunks * 128) == 0):
            mlp_chunks *= 2
    assert (4 * H) % mlp_chunks == 0 and ((4 * H) // mlp_chunks) % 128 == 0
    args = (zs, prep["mix_emb"], prep["wq_t"], prep["bq"], prep["wk_t"], prep["bk"],
            prep["wo_t"], prep["bo"], prep["w_lstm_t"], prep["b_lstm"],
            prep["mlp_w1_t"], prep["mlp_b1"], prep["mlp_w2_t"], prep["mlp_b2"])
    try:
        return _build_streamed_call(L, B, H, M, mlp_chunks, True, budget)(*args)
    except Exception:
        # pipeline_mode=pl.Buffered(1) not supported by this jax build -> default buffers
        return _build_streamed_call(L, B, H, M, mlp_chunks, False, budget)(*args)


def emulator_heads_forward(zs, prep, *, force_streamed=False, mlp_chunks=None):
    """zs: (L, B, H) f32 per-layer base-model hidden states -> (L, B, H) f32."""
    L, B, H = zs.shape
    M = prep["mix_emb"].shape[0]
    cap = _vmem_capacity_bytes()
    if not force_streamed and _resident_vmem_need(L, B, H, M) <= cap // 2:
        return _resident_forward(zs, prep, cap)          # small config: no per-step overhead
    return _streamed_forward(zs, prep, cap, mlp_chunks)  # GPT2-scale: streamed + chunked MLP


# --------------------------------------------------------------------------
# Pure-JAX PyTorch-faithful reference (f32 weights) for the correctness check.
# --------------------------------------------------------------------------
def emulator_heads_ref(zs, params):
    L, B, H = zs.shape
    z0 = zs[0]
    q = z0 @ params["wq"].T + params["bq"]
    k = params["mix_emb"] @ params["wk"].T + params["bk"]
    scores = (q @ k.T) / (math.sqrt(H) * SOFTMAX_TEMPERATURE)
    p = jax.nn.softmax(scores, axis=-1)
    mix = p @ params["mix_emb"]
    z0p = jnp.concatenate([z0, mix], -1) @ params["wo"].T + params["bo"]
    x_seq = jnp.concatenate([z0p[None], zs[1:]], axis=0)

    b = params["b_ih"] + params["b_hh"]

    def step(carry, x):
        h, c = carry
        gates = x @ params["w_ih"].T + h @ params["w_hh"].T + b
        i, f, g, o = jnp.split(gates, 4, axis=-1)
        i, f, g, o = jax.nn.sigmoid(i), jax.nn.sigmoid(f), jnp.tanh(g), jax.nn.sigmoid(o)
        c = f * c + i * g
        h = o * jnp.tanh(c)
        return (h, c), h

    _, rnn_out = lax.scan(step, (jnp.zeros((B, H)), jnp.zeros((B, H))), x_seq)

    outs = []
    for l in range(L):
        xo = jnp.concatenate([x_seq[l], rnn_out[l]], -1)
        h1 = jnp.maximum(xo @ params["mlp_w1"][l].T + params["mlp_b1"][l], 0.0)
        outs.append(h1 @ params["mlp_w2"][l].T + params["mlp_b2"][l])
    return jnp.stack(outs, 0)


# --------------------------------------------------------------------------
# Glue: synthetic base-model hidden states + full forward
# --------------------------------------------------------------------------
def synthetic_base_model_states(input_ids, sep_positions, params):
    # TODO(synk): stand-in for GPT2LMHeadImplicitModel 'forward_emulator' hidden states.
    B = input_ids.shape[0]
    h = params["tok_emb"][input_ids]                   # (B, S, H)
    zs = []
    for l in range(params["layer_mix"].shape[0]):
        h = jnp.tanh(h @ params["layer_mix"][l])
        zs.append(h[jnp.arange(B), sep_positions])     # hidden state at sep position
    return jnp.stack(zs, axis=0)                       # (L, B, H)


def thought_emulator_forward(input_ids, params, prep, eos_token_id):
    # get_sep_position: first eos token per row (rows with no EOS silently map to 0)
    sep_positions = jnp.argmax(input_ids == eos_token_id, axis=-1)
    # TODO(synk): host sync + data-dependent slice length mirrors the PyTorch glue
    # `input_ids[:, :sep_positions.max()+1]`; not jit-friendly.
    max_sep = int(jax.device_get(jnp.max(sep_positions)))
    input_ids = input_ids[:, : max_sep + 1]
    zs = synthetic_base_model_states(input_ids, sep_positions, params)   # (L, B, H)
    return emulator_heads_forward(zs, prep)                              # f_h_cs


def init_params(key, L, H, M, V):
    keys = jax.random.split(key, 14)

    def nrm(k, shape, scale=0.02):
        return scale * jax.random.normal(k, shape, jnp.float32)

    return dict(
        tok_emb=nrm(keys[0], (V, H), 0.1),
        layer_mix=nrm(keys[1], (L, H, H), 0.3),
        mix_emb=nrm(keys[2], (M, H), 0.1),                 # nn.Embedding(mixture_size, H)
        wq=nrm(keys[3], (H, H)), bq=jnp.zeros((H,), jnp.float32),
        wk=nrm(keys[4], (H, H)), bk=jnp.zeros((H,), jnp.float32),
        wo=nrm(keys[5], (H, 2 * H)), bo=jnp.zeros((H,), jnp.float32),
        w_ih=nrm(keys[6], (4 * H, H)), w_hh=nrm(keys[7], (4 * H, H)),
        b_ih=nrm(keys[8], (4 * H,)), b_hh=nrm(keys[9], (4 * H,)),
        mlp_w1=nrm(keys[10], (L, 4 * H, 2 * H)),
        mlp_b1=nrm(keys[11], (L, 4 * H)),
        mlp_w2=nrm(keys[12], (L, H, 4 * H)),
        mlp_b2=nrm(keys[13], (L, H)),
    )


if __name__ == "__main__":
    # Small, TPU-friendly shapes (H multiple of 128 keeps gate slices lane-aligned).
    # NOTE: B=2 underfills the MXU; batch toward 8+ rows per pass if the workload allows.
    B, S, H, L, M, V = 2, 8, 128, 4, 8, 50
    eos_token_id = 1

    key = jax.random.PRNGKey(0)
    k_tok, k_par = jax.random.split(key)
    params = init_params(k_par, L, H, M, V)
    prep = prepare_emulator_params(params)             # one-time layout/bf16 weight prep

    input_ids = jax.random.randint(k_tok, (B, S), 2, V, dtype=jnp.int32)
    input_ids = input_ids.at[0, 5].set(eos_token_id)
    input_ids = input_ids.at[1, 6].set(eos_token_id)

    # Default path (resident single-invocation kernel at this scale).
    out = thought_emulator_forward(input_ids, params, prep, eos_token_id)
    out = jax.block_until_ready(out)

    # Reference check (f32 weights vs bf16 kernel weights + approx softmax reciprocal).
    sep_positions = jnp.argmax(input_ids == eos_token_id, axis=-1)
    zs = synthetic_base_model_states(input_ids, sep_positions, params)
    ref = emulator_heads_ref(zs, params)
    np.testing.assert_allclose(np.asarray(out), np.asarray(ref), rtol=3e-2, atol=3e-3)

    # Also exercise the streamed (GPT2-scale) path: un-chunked and 4H-chunked MLP.
    for chunks in (1, 2):
        out_s = emulator_heads_forward(zs, prep, force_streamed=True, mlp_chunks=chunks)
        out_s = jax.block_until_ready(out_s)
        np.testing.assert_allclose(np.asarray(out_s), np.asarray(ref),
                                   rtol=3e-2, atol=3e-3)

    print("KERNEL_OK")
</pallas_src>

<mosaic_0001>
module attributes {stable_mosaic.version = 11 : i64} {
  func.func @_resident_kernel(%arg0: memref<4x2x128xf32, #tpu.memory_space<vmem>>, %arg1: memref<8x128xbf16, #tpu.memory_space<vmem>>, %arg2: memref<128x128xbf16, #tpu.memory_space<vmem>>, %arg3: memref<1x128xf32, #tpu.memory_space<vmem>>, %arg4: memref<128x128xbf16, #tpu.memory_space<vmem>>, %arg5: memref<1x128xf32, #tpu.memory_space<vmem>>, %arg6: memref<256x128xbf16, #tpu.memory_space<vmem>>, %arg7: memref<1x128xf32, #tpu.memory_space<vmem>>, %arg8: memref<256x512xbf16, #tpu.memory_space<vmem>>, %arg9: memref<1x512xf32, #tpu.memory_space<vmem>>, %arg10: memref<4x256x512xbf16, #tpu.memory_space<vmem>>, %arg11: memref<4x1x512xf32, #tpu.memory_space<vmem>>, %arg12: memref<4x512x128xbf16, #tpu.memory_space<vmem>>, %arg13: memref<4x1x128xf32, #tpu.memory_space<vmem>>, %arg14: memref<4x2x128xf32, #tpu.memory_space<vmem>>, %arg15: memref<2x256xbf16, #tpu.memory_space<vmem>>) attributes {dimension_semantics = [], scalar_prefetch = 0 : i64, scratch_operands = 1 : i64, tpu.core_type = #tpu.core_type<tc>} {
    %c0 = arith.constant 0 : index
    %c0_0 = arith.constant 0 : index
    %c0_1 = arith.constant 0 : index
    %0 = vector.load %arg0[%c0, %c0_0, %c0_1] : memref<4x2x128xf32, #tpu.memory_space<vmem>>, vector<1x2x128xf32>
    %1 = vector.shape_cast %0 : vector<1x2x128xf32> to vector<2x128xf32>
    %c0_2 = arith.constant 0 : index
    %c0_3 = arith.constant 0 : index
    %2 = vector.load %arg1[%c0_2, %c0_3] : memref<8x128xbf16, #tpu.memory_space<vmem>>, vector<8x128xbf16>
    %3 = arith.truncf %1 : vector<2x128xf32> to vector<2x128xbf16>
    %c0_4 = arith.constant 0 : index
    %c0_5 = arith.constant 0 : index
    %4 = vector.load %arg2[%c0_4, %c0_5] : memref<128x128xbf16, #tpu.memory_space<vmem>>, vector<128x128xbf16>
    %cst = arith.constant dense<0.000000e+00> : vector<2x128xf32>
    %5 = tpu.matmul %3, %4, %cst {dimension_numbers = #tpu.dot_dimension_numbers<[1], [0], [0], [1], [0, 0, 1, 1], [], []>} : vector<2x128xbf16>, vector<128x128xbf16>, vector<2x128xf32> -> vector<2x128xf32>
    %c0_6 = arith.constant 0 : index
    %c0_7 = arith.constant 0 : index
    %6 = vector.load %arg3[%c0_6, %c0_7] : memref<1x128xf32, #tpu.memory_space<vmem>>, vector<1x128xf32>
    %7 = vector.broadcast %6 : vector<1x128xf32> to vector<2x128xf32>
    %8 = arith.addf %5, %7 : vector<2x128xf32>
    %c0_8 = arith.constant 0 : index
    %c0_9 = arith.constant 0 : index
    %9 = vector.load %arg4[%c0_8, %c0_9] : memref<128x128xbf16, #tpu.memory_space<vmem>>, vector<128x128xbf16>
    %cst_10 = arith.constant dense<0.000000e+00> : vector<8x128xf32>
    %10 = tpu.matmul %2, %9, %cst_10 {dimension_numbers = #tpu.dot_dimension_numbers<[1], [0], [0], [1], [0, 0, 1, 1], [], []>} : vector<8x128xbf16>, vector<128x128xbf16>, vector<8x128xf32> -> vector<8x128xf32>
    %c0_11 = arith.constant 0 : index
    %c0_12 = arith.constant 0 : index
    %11 = vector.load %arg5[%c0_11, %c0_12] : memref<1x128xf32, #tpu.memory_space<vmem>>, vector<1x128xf32>
    %12 = vector.broadcast %11 : vector<1x128xf32> to vector<8x128xf32>
    %13 = arith.addf %10, %12 : vector<8x128xf32>
    %cst_13 = arith.constant dense<0.000000e+00> : vector<2x8xf32>
    %14 = tpu.matmul %8, %13, %cst_13 {dimension_numbers = #tpu.dot_dimension_numbers<[1], [1], [0], [0], [0, 0, 1, 0], [], []>} : vector<2x128xf32>, vector<8x128xf32>, vector<2x8xf32> -> vector<2x8xf32>
    %cst_14 = arith.constant dense<0xFF800000> : vector<2xf32>
    %15 = vector.multi_reduction <maximumf>, %14, %cst_14 [1] : vector<2x8xf32> to vector<2xf32>
    %16 = vector.shape_cast %15 : vector<2xf32> to vector<2x1xf32>
    %17 = vector.broadcast %16 : vector<2x1xf32> to vector<2x8xf32>
    %18 = arith.subf %14, %17 : vector<2x8xf32>
    %19 = math.exp %18 : vector<2x8xf32>
    %cst_15 = arith.constant dense<0.000000e+00> : vector<2xf32>
    %20 = vector.multi_reduction <add>, %19, %cst_15 [1] : vector<2x8xf32> to vector<2xf32>
    %21 = vector.shape_cast %20 : vector<2xf32> to vector<2x1xf32>
    %22 = tpu.reciprocal %21 {approx = true} : vector<2x1xf32> -> vector<2x1xf32>
    %23 = vector.broadcast %22 : vector<2x1xf32> to vector<2x8xf32>
    %24 = arith.mulf %19, %23 : vector<2x8xf32>
    %25 = arith.truncf %24 : vector<2x8xf32> to vector<2x8xbf16>
    %cst_16 = arith.constant dense<0.000000e+00> : vector<2x128xf32>
    %26 = tpu.matmul %25, %2, %cst_16 {dimension_numbers = #tpu.dot_dimension_numbers<[1], [0], [0], [1], [0, 0, 1, 1], [], []>} : vector<2x8xbf16>, vector<8x128xbf16>, vector<2x128xf32> -> vector<2x128xf32>
    %27 = arith.truncf %1 : vector<2x128xf32> to vector<2x128xbf16>
    %c0_17 = arith.constant 0 : index
    %c0_18 = arith.constant 0 : index
    %28 = vector.load %arg15[%c0_17, %c0_18] : memref<2x256xbf16, #tpu.memory_space<vmem>>, vector<2x128xbf16>
    tpu.vector_store %arg15[%c0_17, %c0_18], %27 {strides = array<i32>} : memref<2x256xbf16, #tpu.memory_space<vmem>>, vector<2x128xbf16>,
    %29 = arith.truncf %26 : vector<2x128xf32> to vector<2x128xbf16>
    %c0_19 = arith.constant 0 : index
    %c128 = arith.constant 128 : index
    %30 = vector.load %arg15[%c0_19, %c128] : memref<2x256xbf16, #tpu.memory_space<vmem>>, vector<2x128xbf16>
    tpu.vector_store %arg15[%c0_19, %c128], %29 {strides = array<i32>} : memref<2x256xbf16, #tpu.memory_space<vmem>>, vector<2x128xbf16>,
    %c0_20 = arith.constant 0 : index
    %c0_21 = arith.constant 0 : index
    %31 = vector.load %arg15[%c0_20, %c0_21] : memref<2x256xbf16, #tpu.memory_space<vmem>>, vector<2x256xbf16>
    %c0_22 = arith.constant 0 : index
    %c0_23 = arith.constant 0 : index
    %32 = vector.load %arg6[%c0_22, %c0_23] : memref<256x128xbf16, #tpu.memory_space<vmem>>, vector<256x128xbf16>
    %cst_24 = arith.constant dense<0.000000e+00> : vector<2x128xf32>
    %33 = tpu.matmul %31, %32, %cst_24 {dimension_numbers = #tpu.dot_dimension_numbers<[1], [0], [0], [1], [0, 0, 1, 1], [], []>} : vector<2x256xbf16>, vector<256x128xbf16>, vector<2x128xf32> -> vector<2x128xf32>
    %c0_25 = arith.constant 0 : index
    %c0_26 = arith.constant 0 : index
    %34 = vector.load %arg7[%c0_25, %c0_26] : memref<1x128xf32, #tpu.memory_space<vmem>>, vector<1x128xf32>
    %35 = vector.broadcast %34 : vector<1x128xf32> to vector<2x128xf32>
    %36 = arith.addf %33, %35 : vector<2x128xf32>
    %37 = arith.truncf %36 : vector<2x128xf32> to vector<2x128xbf16>
    %c0_27 = arith.constant 0 : index
    %c0_28 = arith.constant 0 : index
    %38 = vector.load %arg15[%c0_27, %c0_28] : memref<2x256xbf16, #tpu.memory_space<vmem>>, vector<2x128xbf16>
    tpu.vector_store %arg15[%c0_27, %c0_28], %37 {strides = array<i32>} : memref<2x256xbf16, #tpu.memory_space<vmem>>, vector<2x128xbf16>,
    %cst_29 = arith.constant 0.000000e+00 : f32
    %39 = vector.broadcast %cst_29 : f32 to vector<2x128xf32>
    %cst_30 = arith.constant 0.000000e+00 : f32
    %40 = vector.broadcast %cst_30 : f32 to vector<2x128xf32>
    %c0_i32 = arith.constant 0 : i32
    %c0_i32_31 = arith.constant 0 : i32
    %41 = arith.cmpi eq, %c0_i32, %c0_i32_31 : i32
    %42 = arith.index_cast %c0_i32 : i32 to index
    %c0_32 = arith.constant 0 : index
    %c0_33 = arith.constant 0 : index
    %43 = vector.load %arg0[%42, %c0_32, %c0_33] : memref<4x2x128xf32, #tpu.memory_space<vmem>>, vector<1x2x128xf32>
    %44 = vector.shape_cast %43 : vector<1x2x128xf32> to vector<2x128xf32>
    %45 = arith.select %41, %36, %44 : vector<2x128xf32>
    %46 = arith.truncf %45 : vector<2x128xf32> to vector<2x128xbf16>
    %c0_34 = arith.constant 0 : index
    %c0_35 = arith.constant 0 : index
    %47 = vector.load %arg15[%c0_34, %c0_35] : memref<2x256xbf16, #tpu.memory_space<vmem>>, vector<2x128xbf16>
    tpu.vector_store %arg15[%c0_34, %c0_35], %46 {strides = array<i32>} : memref<2x256xbf16, #tpu.memory_space<vmem>>, vector<2x128xbf16>,
    %48 = arith.truncf %39 : vector<2x128xf32> to vector<2x128xbf16>
    %c0_36 = arith.constant 0 : index
    %c128_37 = arith.constant 128 : index
    %49 = vector.load %arg15[%c0_36, %c128_37] : memref<2x256xbf16, #tpu.memory_space<vmem>>, vector<2x128xbf16>
    tpu.vector_store %arg15[%c0_36, %c128_37], %48 {strides = array<i32>} : memref<2x256xbf16, #tpu.memory_space<vmem>>, vector<2x128xbf16>,
    %c0_38 = arith.constant 0 : index
    %c0_39 = arith.constant 0 : index
    %50 = vector.load %arg15[%c0_38, %c0_39] : memref<2x256xbf16, #tpu.memory_space<vmem>>, vector<2x256xbf16>
    %c0_40 = arith.constant 0 : index
    %c0_41 = arith.constant 0 : index
    %51 = vector.load %arg8[%c0_40, %c0_41] : memref<256x512xbf16, #tpu.memory_space<vmem>>, vector<256x512xbf16>
    %cst_42 = arith.constant dense<0.000000e+00> : vector<2x512xf32>
    %52 = tpu.matmul %50, %51, %cst_42 {dimension_numbers = #tpu.dot_dimension_numbers<[1], [0], [0], [1], [0, 0, 1, 1], [], []>} : vector<2x256xbf16>, vector<256x512xbf16>, vector<2x512xf32> -> vector<2x512xf32>
    %c0_43 = arith.constant 0 : index
    %c0_44 = arith.constant 0 : index
    %53 = vector.load %arg9[%c0_43, %c0_44] : memref<1x512xf32, #tpu.memory_space<vmem>>, vector<1x512xf32>
    %54 = vector.broadcast %53 : vector<1x512xf32> to vector<2x512xf32>
    %55 = arith.addf %52, %54 : vector<2x512xf32>
    %56 = vector.extract_strided_slice %55 {offsets = [0, 0], sizes = [2, 128], strides = [1, 1]} : vector<2x512xf32> to vector<2x128xf32>
    %57 = arith.negf %56 : vector<2x128xf32>
    %58 = math.exp %57 : vector<2x128xf32>
    %cst_45 = arith.constant 1.000000e+00 : f32
    %59 = vector.broadcast %cst_45 : f32 to vector<2x128xf32>
    %60 = arith.addf %59, %58 : vector<2x128xf32>
    %61 = arith.divf %59, %60 : vector<2x128xf32>
    %62 = vector.extract_strided_slice %55 {offsets = [0, 128], sizes = [2, 128], strides = [1, 1]} : vector<2x512xf32> to vector<2x128xf32>
    %63 = arith.negf %62 : vector<2x128xf32>
    %64 = math.exp %63 : vector<2x128xf32>
    %cst_46 = arith.constant 1.000000e+00 : f32
    %65 = vector.broadcast %cst_46 : f32 to vector<2x128xf32>
    %66 = arith.addf %65, %64 : vector<2x128xf32>
    %67 = arith.divf %65, %66 : vector<2x128xf32>
    %68 = vector.extract_strided_slice %55 {offsets = [0, 256], sizes = [2, 128], strides = [1, 1]} : vector<2x512xf32> to vector<2x128xf32>
    %69 = math.tanh %68 : vector<2x128xf32>
    %70 = vector.extract_strided_slice %55 {offsets = [0, 384], sizes = [2, 128], strides = [1, 1]} : vector<2x512xf32> to vector<2x128xf32>
    %71 = arith.negf %70 : vector<2x128xf32>
    %72 = math.exp %71 : vector<2x128xf32>
    %cst_47 = arith.constant 1.000000e+00 : f32
    %73 = vector.broadcast %cst_47 : f32 to vector<2x128xf32>
    %74 = arith.addf %73, %72 : vector<2x128xf32>
    %75 = arith.divf %73, %74 : vector<2x128xf32>
    %76 = arith.mulf %67, %40 : vector<2x128xf32>
    %77 = arith.mulf %61, %69 : vector<2x128xf32>
    %78 = arith.addf %76, %77 : vector<2x128xf32>
    %79 = math.tanh %78 : vector<2x128xf32>
    %80 = arith.mulf %75, %79 : vector<2x128xf32>
    %81 = arith.truncf %80 : vector<2x128xf32> to vector<2x128xbf16>
    %c0_48 = arith.constant 0 : index
    %c128_49 = arith.constant 128 : index
    %82 = vector.load %arg15[%c0_48, %c128_49] : memref<2x256xbf16, #tpu.memory_space<vmem>>, vector<2x128xbf16>
    tpu.vector_store %arg15[%c0_48, %c128_49], %81 {strides = array<i32>} : memref<2x256xbf16, #tpu.memory_space<vmem>>, vector<2x128xbf16>,
    %c0_50 = arith.constant 0 : index
    %c0_51 = arith.constant 0 : index
    %83 = vector.load %arg15[%c0_50, %c0_51] : memref<2x256xbf16, #tpu.memory_space<vmem>>, vector<2x256xbf16>
    %84 = arith.index_cast %c0_i32 : i32 to index
    %c0_52 = arith.constant 0 : index
    %c0_53 = arith.constant 0 : index
    %85 = vector.load %arg10[%84, %c0_52, %c0_53] : memref<4x256x512xbf16, #tpu.memory_space<vmem>>, vector<1x256x512xbf16>
    %86 = vector.shape_cast %85 : vector<1x256x512xbf16> to vector<256x512xbf16>
    %cst_54 = arith.constant dense<0.000000e+00> : vector<2x512xf32>
    %87 = tpu.matmul %83, %86, %cst_54 {dimension_numbers = #tpu.dot_dimension_numbers<[1], [0], [0], [1], [0, 0, 1, 1], [], []>} : vector<2x256xbf16>, vector<256x512xbf16>, vector<2x512xf32> -> vector<2x512xf32>
    %88 = arith.index_cast %c0_i32 : i32 to index
    %c0_55 = arith.constant 0 : index
    %c0_56 = arith.constant 0 : index
    %89 = vector.load %arg11[%88, %c0_55, %c0_56] : memref<4x1x512xf32, #tpu.memory_space<vmem>>, vector<1x1x512xf32>
    %90 = vector.shape_cast %89 : vector<1x1x512xf32> to vector<1x512xf32>
    %91 = vector.broadcast %90 : vector<1x512xf32> to vector<2x512xf32>
    %92 = arith.addf %87, %91 : vector<2x512xf32>
    %cst_57 = arith.constant 0.000000e+00 : f32
    %93 = vector.broadcast %cst_57 : f32 to vector<2x512xf32>
    %94 = arith.maximumf %92, %93 : vector<2x512xf32>
    %95 = arith.truncf %94 : vector<2x512xf32> to vector<2x512xbf16>
    %96 = arith.index_cast %c0_i32 : i32 to index
    %c0_58 = arith.constant 0 : index
    %c0_59 = arith.constant 0 : index
    %97 = vector.load %arg12[%96, %c0_58, %c0_59] : memref<4x512x128xbf16, #tpu.memory_space<vmem>>, vector<1x512x128xbf16>
    %98 = vector.shape_cast %97 : vector<1x512x128xbf16> to vector<512x128xbf16>
    %cst_60 = arith.constant dense<0.000000e+00> : vector<2x128xf32>
    %99 = tpu.matmul %95, %98, %cst_60 {dimension_numbers = #tpu.dot_dimension_numbers<[1], [0], [0], [1], [0, 0, 1, 1], [], []>} : vector<2x512xbf16>, vector<512x128xbf16>, vector<2x128xf32> -> vector<2x128xf32>
    %100 = arith.index_cast %c0_i32 : i32 to index
    %c0_61 = arith.constant 0 : index
    %c0_62 = arith.constant 0 : index
    %101 = vector.load %arg13[%100, %c0_61, %c0_62] : memref<4x1x128xf32, #tpu.memory_space<vmem>>, vector<1x1x128xf32>
    %102 = vector.shape_cast %101 : vector<1x1x128xf32> to vector<1x128xf32>
    %103 = vector.broadcast %102 : vector<1x128xf32> to vector<2x128xf32>
    %104 = arith.addf %99, %103 : vector<2x128xf32>
    %105 = arith.index_cast %c0_i32 : i32 to index
    %c0_63 = arith.constant 0 : index
    %c0_64 = arith.constant 0 : index
    %106 = vector.load %arg14[%105, %c0_63, %c0_64] : memref<4x2x128xf32, #tpu.memory_space<vmem>>, vector<1x2x128xf32>
    %107 = vector.shape_cast %106 : vector<1x2x128xf32> to vector<2x128xf32>
    %108 = vector.shape_cast %104 : vector<2x128xf32> to vector<1x2x128xf32>
    tpu.vector_store %arg14[%105, %c0_63, %c0_64], %108 {strides = array<i32>} : memref<4x2x128xf32, #tpu.memory_space<vmem>>, vector<1x2x128xf32>,
    %c1_i32 = arith.constant 1 : i32
    %c0_i32_65 = arith.constant 0 : i32
    %109 = arith.cmpi eq, %c1_i32, %c0_i32_65 : i32
    %110 = arith.index_cast %c1_i32 : i32 to index
    %c0_66 = arith.constant 0 : index
    %c0_67 = arith.constant 0 : index
    %111 = vector.load %arg0[%110, %c0_66, %c0_67] : memref<4x2x128xf32, #tpu.memory_space<vmem>>, vector<1x2x128xf32>
    %112 = vector.shape_cast %111 : vector<1x2x128xf32> to vector<2x128xf32>
    %113 = arith.select %109, %36, %112 : vector<2x128xf32>
    %114 = arith.truncf %113 : vector<2x128xf32> to vector<2x128xbf16>
    %c0_68 = arith.constant 0 : index
    %c0_69 = arith.constant 0 : index
    %115 = vector.load %arg15[%c0_68, %c0_69] : memref<2x256xbf16, #tpu.memory_space<vmem>>, vector<2x128xbf16>
    tpu.vector_store %arg15[%c0_68, %c0_69], %114 {strides = array<i32>} : memref<2x256xbf16, #tpu.memory_space<vmem>>, vector<2x128xbf16>,
    %116 = arith.truncf %80 : vector<2x128xf32> to vector<2x128xbf16>
    %c0_70 = arith.constant 0 : index
    %c128_71 = arith.constant 128 : index
    %117 = vector.load %arg15[%c0_70, %c128_71] : memref<2x256xbf16, #tpu.memory_space<vmem>>, vector<2x128xbf16>
    tpu.vector_store %arg15[%c0_70, %c128_71], %116 {strides = array<i32>} : memref<2x256xbf16, #tpu.memory_space<vmem>>, vector<2x128xbf16>,
    %c0_72 = arith.constant 0 : index
    %c0_73 = arith.constant 0 : index
    %118 = vector.load %arg15[%c0_72, %c0_73] : memref<2x256xbf16, #tpu.memory_space<vmem>>, vector<2x256xbf16>
    %c0_74 = arith.constant 0 : index
    %c0_75 = arith.constant 0 : index
    %119 = vector.load %arg8[%c0_74, %c0_75] : memref<256x512xbf16, #tpu.memory_space<vmem>>, vector<256x512xbf16>
    %cst_76 = arith.constant dense<0.000000e+00> : vector<2x512xf32>
    %120 = tpu.matmul %118, %119, %cst_76 {dimension_numbers = #tpu.dot_dimension_numbers<[1], [0], [0], [1], [0, 0, 1, 1], [], []>} : vector<2x256xbf16>, vector<256x512xbf16>, vector<2x512xf32> -> vector<2x512xf32>
    %c0_77 = arith.constant 0 : index
    %c0_78 = arith.constant 0 : index
    %121 = vector.load %arg9[%c0_77, %c0_78] : memref<1x512xf32, #tpu.memory_space<vmem>>, vector<1x512xf32>
    %122 = vector.broadcast %121 : vector<1x512xf32> to vector<2x512xf32>
    %123 = arith.addf %120, %122 : vector<2x512xf32>
    %124 = vector.extract_strided_slice %123 {offsets = [0, 0], sizes = [2, 128], strides = [1, 1]} : vector<2x512xf32> to vector<2x128xf32>
    %125 = arith.negf %124 : vector<2x128xf32>
    %126 = math.exp %125 : vector<2x128xf32>
    %cst_79 = arith.constant 1.000000e+00 : f32
    %127 = vector.broadcast %cst_79 : f32 to vector<2x128xf32>
    %128 = arith.addf %127, %126 : vector<2x128xf32>
    %129 = arith.divf %127, %128 : vector<2x128xf32>
    %130 = vector.extract_strided_slice %123 {offsets = [0, 128], sizes = [2, 128], strides = [1, 1]} : vector<2x512xf32> to vector<2x128xf32>
    %131 = arith.negf %130 : vector<2x128xf32>
    %132 = math.exp %131 : vector<2x128xf32>
    %cst_80 = arith.constant 1.000000e+00 : f32
    %133 = vector.broadcast %cst_80 : f32 to vector<2x128xf32>
    %134 = arith.addf %133, %132 : vector<2x128xf32>
    %135 = arith.divf %133, %134 : vector<2x128xf32>
    %136 = vector.extract_strided_slice %123 {offsets = [0, 256], sizes = [2, 128], strides = [1, 1]} : vector<2x512xf32> to vector<2x128xf32>
    %137 = math.tanh %136 : vector<2x128xf32>
    %138 = vector.extract_strided_slice %123 {offsets = [0, 384], sizes = [2, 128], strides = [1, 1]} : vector<2x512xf32> to vector<2x128xf32>
    %139 = arith.negf %138 : vector<2x128xf32>
    %140 = math.exp %139 : vector<2x128xf32>
    %cst_81 = arith.constant 1.000000e+00 : f32
    %141 = vector.broadcast %cst_81 : f32 to vector<2x128xf32>
    %142 = arith.addf %141, %140 : vector<2x128xf32>
    %143 = arith.divf %141, %142 : vector<2x128xf32>
    %144 = arith.mulf %135, %78 : vector<2x128xf32>
    %145 = arith.mulf %129, %137 : vector<2x128xf32>
    %146 = arith.addf %144, %145 : vector<2x128xf32>
    %147 = math.tanh %146 : vector<2x128xf32>
    %148 = arith.mulf %143, %147 : vector<2x128xf32>
    %149 = arith.truncf %148 : vector<2x128xf32> to vector<2x128xbf16>
    %c0_82 = arith.constant 0 : index
    %c128_83 = arith.constant 128 : index
    %150 = vector.load %arg15[%c0_82, %c128_83] : memref<2x256xbf16, #tpu.memory_space<vmem>>, vector<2x128xbf16>
    tpu.vector_store %arg15[%c0_82, %c128_83], %149 {strides = array<i32>} : memref<2x256xbf16, #tpu.memory_space<vmem>>, vector<2x128xbf16>,
    %c0_84 = arith.constant 0 : index
    %c0_85 = arith.constant 0 : index
    %151 = vector.load %arg15[%c0_84, %c0_85] : memref<2x256xbf16, #tpu.memory_space<vmem>>, vector<2x256xbf16>
    %152 = arith.index_cast %c1_i32 : i32 to index
    %c0_86 = arith.constant 0 : index
    %c0_87 = arith.constant 0 : index
    %153 = vector.load %arg10[%152, %c0_86, %c0_87] : memref<4x256x512xbf16, #tpu.memory_space<vmem>>, vector<1x256x512xbf16>
    %154 = vector.shape_cast %153 : vector<1x256x512xbf16> to vector<256x512xbf16>
    %cst_88 = arith.constant dense<0.000000e+00> : vector<2x512xf32>
    %155 = tpu.matmul %151, %154, %cst_88 {dimension_numbers = #tpu.dot_dimension_numbers<[1], [0], [0], [1], [0, 0, 1, 1], [], []>} : vector<2x256xbf16>, vector<256x512xbf16>, vector<2x512xf32> -> vector<2x512xf32>
    %156 = arith.index_cast %c1_i32 : i32 to index
    %c0_89 = arith.constant 0 : index
    %c0_90 = arith.constant 0 : index
    %157 = vector.load %arg11[%156, %c0_89, %c0_90] : memref<4x1x512xf32, #tpu.memory_space<vmem>>, vector<1x1x512xf32>
    %158 = vector.shape_cast %157 : vector<1x1x512xf32> to vector<1x512xf32>
    %159 = vector.broadcast %158 : vector<1x512xf32> to vector<2x512xf32>
    %160 = arith.addf %155, %159 : vector<2x512xf32>
    %cst_91 = arith.constant 0.000000e+00 : f32
    %161 = vector.broadcast %cst_91 : f32 to vector<2x512xf32>
    %162 = arith.maximumf %160, %161 : vector<2x512xf32>
    %163 = arith.truncf %162 : vector<2x512xf32> to vector<2x512xbf16>
    %164 = arith.index_cast %c1_i32 : i32 to index
    %c0_92 = arith.constant 0 : index
    %c0_93 = arith.constant 0 : index
    %165 = vector.load %arg12[%164, %c0_92, %c0_93] : memref<4x512x128xbf16, #tpu.memory_space<vmem>>, vector<1x512x128xbf16>
    %166 = vector.shape_cast %165 : vector<1x512x128xbf16> to vector<512x128xbf16>
    %cst_94 = arith.constant dense<0.000000e+00> : vector<2x128xf32>
    %167 = tpu.matmul %163, %166, %cst_94 {dimension_numbers = #tpu.dot_dimension_numbers<[1], [0], [0], [1], [0, 0, 1, 1], [], []>} : vector<2x512xbf16>, vector<512x128xbf16>, vector<2x128xf32> -> vector<2x128xf32>
    %168 = arith.index_cast %c1_i32 : i32 to index
    %c0_95 = arith.constant 0 : index
    %c0_96 = arith.constant 0 : index
    %169 = vector.load %arg13[%168, %c0_95, %c0_96] : memref<4x1x128xf32, #tpu.memory_space<vmem>>, vector<1x1x128xf32>
    %170 = vector.shape_cast %169 : vector<1x1x128xf32> to vector<1x128xf32>
    %171 = vector.broadcast %170 : vector<1x128xf32> to vector<2x128xf32>
    %172 = arith.addf %167, %171 : vector<2x128xf32>
    %173 = arith.index_cast %c1_i32 : i32 to index
    %c0_97 = arith.constant 0 : index
    %c0_98 = arith.constant 0 : index
    %174 = vector.load %arg14[%173, %c0_97, %c0_98] : memref<4x2x128xf32, #tpu.memory_space<vmem>>, vector<1x2x128xf32>
    %175 = vector.shape_cast %174 : vector<1x2x128xf32> to vector<2x128xf32>
    %176 = vector.shape_cast %172 : vector<2x128xf32> to vector<1x2x128xf32>
    tpu.vector_store %arg14[%173, %c0_97, %c0_98], %176 {strides = array<i32>} : memref<4x2x128xf32, #tpu.memory_space<vmem>>, vector<1x2x128xf32>,
    %c2_i32 = arith.constant 2 : i32
    %c0_i32_99 = arith.constant 0 : i32
    %177 = arith.cmpi eq, %c2_i32, %c0_i32_99 : i32
    %178 = arith.index_cast %c2_i32 : i32 to index
    %c0_100 = arith.constant 0 : index
    %c0_101 = arith.constant 0 : index
    %179 = vector.load %arg0[%178, %c0_100, %c0_101] : memref<4x2x128xf32, #tpu.memory_space<vmem>>, vector<1x2x128xf32>
    %180 = vector.shape_cast %179 : vector<1x2x128xf32> to vector<2x128xf32>
    %181 = arith.select %177, %36, %180 : vector<2x128xf32>
    %182 = arith.truncf %181 : vector<2x128xf32> to vector<2x128xbf16>
    %c0_102 = arith.constant 0 : index
    %c0_103 = arith.constant 0 : index
    %183 = vector.load %arg15[%c0_102, %c0_103] : memref<2x256xbf16, #tpu.memory_space<vmem>>, vector<2x128xbf16>
    tpu.vector_store %arg15[%c0_102, %c0_103], %182 {strides = array<i32>} : memref<2x256xbf16, #tpu.memory_space<vmem>>, vector<2x128xbf16>,
    %184 = arith.truncf %148 : vector<2x128xf32> to vector<2x128xbf16>
    %c0_104 = arith.constant 0 : index
    %c128_105 = arith.constant 128 : index
    %185 = vector.load %arg15[%c0_104, %c128_105] : memref<2x256xbf16, #tpu.memory_space<vmem>>, vector<2x128xbf16>
    tpu.vector_store %arg15[%c0_104, %c128_105], %184 {strides = array<i32>} : memref<2x256xbf16, #tpu.memory_space<vmem>>, vector<2x128xbf16>,
    %c0_106 = arith.constant 0 : index
    %c0_107 = arith.constant 0 : index
    %186 = vector.load %arg15[%c0_106, %c0_107] : memref<2x256xbf16, #tpu.memory_space<vmem>>, vector<2x256xbf16>
    %c0_108 = arith.constant 0 : index
    %c0_109 = arith.constant 0 : index
    %187 = vector.load %arg8[%c0_108, %c0_109] : memref<256x512xbf16, #tpu.memory_space<vmem>>, vector<256x512xbf16>
    %cst_110 = arith.constant dense<0.000000e+00> : vector<2x512xf32>
    %188 = tpu.matmul %186, %187, %cst_110 {dimension_numbers = #tpu.dot_dimension_numbers<[1], [0], [0], [1], [0, 0, 1, 1], [], []>} : vector<2x256xbf16>, vector<256x512xbf16>, vector<2x512xf32> -> vector<2x512xf32>
    %c0_111 = arith.constant 0 : index
    %c0_112 = arith.constant 0 : index
    %189 = vector.load %arg9[%c0_111, %c0_112] : memref<1x512xf32, #tpu.memory_space<vmem>>, vector<1x512xf32>
    %190 = vector.broadcast %189 : vector<1x512xf32> to vector<2x512xf32>
    %191 = arith.addf %188, %190 : vector<2x512xf32>
    %192 = vector.extract_strided_slice %191 {offsets = [0, 0], sizes = [2, 128], strides = [1, 1]} : vector<2x512xf32> to vector<2x128xf32>
    %193 = arith.negf %192 : vector<2x128xf32>
    %194 = math.exp %193 : vector<2x128xf32>
    %cst_113 = arith.constant 1.000000e+00 : f32
    %195 = vector.broadcast %cst_113 : f32 to vector<2x128xf32>
    %196 = arith.addf %195, %194 : vector<2x128xf32>
    %197 = arith.divf %195, %196 : vector<2x128xf32>
    %198 = vector.extract_strided_slice %191 {offsets = [0, 128], sizes = [2, 128], strides = [1, 1]} : vector<2x512xf32> to vector<2x128xf32>
    %199 = arith.negf %198 : vector<2x128xf32>
    %200 = math.exp %199 : vector<2x128xf32>
    %cst_114 = arith.constant 1.000000e+00 : f32
    %201 = vector.broadcast %cst_114 : f32 to vector<2x128xf32>
    %202 = arith.addf %201, %200 : vector<2x128xf32>
    %203 = arith.divf %201, %202 : vector<2x128xf32>
    %204 = vector.extract_strided_slice %191 {offsets = [0, 256], sizes = [2, 128], strides = [1, 1]} : vector<2x512xf32> to vector<2x128xf32>
    %205 = math.tanh %204 : vector<2x128xf32>
    %206 = vector.extract_strided_slice %191 {offsets = [0, 384], sizes = [2, 128], strides = [1, 1]} : vector<2x512xf32> to vector<2x128xf32>
    %207 = arith.negf %206 : vector<2x128xf32>
    %208 = math.exp %207 : vector<2x128xf32>
    %cst_115 = arith.constant 1.000000e+00 : f32
    %209 = vector.broadcast %cst_115 : f32 to vector<2x128xf32>
    %210 = arith.addf %209, %208 : vector<2x128xf32>
    %211 = arith.divf %209, %210 : vector<2x128xf32>
    %212 = arith.mulf %203, %146 : vector<2x128xf32>
    %213 = arith.mulf %197, %205 : vector<2x128xf32>
    %214 = arith.addf %212, %213 : vector<2x128xf32>
    %215 = math.tanh %214 : vector<2x128xf32>
    %216 = arith.mulf %211, %215 : vector<2x128xf32>
    %217 = arith.truncf %216 : vector<2x128xf32> to vector<2x128xbf16>
    %c0_116 = arith.constant 0 : index
    %c128_117 = arith.constant 128 : index
    %218 = vector.load %arg15[%c0_116, %c128_117] : memref<2x256xbf16, #tpu.memory_space<vmem>>, vector<2x128xbf16>
    tpu.vector_store %arg15[%c0_116, %c128_117], %217 {strides = array<i32>} : memref<2x256xbf16, #tpu.memory_space<vmem>>, vector<2x128xbf16>,
    %c0_118 = arith.constant 0 : index
    %c0_119 = arith.constant 0 : index
    %219 = vector.load %arg15[%c0_118, %c0_119] : memref<2x256xbf16, #tpu.memory_space<vmem>>, vector<2x256xbf16>
    %220 = arith.index_cast %c2_i32 : i32 to index
    %c0_120 = arith.constant 0 : index
    %c0_121 = arith.constant 0 : index
    %221 = vector.load %arg10[%220, %c0_120, %c0_121] : memref<4x256x512xbf16, #tpu.memory_space<vmem>>, vector<1x256x512xbf16>
    %222 = vector.shape_cast %221 : vector<1x256x512xbf16> to vector<256x512xbf16>
    %cst_122 = arith.constant dense<0.000000e+00> : vector<2x512xf32>
    %223 = tpu.matmul %219, %222, %cst_122 {dimension_numbers = #tpu.dot_dimension_numbers<[1], [0], [0], [1], [0, 0, 1, 1], [], []>} : vector<2x256xbf16>, vector<256x512xbf16>, vector<2x512xf32> -> vector<2x512xf32>
    %224 = arith.index_cast %c2_i32 : i32 to index
    %c0_123 = arith.constant 0 : index
    %c0_124 = arith.constant 0 : index
    %225 = vector.load %arg11[%224, %c0_123, %c0_124] : memref<4x1x512xf32, #tpu.memory_space<vmem>>, vector<1x1x512xf32>
    %226 = vector.shape_cast %225 : vector<1x1x512xf32> to vector<1x512xf32>
    %227 = vector.broadcast %226 : vector<1x512xf32> to vector<2x512xf32>
    %228 = arith.addf %223, %227 : vector<2x512xf32>
    %cst_125 = arith.constant 0.000000e+00 : f32
    %229 = vector.broadcast %cst_125 : f32 to vector<2x512xf32>
    %230 = arith.maximumf %228, %229 : vector<2x512xf32>
    %231 = arith.truncf %230 : vector<2x512xf32> to vector<2x512xbf16>
    %232 = arith.index_cast %c2_i32 : i32 to index
    %c0_126 = arith.constant 0 : index
    %c0_127 = arith.constant 0 : index
    %233 = vector.load %arg12[%232, %c0_126, %c0_127] : memref<4x512x128xbf16, #tpu.memory_space<vmem>>, vector<1x512x128xbf16>
    %234 = vector.shape_cast %233 : vector<1x512x128xbf16> to vector<512x128xbf16>
    %cst_128 = arith.constant dense<0.000000e+00> : vector<2x128xf32>
    %235 = tpu.matmul %231, %234, %cst_128 {dimension_numbers = #tpu.dot_dimension_numbers<[1], [0], [0], [1], [0, 0, 1, 1], [], []>} : vector<2x512xbf16>, vector<512x128xbf16>, vector<2x128xf32> -> vector<2x128xf32>
    %236 = arith.index_cast %c2_i32 : i32 to index
    %c0_129 = arith.constant 0 : index
    %c0_130 = arith.constant 0 : index
    %237 = vector.load %arg13[%236, %c0_129, %c0_130] : memref<4x1x128xf32, #tpu.memory_space<vmem>>, vector<1x1x128xf32>
    %238 = vector.shape_cast %237 : vector<1x1x128xf32> to vector<1x128xf32>
    %239 = vector.broadcast %238 : vector<1x128xf32> to vector<2x128xf32>
    %240 = arith.addf %235, %239 : vector<2x128xf32>
    %241 = arith.index_cast %c2_i32 : i32 to index
    %c0_131 = arith.constant 0 : index
    %c0_132 = arith.constant 0 : index
    %242 = vector.load %arg14[%241, %c0_131, %c0_132] : memref<4x2x128xf32, #tpu.memory_space<vmem>>, vector<1x2x128xf32>
    %243 = vector.shape_cast %242 : vector<1x2x128xf32> to vector<2x128xf32>
    %244 = vector.shape_cast %240 : vector<2x128xf32> to vector<1x2x128xf32>
    tpu.vector_store %arg14[%241, %c0_131, %c0_132], %244 {strides = array<i32>} : memref<4x2x128xf32, #tpu.memory_space<vmem>>, vector<1x2x128xf32>,
    %c3_i32 = arith.constant 3 : i32
    %c0_i32_133 = arith.constant 0 : i32
    %245 = arith.cmpi eq, %c3_i32, %c0_i32_133 : i32
    %246 = arith.index_cast %c3_i32 : i32 to index
    %c0_134 = arith.constant 0 : index
    %c0_135 = arith.constant 0 : index
    %247 = vector.load %arg0[%246, %c0_134, %c0_135] : memref<4x2x128xf32, #tpu.memory_space<vmem>>, vector<1x2x128xf32>
    %248 = vector.shape_cast %247 : vector<1x2x128xf32> to vector<2x128xf32>
    %249 = arith.select %245, %36, %248 : vector<2x128xf32>
    %250 = arith.truncf %249 : vector<2x128xf32> to vector<2x128xbf16>
    %c0_136 = arith.constant 0 : index
    %c0_137 = arith.constant 0 : index
    %251 = vector.load %arg15[%c0_136, %c0_137] : memref<2x256xbf16, #tpu.memory_space<vmem>>, vector<2x128xbf16>
    tpu.vector_store %arg15[%c0_136, %c0_137], %250 {strides = array<i32>} : memref<2x256xbf16, #tpu.memory_space<vmem>>, vector<2x128xbf16>,
    %252 = arith.truncf %216 : vector<2x128xf32> to vector<2x128xbf16>
    %c0_138 = arith.constant 0 : index
    %c128_139 = arith.constant 128 : index
    %253 = vector.load %arg15[%c0_138, %c128_139] : memref<2x256xbf16, #tpu.memory_space<vmem>>, vector<2x128xbf16>
    tpu.vector_store %arg15[%c0_138, %c128_139], %252 {strides = array<i32>} : memref<2x256xbf16, #tpu.memory_space<vmem>>, vector<2x128xbf16>,
    %c0_140 = arith.constant 0 : index
    %c0_141 = arith.constant 0 : index
    %254 = vector.load %arg15[%c0_140, %c0_141] : memref<2x256xbf16, #tpu.memory_space<vmem>>, vector<2x256xbf16>
    %c0_142 = arith.constant 0 : index
    %c0_143 = arith.constant 0 : index
    %255 = vector.load %arg8[%c0_142, %c0_143] : memref<256x512xbf16, #tpu.memory_space<vmem>>, vector<256x512xbf16>
    %cst_144 = arith.constant dense<0.000000e+00> : vector<2x512xf32>
    %256 = tpu.matmul %254, %255, %cst_144 {dimension_numbers = #tpu.dot_dimension_numbers<[1], [0], [0], [1], [0, 0, 1, 1], [], []>} : vector<2x256xbf16>, vector<256x512xbf16>, vector<2x512xf32> -> vector<2x512xf32>
    %c0_145 = arith.constant 0 : index
    %c0_146 = arith.constant 0 : index
    %257 = vector.load %arg9[%c0_145, %c0_146] : memref<1x512xf32, #tpu.memory_space<vmem>>, vector<1x512xf32>
    %258 = vector.broadcast %257 : vector<1x512xf32> to vector<2x512xf32>
    %259 = arith.addf %256, %258 : vector<2x512xf32>
    %260 = vector.extract_strided_slice %259 {offsets = [0, 0], sizes = [2, 128], strides = [1, 1]} : vector<2x512xf32> to vector<2x128xf32>
    %261 = arith.negf %260 : vector<2x128xf32>
    %262 = math.exp %261 : vector<2x128xf32>
    %cst_147 = arith.constant 1.000000e+00 : f32
    %263 = vector.broadcast %cst_147 : f32 to vector<2x128xf32>
    %264 = arith.addf %263, %262 : vector<2x128xf32>
    %265 = arith.divf %263, %264 : vector<2x128xf32>
    %266 = vector.extract_strided_slice %259 {offsets = [0, 128], sizes = [2, 128], strides = [1, 1]} : vector<2x512xf32> to vector<2x128xf32>
    %267 = arith.negf %266 : vector<2x128xf32>
    %268 = math.exp %267 : vector<2x128xf32>
    %cst_148 = arith.constant 1.000000e+00 : f32
    %269 = vector.broadcast %cst_148 : f32 to vector<2x128xf32>
    %270 = arith.addf %269, %268 : vector<2x128xf32>
    %271 = arith.divf %269, %270 : vector<2x128xf32>
    %272 = vector.extract_strided_slice %259 {offsets = [0, 256], sizes = [2, 128], strides = [1, 1]} : vector<2x512xf32> to vector<2x128xf32>
    %273 = math.tanh %272 : vector<2x128xf32>
    %274 = vector.extract_strided_slice %259 {offsets = [0, 384], sizes = [2, 128], strides = [1, 1]} : vector<2x512xf32> to vector<2x128xf32>
    %275 = arith.negf %274 : vector<2x128xf32>
    %276 = math.exp %275 : vector<2x128xf32>
    %cst_149 = arith.constant 1.000000e+00 : f32
    %277 = vector.broadcast %cst_149 : f32 to vector<2x128xf32>
    %278 = arith.addf %277, %276 : vector<2x128xf32>
    %279 = arith.divf %277, %278 : vector<2x128xf32>
    %280 = arith.mulf %271, %214 : vector<2x128xf32>
    %281 = arith.mulf %265, %273 : vector<2x128xf32>
    %282 = arith.addf %280, %281 : vector<2x128xf32>
    %283 = math.tanh %282 : vector<2x128xf32>
    %284 = arith.mulf %279, %283 : vector<2x128xf32>
    %285 = arith.truncf %284 : vector<2x128xf32> to vector<2x128xbf16>
    %c0_150 = arith.constant 0 : index
    %c128_151 = arith.constant 128 : index
    %286 = vector.load %arg15[%c0_150, %c128_151] : memref<2x256xbf16, #tpu.memory_space<vmem>>, vector<2x128xbf16>
    tpu.vector_store %arg15[%c0_150, %c128_151], %285 {strides = array<i32>} : memref<2x256xbf16, #tpu.memory_space<vmem>>, vector<2x128xbf16>,
    %c0_152 = arith.constant 0 : index
    %c0_153 = arith.constant 0 : index
    %287 = vector.load %arg15[%c0_152, %c0_153] : memref<2x256xbf16, #tpu.memory_space<vmem>>, vector<2x256xbf16>
    %288 = arith.index_cast %c3_i32 : i32 to index
    %c0_154 = arith.constant 0 : index
    %c0_155 = arith.constant 0 : index
    %289 = vector.load %arg10[%288, %c0_154, %c0_155] : memref<4x256x512xbf16, #tpu.memory_space<vmem>>, vector<1x256x512xbf16>
    %290 = vector.shape_cast %289 : vector<1x256x512xbf16> to vector<256x512xbf16>
    %cst_156 = arith.constant dense<0.000000e+00> : vector<2x512xf32>
    %291 = tpu.matmul %287, %290, %cst_156 {dimension_numbers = #tpu.dot_dimension_numbers<[1], [0], [0], [1], [0, 0, 1, 1], [], []>} : vector<2x256xbf16>, vector<256x512xbf16>, vector<2x512xf32> -> vector<2x512xf32>
    %292 = arith.index_cast %c3_i32 : i32 to index
    %c0_157 = arith.constant 0 : index
    %c0_158 = arith.constant 0 : index
    %293 = vector.load %arg11[%292, %c0_157, %c0_158] : memref<4x1x512xf32, #tpu.memory_space<vmem>>, vector<1x1x512xf32>
    %294 = vector.shape_cast %293 : vector<1x1x512xf32> to vector<1x512xf32>
    %295 = vector.broadcast %294 : vector<1x512xf32> to vector<2x512xf32>
    %296 = arith.addf %291, %295 : vector<2x512xf32>
    %cst_159 = arith.constant 0.000000e+00 : f32
    %297 = vector.broadcast %cst_159 : f32 to vector<2x512xf32>
    %298 = arith.maximumf %296, %297 : vector<2x512xf32>
    %299 = arith.truncf %298 : vector<2x512xf32> to vector<2x512xbf16>
    %300 = arith.index_cast %c3_i32 : i32 to index
    %c0_160 = arith.constant 0 : index
    %c0_161 = arith.constant 0 : index
    %301 = vector.load %arg12[%300, %c0_160, %c0_161] : memref<4x512x128xbf16, #tpu.memory_space<vmem>>, vector<1x512x128xbf16>
    %302 = vector.shape_cast %301 : vector<1x512x128xbf16> to vector<512x128xbf16>
    %cst_162 = arith.constant dense<0.000000e+00> : vector<2x128xf32>
    %303 = tpu.matmul %299, %302, %cst_162 {dimension_numbers = #tpu.dot_dimension_numbers<[1], [0], [0], [1], [0, 0, 1, 1], [], []>} : vector<2x512xbf16>, vector<512x128xbf16>, vector<2x128xf32> -> vector<2x128xf32>
    %304 = arith.index_cast %c3_i32 : i32 to index
    %c0_163 = arith.constant 0 : index
    %c0_164 = arith.constant 0 : index
    %305 = vector.load %arg13[%304, %c0_163, %c0_164] : memref<4x1x128xf32, #tpu.memory_space<vmem>>, vector<1x1x128xf32>
    %306 = vector.shape_cast %305 : vector<1x1x128xf32> to vector<1x128xf32>
    %307 = vector.broadcast %306 : vector<1x128xf32> to vector<2x128xf32>
    %308 = arith.addf %303, %307 : vector<2x128xf32>
    %309 = arith.index_cast %c3_i32 : i32 to index
    %c0_165 = arith.constant 0 : index
    %c0_166 = arith.constant 0 : index
    %310 = vector.load %arg14[%309, %c0_165, %c0_166] : memref<4x2x128xf32, #tpu.memory_space<vmem>>, vector<1x2x128xf32>
    %311 = vector.shape_cast %310 : vector<1x2x128xf32> to vector<2x128xf32>
    %312 = vector.shape_cast %308 : vector<2x128xf32> to vector<1x2x128xf32>
    tpu.vector_store %arg14[%309, %c0_165, %c0_166], %312 {strides = array<i32>} : memref<4x2x128xf32, #tpu.memory_space<vmem>>, vector<1x2x128xf32>,
    %c4_i32 = arith.constant 4 : i32
    return
  }
}

</mosaic_0001>

<bundles_post_ra>
// kernel: tpu_custom_call.1
= control target key start
LH: loop header
LB: loop body
LE: loop exit
PB: predicated region body
PF: predicated region fallthrough
CT: control target
= control target key end

     0   :  { %19 = vsyncpa [#allocation4], 0  ;;  %s9004_s0 = inlined_call_operand.hbm [shape: f32[4,2,128], index: 0, kind: input, shape index: {}]   ;;  %s9005_s1 = inlined_call_operand.hbm [shape: bf16[8,128], index: 1, kind: input, shape index: {}]   ;;  %s9006_s2 = inlined_call_operand.hbm [shape: bf16[128,128], index: 2, kind: input, shape index: {}]   ;;  %s9007_s3 = inlined_call_operand.vmem [shape: f32[1,128], index: 3, kind: input, shape index: {}]   ;;  %s9008_s4 = inlined_call_operand.hbm [shape: bf16[128,128], index: 4, kind: input, shape index: {}]   ;;  %s9009_s5 = inlined_call_operand.vmem [shape: f32[1,128], index: 5, kind: input, shape index: {}]   ;;  %s9010_s6 = inlined_call_operand.hbm [shape: bf16[256,128], index: 6, kind: input, shape index: {}]   ;;  %s9011_s7 = inlined_call_operand.vmem [shape: f32[1,128], index: 7, kind: input, shape index: {}]   ;;  %s9012_s8 = inlined_call_operand.hbm [shape: bf16[256,512], index: 8, kind: input, shape index: {}]   ;;  %s9013_s9 = inlined_call_operand.vmem [shape: f32[1,512], index: 9, kind: input, shape index: {}]   ;;  %s9014_s10 = inlined_call_operand.hbm [shape: bf16[4,256,512], index: 10, kind: input, shape index: {}]   ;;  %s9015_s11 = inlined_call_operand.vmem [shape: f32[4,1,512], index: 11, kind: input, shape index: {}]   ;;  %s9016_s12 = inlined_call_operand.hbm [shape: bf16[4,512,128], index: 12, kind: input, shape index: {}]   ;;  %s9017_s13 = inlined_call_operand.vmem [shape: f32[4,1,128], index: 13, kind: input, shape index: {}]   ;;  %s9018_s14 = inlined_call_operand.hbm [shape: f32[4,2,128], index: 14, kind: output, shape index: {}]  }
   0x1   :  { %20 = vsyncpa [#allocation7], 0 }
   0x2   :  { %21 = vsyncpa [#allocation10], 0 }
   0x3   :  { %22 = vsyncpa [#allocation13], 0 }
   0x4   :  { %23 = vsyncpa [#allocation16], 0 }
   0x5   :  { %24 = vsyncpa [#allocation5], 0  ;;  %s8599_s29 = smov [#allocation6]   ;;  %s8389_s17 = scalar_lea.hbm %s9005_s1, 64 }
   0x6   :  { %s43_s30 = sshll.u32 %s8599_s29, 4  ;;  %p8390_p0 = scmp.ne.s32.totalorder %s9005_s1, %s8389_s17  ;;  %s44_s30 = int_to_ptr.vmem [resolvable:$true] %s43_s30 }
   0x7   :  { %p8393_p1 = scmp.lt.u32.totalorder %s8389_s17, %s9005_s1 }
   0x9   :  { %p8395_p2 = pnand %p8393_p1, %p8390_p0 }
   0xb   :  { %8398 = shalt.err (!%p8395_p2)
}
   0xc   :  { %s8399_s22 = scalar_lea.vmem %s44_s30, 64  ;;  %p8404_p4 = scmp.lt.s32.totalorder %s44_s30, %s44_s30 }
   0xd   :  { %p8400_p3 = scmp.ne.s32.totalorder %s44_s30, %s8399_s22  ;;  %p8405_p5 = scmp.lt.s32.totalorder %s8399_s22, %s8399_s22 }
   0xf   :  { %p8406_p6 = por %p8405_p5, %p8404_p4 }
  0x11   :  { %p8407_p7 = pnand %p8406_p6, %p8400_p3 }
  0x13   :  { %8410 = shalt.err (!%p8407_p7)
}
  0x14   :  { %46 = dma.hbm_to_vmem [thread:$0]  %s9005_s1, 64, %s44_s30, [#allocation7]  }
  0x15   :  { %s8600_s25 = smov [#allocation9]   ;;  %s8601_s27 = smov [#allocation12]  }
  0x16   :  { %s66_s26 = sshll.u32 %s8600_s25, 4  ;;  %s94_s28 = sshll.u32 %s8601_s27, 4  ;;  %s67_s26 = int_to_ptr.vmem [resolvable:$true] %s66_s26  ;;  %s95_s28 = int_to_ptr.vmem [resolvable:$true] %s94_s28 }
  0x17   :  { %s8411_s16 = scalar_lea.hbm %s9008_s4, 1024 }
  0x18   :  { %p8412_p8 = scmp.ne.s32.totalorder %s9008_s4, %s8411_s16  ;;  %p8415_p9 = scmp.lt.u32.totalorder %s8411_s16, %s9008_s4 }
  0x1a   :  { %p8417_p10 = pnand %p8415_p9, %p8412_p8 }
  0x1c   :  { %8420 = shalt.err (!%p8417_p10)
}
  0x1d   :  { %s8421_s1 = scalar_lea.vmem %s67_s26, 1024  ;;  %p8426_p12 = scmp.lt.s32.totalorder %s67_s26, %s67_s26 }
  0x1e   :  { %p8422_p11 = scmp.ne.s32.totalorder %s67_s26, %s8421_s1  ;;  %p8427_p13 = scmp.lt.s32.totalorder %s8421_s1, %s8421_s1 }
  0x20   :  { %p8428_p0 = por %p8427_p13, %p8426_p12 }
  0x22   :  { %p8429_p1 = pnand %p8428_p0, %p8422_p11 }
  0x24   :  { %8432 = shalt.err (!%p8429_p1)
}
  0x25   :  { %s8602_s30 = smov 64   ;;  %s8603_s21 = smov 4  }
  0x26   :  { %72 = dma.hbm_to_vmem [thread:$0]  %s9008_s4, 1024, %s67_s26, [#allocation10], %s8602_s30, %s8602_s30, %s8603_s21  }
  0x27   :  { %s8433_s27 = scalar_lea.hbm %s9012_s8, 8192 }
  0x28   :  { %p8434_p2 = scmp.ne.s32.totalorder %s9012_s8, %s8433_s27  ;;  %p8437_p3 = scmp.lt.u32.totalorder %s8433_s27, %s9012_s8 }
  0x2a   :  { %p8439_p4 = pnand %p8437_p3, %p8434_p2 }
  0x2c   :  { %8442 = shalt.err (!%p8439_p4)
}
  0x2d   :  { %s8443_s18 = scalar_lea.vmem %s95_s28, 8192  ;;  %p8448_p6 = scmp.lt.s32.totalorder %s95_s28, %s95_s28 }
  0x2e   :  { %p8444_p5 = scmp.ne.s32.totalorder %s95_s28, %s8443_s18  ;;  %p8449_p7 = scmp.lt.s32.totalorder %s8443_s18, %s8443_s18 }
  0x30   :  { %p8450_p8 = por %p8449_p7, %p8448_p6 }
  0x32   :  { %p8451_p9 = pnand %p8450_p8, %p8444_p5 }
  0x34   :  { %8454 = shalt.err (!%p8451_p9)
}
  0x35   :  { %s9019_s4 = smov 256   ;;  %s8605_s26 = smov 16  }
  0x36   :  { %100 = dma.hbm_to_vmem [thread:$0]  %s9012_s8, 8192, %s95_s28, [#allocation13], %s9019_s4, %s9019_s4, %s8605_s26  }
  0x37   :  { %s8606_s1 = smov [#allocation3]   ;;  %s8455_s25 = scalar_lea.hbm %s9004_s0, 128 }
  0x38   :  { %s30_s22 = sshll.u32 %s8606_s1, 4  ;;  %p8456_p10 = scmp.ne.s32.totalorder %s9004_s0, %s8455_s25  ;;  %s31_s22 = int_to_ptr.vmem [resolvable:$true] %s30_s22 }
  0x39   :  { %p8459_p11 = scmp.lt.u32.totalorder %s8455_s25, %s9004_s0 }
  0x3b   :  { %p8461_p12 = pnand %p8459_p11, %p8456_p10 }
  0x3d   :  { %8464 = shalt.err (!%p8461_p12)
}
  0x3e   :  { %s8465_s17 = scalar_lea.vmem %s31_s22, 128  ;;  %p8470_p0 = scmp.lt.s32.totalorder %s31_s22, %s31_s22 }
  0x3f   :  { %p8466_p13 = scmp.ne.s32.totalorder %s31_s22, %s8465_s17  ;;  %p8471_p1 = scmp.lt.s32.totalorder %s8465_s17, %s8465_s17 }
  0x41   :  { %p8472_p2 = por %p8471_p1, %p8470_p0 }
  0x43   :  { %p8473_p3 = pnand %p8472_p2, %p8466_p13 }
  0x45   :  { %8476 = shalt.err (!%p8473_p3)
}
  0x46   :  { %s8607_s8 = smov 32   ;;  %s8608_s28 = smov 2  }
  0x47   :  { %36 = dma.hbm_to_vmem [thread:$0]  %s9004_s0, 128, %s31_s22, [#allocation4], %s8607_s8, %s8607_s8, %s8608_s28  }
  0x48   :  { %s8609_s20 = smov [#allocation8]   ;;  %s8610_s23 = smov [#allocation11]  }
  0x49   :  { %s52_s1 = sshll.u32 %s8609_s20, 4  ;;  %s80_s24 = sshll.u32 %s8610_s23, 4  ;;  %s53_s1 = int_to_ptr.vmem [resolvable:$true] %s52_s1  ;;  %s8750_s24 = int_to_ptr.vmem [resolvable:$true] %s80_s24 }
  0x4a   :  { %s8477_s29 = scalar_lea.hbm %s9006_s2, 1024 }
  0x4b   :  { %p8478_p4 = scmp.ne.s32.totalorder %s9006_s2, %s8477_s29  ;;  %p8481_p5 = scmp.lt.u32.totalorder %s8477_s29, %s9006_s2 }
  0x4d   :  { %p8483_p6 = pnand %p8481_p5, %p8478_p4 }
  0x4f   :  { %8486 = shalt.err (!%p8483_p6)
}
  0x50   :  { %s8487_s0 = scalar_lea.vmem %s53_s1, 1024  ;;  %p8492_p8 = scmp.lt.s32.totalorder %s53_s1, %s53_s1 }
  0x51   :  { %p8488_p7 = scmp.ne.s32.totalorder %s53_s1, %s8487_s0  ;;  %p8493_p9 = scmp.lt.s32.totalorder %s8487_s0, %s8487_s0 }
  0x53   :  { %p8494_p10 = por %p8493_p9, %p8492_p8 }
  0x55   :  { %p8495_p11 = pnand %p8494_p10, %p8488_p7 }
  0x57   :  { %8498 = shalt.err (!%p8495_p11)
}
  0x58   :  { %58 = dma.hbm_to_vmem [thread:$0]  %s9006_s2, 1024, %s53_s1, [#allocation7], %s8602_s30, %s8602_s30, %s8603_s21  }
  0x59   :  { %s8499_s4 = scalar_lea.hbm %s9010_s6, 2048 }
  0x5a   :  { %p8500_p12 = scmp.ne.s32.totalorder %s9010_s6, %s8499_s4  ;;  %p8503_p13 = scmp.lt.u32.totalorder %s8499_s4, %s9010_s6 }
  0x5c   :  { %p8505_p0 = pnand %p8503_p13, %p8500_p12 }
  0x5e   :  { %8508 = shalt.err (!%p8505_p0)
}
  0x5f   :  { %s8509_s15 = scalar_lea.vmem %s8750_s24, 2048  ;;  %p8514_p2 = scmp.lt.s32.totalorder %s8750_s24, %s8750_s24 }
  0x60   :  { %p8510_p1 = scmp.ne.s32.totalorder %s8750_s24, %s8509_s15  ;;  %p8515_p3 = scmp.lt.s32.totalorder %s8509_s15, %s8509_s15 }
  0x62   :  { %p8516_p4 = por %p8515_p3, %p8514_p2 }
  0x64   :  { %p8517_p5 = pnand %p8516_p4, %p8510_p1 }
  0x66   :  { %8520 = shalt.err (!%p8517_p5)
}
  0x67   :  { %86 = dma.hbm_to_vmem [thread:$0]  %s9010_s6, 2048, %s8750_s24, [#allocation10], %s8602_s30, %s8602_s30, %s8603_s21  }
  0x68   :  { %s8611_s16 = smov [#allocation14]   ;;  %s8612_s0 = smov [#allocation15]  }
  0x69   :  { %s108_s17 = sshll.u32 %s8611_s16, 4  ;;  %s122_s22 = sshll.u32 %s8612_s0, 4  ;;  %s109_s17 = int_to_ptr.vmem [resolvable:$true] %s108_s17  ;;  %s8787_s22 = int_to_ptr.vmem [resolvable:$true] %s122_s22 }
  0x6a   :  { %s8521_s20 = scalar_lea.hbm %s9014_s10, 32768 }
  0x6b   :  { %p8522_p6 = scmp.ne.s32.totalorder %s9014_s10, %s8521_s20  ;;  %p8525_p7 = scmp.lt.u32.totalorder %s8521_s20, %s9014_s10 }
  0x6d   :  { %p8527_p8 = pnand %p8525_p7, %p8522_p6 }
  0x6f   :  { %8530 = shalt.err (!%p8527_p8)
}
  0x70   :  { %s8531_s6 = scalar_lea.vmem %s109_s17, 32768  ;;  %p8536_p10 = scmp.lt.s32.totalorder %s109_s17, %s109_s17 }
  0x71   :  { %p8532_p9 = scmp.ne.s32.totalorder %s109_s17, %s8531_s6  ;;  %p8537_p11 = scmp.lt.s32.totalorder %s8531_s6, %s8531_s6 }
  0x73   :  { %p8538_p12 = por %p8537_p11, %p8536_p10 }
  0x75   :  { %p8539_p13 = pnand %p8538_p12, %p8532_p9 }
  0x77   :  { %8542 = shalt.err (!%p8539_p13)
}
  0x78   :  { %s9020_s24 = smov 256   ;;  %s8543_s16 = scalar_lea.hbm %s9016_s12, 16384 }
  0x79   :  { %114 = dma.hbm_to_vmem [thread:$0]  %s9014_s10, 32768, %s109_s17, [#allocation13], %s9020_s24, %s9020_s24, %s8605_s26  }
  0x7a   :  { %p8544_p0 = scmp.ne.s32.totalorder %s9016_s12, %s8543_s16  ;;  %p8547_p1 = scmp.lt.u32.totalorder %s8543_s16, %s9016_s12 }
  0x7c   :  { %p8549_p2 = pnand %p8547_p1, %p8544_p0 }
  0x7e   :  { %8552 = shalt.err (!%p8549_p2)
}
  0x7f   :  { %s8553_s4 = scalar_lea.vmem %s8787_s22, 16384  ;;  %p8558_p4 = scmp.lt.s32.totalorder %s8787_s22, %s8787_s22 }
  0x80   :  { %p8554_p3 = scmp.ne.s32.totalorder %s8787_s22, %s8553_s4  ;;  %p8559_p5 = scmp.lt.s32.totalorder %s8553_s4, %s8553_s4 }
  0x82   :  { %p8560_p6 = por %p8559_p5, %p8558_p4 }
  0x84   :  { %p8561_p7 = pnand %p8560_p6, %p8554_p3 }
  0x86   :  { %8564 = shalt.err (!%p8561_p7)
}
  0x87   :  { %128 = dma.hbm_to_vmem [thread:$0]  %s9016_s12, 16384, %s8787_s22, [#allocation16], %s8602_s30, %s8602_s30, %s8603_s21  }
  0x88   :  { %8587 = dma.done.wait [#allocation4], 128  }
  0x89   :  { %8588 = vsyncadd [#allocation4], 4294967168 }
  0x8a   :  { %8589 = dma.done.wait [#allocation7], 1088  }
  0x8b   :  { %8590 = vsyncadd [#allocation7], 4294966208 }
  0x8c   :  { %8591 = dma.done.wait [#allocation10], 3072  }
  0x8d   :  { %8592 = vsyncadd [#allocation10], 4294964224 }
  0x8e   :  { %8593 = dma.done.wait [#allocation13], 40960  }
  0x8f   :  { %8594 = vsyncadd [#allocation13], 4294926336 }
  0x90   :  { %8595 = dma.done.wait [#allocation16], 16384  }
  0x91   :  { %8596 = vsyncadd [#allocation16], 4294950912  ;;  %v8613_v0 = vmov 0.0   ;;  %vm8614_vm0 = vmmov 0   ;;  %v7392_v1 = vld [vmem:[#allocation9] sm:$0xff]   ;;  %v7394_v3 = vld [vmem:[#allocation9 + $0x8] sm:$0xff]  }
  0x92   :  { %7342 = vmatprep.subr.bf16.mxu1 %v8613_v0  ;;  %7322 = vmatprep.subr.bf16.mxu0 %v8613_v0  ;;  %v7393_v2 = vld [vmem:[#allocation8] sm:$0xff]   ;;  %v7395_v4 = vld [vmem:[#allocation8 + $0x8] sm:$0xff]   ;;  %v7396_v5 = vld [vmem:[#allocation9 + $0x10] sm:$0xff]   ;;  %vm468_vm1 = vcmask 1043456   ;;  %vm451_vm2 = vcmask 58368   ;;  %vm464_vm3 = vcmask 64512  }
  0x93   :  { %7358 = vmatprep.mubr.msk.bf16.mxu1 %vm8614_vm0, %v8613_v0  ;;  %7338 = vmatprep.mubr.msk.bf16.mxu0 %vm8614_vm0, %v8613_v0  ;;  %v7397_v6 = vld [vmem:[#allocation8 + $0x10] sm:$0xff]   ;;  %v7398_v7 = vld [vmem:[#allocation9 + $0x18] sm:$0xff]   ;;  %v7400_v9 = vld [vmem:[#allocation9 + $0x20] sm:$0xff]   ;;  %s8617_s17 = smov [#allocation17]  }
  0x94   :  { %7343 = vmatpush3.bf16.msra.mxu1 %v7392_v1  ;;  %7323 = vmatpush3.bf16.msra.mxu0 %v7393_v2  ;;  %v7399_v8 = vld [vmem:[#allocation8 + $0x18] sm:$0xff]   ;;  %v7401_v10 = vld [vmem:[#allocation8 + $0x20] sm:$0xff]   ;;  %v7402_v11 = vld [vmem:[#allocation9 + $0x28] sm:$0xff]  }
  0x95   :  { %7344 = vmatprep.subr.bf16.mxu1 %v8613_v0  ;;  %7324 = vmatprep.subr.bf16.mxu0 %v8613_v0  ;;  %v156_v12 = vld [vmem:[#allocation3] sm:$0x3]  ;;  %v7403_v13 = vld [vmem:[#allocation8 + $0x28] sm:$0xff]   ;;  %v7406_v17 = vld [vmem:[#allocation9 + $0x38] sm:$0xff]  }
  0x96   :  { %v158_v14 = vpack.c.bf16 %v156_v12, %v156_v12  ;;  %v7404_v15 = vld [vmem:[#allocation9 + $0x30] sm:$0xff]   ;;  %v7407_v18 = vld [vmem:[#allocation8 + $0x38] sm:$0xff]   ;;  %v6404_v20 = vld [vmem:[%s9009_s5] ss:$0 sm:$0xff] }
  0x97   :  { %v7405_v16 = vld [vmem:[#allocation8 + $0x30] sm:$0xff]   ;;  %v157_v19 = vld [vmem:[#allocation6] sm:$0xf]  ;;  %v6395_v21 = vld [vmem:[%s9007_s3] ss:$0 sm:$0xff]  ;;  %s6379_s3 = sshll.u32 %s8617_s17, 4  ;;  %s6380_s3 = int_to_ptr.vmem [resolvable:$true] %s6379_s3 }
  0x98   :  { %7345 = vmatpush3.bf16.msra.mxu1 %v7394_v3  ;;  %7325 = vmatpush3.bf16.msra.mxu0 %v7395_v4  ;;  %512 = vst [vmem:[#allocation2] sm:$0x1] %v158_v14  ;;  %v8388_v31 = vld [vmem:[#allocation6] sm:$0xf]  ;;  %v7408_v42 = vld [vmem:[#allocation11 + $0x40] sm:$0xff]   ;;  %v7410_v44 = vld [vmem:[#allocation11 + $0x48] sm:$0xff]   ;;  %p8570_p9 = scmp.lt.s32.totalorder %s6380_s3, %s6380_s3 }
  0x99   :  { %7346 = vmatprep.subr.bf16.mxu1 %v8613_v0  ;;  %7326 = vmatprep.subr.bf16.mxu0 %v8613_v0  ;;  %v470_v32 = vsel %vm468_vm1, %v8388_v31, 0  ;;  %v7409_v43 = vld [vmem:[#allocation11] sm:$0xff]   ;;  %v7411_v45 = vld [vmem:[#allocation11 + $0x8] sm:$0xff]   ;;  %v7412_v46 = vld [vmem:[#allocation11 + $0x50] sm:$0xff]   ;;  %s8565_s5 = scalar_lea.vmem %s6380_s3, 128 }
  0x9a   :  { %v7413_v47 = vld [vmem:[#allocation11 + $0x10] sm:$0xff]   ;;  %v7414_v48 = vld [vmem:[#allocation11 + $0x58] sm:$0xff]   ;;  %v7416_v54 = vld [vmem:[#allocation11 + $0x60] sm:$0xff]   ;;  %p8566_p8 = scmp.ne.s32.totalorder %s6380_s3, %s8565_s5  ;;  %p8571_p10 = scmp.lt.s32.totalorder %s8565_s5, %s8565_s5 }
  0x9b   :  { %v7415_v49 = vld [vmem:[#allocation11 + $0x18] sm:$0xff]   ;;  %v7417_v55 = vld [vmem:[#allocation11 + $0x20] sm:$0xff]   ;;  %v7418_v56 = vld [vmem:[#allocation11 + $0x68] sm:$0xff]  }
  0x9c   :  { %7347 = vmatpush3.bf16.msra.mxu1 %v7396_v5  ;;  %7327 = vmatpush3.bf16.msra.mxu0 %v7397_v6  ;;  %v7419_v57 = vld [vmem:[#allocation11 + $0x28] sm:$0xff]   ;;  %v7420_v58 = vld [vmem:[#allocation11 + $0x70] sm:$0xff]   ;;  %v7422_v60 = vld [vmem:[#allocation11 + $0x78] sm:$0xff]   ;;  %p8572_p11 = por %p8571_p10, %p8570_p9 }
  0x9d   :  { %7348 = vmatprep.subr.bf16.mxu1 %v8613_v0  ;;  %7328 = vmatprep.subr.bf16.mxu0 %v8613_v0  ;;  %v7421_v59 = vld [vmem:[#allocation11 + $0x30] sm:$0xff]   ;;  %v7423_v61 = vld [vmem:[#allocation11 + $0x38] sm:$0xff]  }
  0x9e   :  { %v7424_v62 = vld [vmem:[#allocation12] ss:$16 sps:$4 sm:$0xff]   ;;  %v7426_v63 = vld [vmem:[#allocation12 + $0x4] ss:$16 sps:$4 sm:$0xff]   ;;  %p8573_p12 = pnand %p8572_p11, %p8566_p8 }
  0x9f   :  { %v7432_v1 = vld [vmem:[#allocation12 + $0x24] ss:$16 sps:$4 sm:$0xff]   ;;  %v7430_v2 = vld [vmem:[#allocation12 + $0x20] ss:$16 sps:$4 sm:$0xff]  }
  0xa0   :  { %7349 = vmatpush3.bf16.msra.mxu1 %v7398_v7  ;;  %7329 = vmatpush3.bf16.msra.mxu0 %v7399_v8  ;;  %v7438_v3 = vld [vmem:[#allocation12 + $0x44] ss:$16 sps:$4 sm:$0xff]   ;;  %v7436_v4 = vld [vmem:[#allocation12 + $0x40] ss:$16 sps:$4 sm:$0xff]  }
  0xa1   :  { %7350 = vmatprep.subr.bf16.mxu1 %v8613_v0  ;;  %7330 = vmatprep.subr.bf16.mxu0 %v8613_v0  ;;  %v7444_v5 = vld [vmem:[#allocation12 + $0x64] ss:$16 sps:$4 sm:$0xff]   ;;  %v7442_v6 = vld [vmem:[#allocation12 + $0x60] ss:$16 sps:$4 sm:$0xff]  }
  0xa2   :  { %v7450_v7 = vld [vmem:[#allocation12 + $0x84] ss:$16 sps:$4 sm:$0xff]   ;;  %v7448_v8 = vld [vmem:[#allocation12 + $0x80] ss:$16 sps:$4 sm:$0xff]  }
  0xa3   :  { %v7460_v12 = vld [vmem:[#allocation12 + $0xc0] ss:$16 sps:$4 sm:$0xff]  }
  0xa4   :  { %7351 = vmatpush3.bf16.msra.mxu1 %v7400_v9  ;;  %7331 = vmatpush3.bf16.msra.mxu0 %v7401_v10  ;;  %v7456_v9 = vld [vmem:[#allocation12 + $0xa4] ss:$16 sps:$4 sm:$0xff]   ;;  %v7454_v10 = vld [vmem:[#allocation12 + $0xa0] ss:$16 sps:$4 sm:$0xff]  }
  0xa5   :  { %7352 = vmatprep.subr.bf16.mxu1 %v8613_v0  ;;  %7332 = vmatprep.subr.bf16.mxu0 %v8613_v0 }
  0xa8   :  { %7353 = vmatpush3.bf16.msra.mxu1 %v7402_v11  ;;  %7333 = vmatpush3.bf16.msra.mxu0 %v7403_v13  ;;  %v7462_v11 = vld [vmem:[#allocation12 + $0xc4] ss:$16 sps:$4 sm:$0xff]  }
  0xa9   :  { %7354 = vmatprep.subr.bf16.mxu1 %v8613_v0  ;;  %7334 = vmatprep.subr.bf16.mxu0 %v8613_v0  ;;  %v7468_v13 = vld [vmem:[#allocation12 + $0xe4] ss:$16 sps:$4 sm:$0xff]  }
  0xac   :  { %7355 = vmatpush3.bf16.msra.mxu1 %v7404_v15  ;;  %7335 = vmatpush3.bf16.msra.mxu0 %v7405_v16  ;;  %v7474_v15 = vld [vmem:[#allocation12 + $0x104] ss:$16 sps:$4 sm:$0xff]   ;;  %v7472_v16 = vld [vmem:[#allocation12 + $0x100] ss:$16 sps:$4 sm:$0xff]  }
  0xad   :  { %7356 = vmatprep.subr.bf16.mxu1 %v8613_v0  ;;  %7336 = vmatprep.subr.bf16.mxu0 %v8613_v0 }
  0xb0   :  { %7357 = vmatpush3.bf16.msra.mxu1 %v7406_v17  ;;  %7337 = vmatpush3.bf16.msra.mxu0 %v7407_v18  ;;  %v7480_v17 = vld [vmem:[#allocation12 + $0x124] ss:$16 sps:$4 sm:$0xff]   ;;  %v7478_v18 = vld [vmem:[#allocation12 + $0x120] ss:$16 sps:$4 sm:$0xff]  }
  0xb1   :  { %7362 = vmatprep.subr.mxu1 %v8613_v0  ;;  %7124 = vmatprep.subr.bf16.mxu0 %v7408_v42  ;;  %v7447_v42 = vld [vmem:[#allocation12 + $0x6c] ss:$16 sps:$4 sm:$0xff]  }
  0xb3   :  { %7359 = vmatmul.mubr.bf16.vlgmr.msra.gmra.mrb[0].mxu1 %v157_v19  ;;  %7339 = vmatmul.mubr.bf16.vlgmr.msra.gmra.mrb[0].mxu0 %v158_v14  ;;  %v7466_v14 = vld [vmem:[#allocation12 + $0xe0] ss:$16 sps:$4 sm:$0xff]   ;;  %v7486_v19 = vld [vmem:[#allocation12 + $0x144] ss:$16 sps:$4 sm:$0xff]  }
  0xb4   :  { %7364 = vmatprep.mubr.msk.f32.mxu1 %vm8614_vm0, %v8613_v0  ;;  %7125 = vmatpush3.bf16.msra.mxu0 %v7409_v43  ;;  %v7445_v43 = vld [vmem:[#allocation12 + $0x68] ss:$16 sps:$4 sm:$0xff]  }
  0xb5   :  { %7126 = vmatprep.subr.bf16.mxu0 %v7410_v44  ;;  %v7453_v44 = vld [vmem:[#allocation12 + $0x8c] ss:$16 sps:$4 sm:$0xff]  }
  0xb8   :  { %7127 = vmatpush3.bf16.msra.mxu0 %v7411_v45  ;;  %v7451_v45 = vld [vmem:[#allocation12 + $0x88] ss:$16 sps:$4 sm:$0xff]  }
  0xb9   :  { %7128 = vmatprep.subr.bf16.mxu0 %v7412_v46  ;;  %v7459_v46 = vld [vmem:[#allocation12 + $0xac] ss:$16 sps:$4 sm:$0xff]  }
  0xbc   :  { %7129 = vmatpush3.bf16.msra.mxu0 %v7413_v47  ;;  %v7457_v47 = vld [vmem:[#allocation12 + $0xa8] ss:$16 sps:$4 sm:$0xff]  }
  0xbd   :  { %7130 = vmatprep.subr.bf16.mxu0 %v7414_v48  ;;  %v7465_v48 = vld [vmem:[#allocation12 + $0xcc] ss:$16 sps:$4 sm:$0xff]  }
  0xc0   :  { %7131 = vmatpush3.bf16.msra.mxu0 %v7415_v49  ;;  %v7463_v49 = vld [vmem:[#allocation12 + $0xc8] ss:$16 sps:$4 sm:$0xff]  }
  0xc1   :  { %7132 = vmatprep.subr.bf16.mxu0 %v7416_v54  ;;  %v7483_v54 = vld [vmem:[#allocation12 + $0x12c] ss:$16 sps:$4 sm:$0xff]  }
  0xc4   :  { %7133 = vmatpush3.bf16.msra.mxu0 %v7417_v55  ;;  %v7481_v55 = vld [vmem:[#allocation12 + $0x128] ss:$16 sps:$4 sm:$0xff]  }
  0xc5   :  { %7134 = vmatprep.subr.bf16.mxu0 %v7418_v56  ;;  %v7489_v56 = vld [vmem:[#allocation12 + $0x14c] ss:$16 sps:$4 sm:$0xff]  }
  0xc8   :  { %7135 = vmatpush3.bf16.msra.mxu0 %v7419_v57  ;;  %v7487_v57 = vld [vmem:[#allocation12 + $0x148] ss:$16 sps:$4 sm:$0xff]  }
  0xc9   :  { %7136 = vmatprep.subr.bf16.mxu0 %v7420_v58  ;;  %v7492_v58 = vld [vmem:[#allocation12 + $0x164] ss:$16 sps:$4 sm:$0xff]  }
  0xcc   :  { %7137 = vmatpush3.bf16.msra.mxu0 %v7421_v59  ;;  %v7495_v59 = vld [vmem:[#allocation12 + $0x16c] ss:$16 sps:$4 sm:$0xff]  }
  0xcd   :  { %7138 = vmatprep.subr.bf16.mxu0 %v7422_v60  ;;  %v7490_v60 = vld [vmem:[#allocation12 + $0x160] ss:$16 sps:$4 sm:$0xff]  }
  0xd0   :  { %7139 = vmatpush3.bf16.msra.mxu0 %v7423_v61  ;;  %v7493_v61 = vld [vmem:[#allocation12 + $0x168] ss:$16 sps:$4 sm:$0xff]  }
 0x186   :  { %v375_v22 = vpop.f32.mrb[0].mxu1  ;;  %v264_v25 = vpop.f32.mrb[0].mxu0 }
 0x187   :  { %v376_v23 = vadd.f32 %v6404_v20, %v375_v22  ;;  %v7360_v24 = vpop.f32.mrb[1].mxu1  ;;  %v265_v27 = vadd.f32 %v6395_v21, %v264_v25  ;;  %v7340_v28 = vpop.f32.mrb[1].mxu0  ;;  %v7484_v20 = vld [vmem:[#allocation12 + $0x140] ss:$16 sps:$4 sm:$0xff]   ;;  %v8615_v25 = vmov 1966171168  }
 0x188   :  { %v378_v26 = vpop.f32.mrb[2].mxu1  ;;  %v267_v30 = vpop.f32.mrb[2].mxu0 }
 0x189   :  { %v7361_v29 = vpop.f32.mrb[3].mxu1  ;;  %7363 = vmatpush3.xpose.msra.mxu1 %v376_v23  ;;  %v7341_v33 = vpop.f32.mrb[3].mxu0  ;;  %v565_v26 = vunpack.c.l.s4 %v8615_v25 }
 0x18a   :  { %7367 = vmatprep.subr.bf16.mxu1 %v8613_v0  ;;  %v8616_v33 = vmov 0  }
 0x18b   :  { %v566_v29 = vunpack.c.0.s8 %v565_v26 }
 0x18c   :  { %7365 = vmatmul.mubr.f32.vlgmr.msra.gmra.mrb[4].mxu1 %v265_v27  ;;  %v567_v27 = vlaneseq }
 0x18d   :  { %7368 = vmatpush3.bf16.msra.mxu1 %v470_v32  ;;  %7369 = vmatprep.mubr.msk.bf16.mxu1 %vm8614_vm0, %v8613_v0  ;;  %v7429_v0 = vld [vmem:[#allocation12 + $0xc] ss:$16 sps:$4 sm:$0xff]  }
 0x18e   :  { %1152 = vmatprep.subr.bf16.mxu1 %v7426_v63  ;;  %1193 = vmatprep.subr.bf16.mxu0 %v7429_v0  ;;  %v8856_v30 = vshrl.u32 %v567_v27, 7  ;;  %v7501_v63 = vld [vmem:[#allocation12 + $0x18c] ss:$16 sps:$4 sm:$0xff]   ;;  %v7496_v0 = vld [vmem:[#allocation12 + $0x180] ss:$16 sps:$4 sm:$0xff]  }
 0x18f   :  { %v7520_v27 = vld [vmem:[#allocation14] ss:$16 sps:$4 sm:$0xff]  }
 0x190   :  { %v8859_v32 = vsub.s32 %v566_v29, %v8856_v30 }
 0x25f   :  { %v447_v34 = vpop.f32.mrb[4].mxu1 }
 0x260   :  { %v452_v35 = vsel %vm451_vm2, %v447_v34, -inf  ;;  %v7366_v36 = vpop.f32.mrb[5].mxu1 }
 0x261   :  { %453 = vmax.xlane.f32.xlu0 %v452_v35  ;;  %v7427_v36 = vld [vmem:[#allocation12 + $0x8] ss:$16 sps:$4 sm:$0xff]  }
 0x2ee   :  { %v454_v37 = vpop.xlane.xlu0 %453 }
 0x2ef   :  { %v455_v38 = vsub.f32 %v447_v34, %v454_v37 }
 0x2f1   :  { %v456_v39 = vmul.f32 1.442695, %v455_v38  ;;  %v7435_v38 = vld [vmem:[#allocation12 + $0x2c] ss:$16 sps:$4 sm:$0xff]  }
 0x2f3   :  { %8320 = vpow2.f32 %v456_v39  ;;  %v7433_v39 = vld [vmem:[#allocation12 + $0x28] ss:$16 sps:$4 sm:$0xff]  }
 0x2fd   :  { %v8321_v40 = vpop.eup %8320 }
 0x2fe   :  { %v458_v41 = vsel %vm451_vm2, %v8321_v40, 0.0 }
 0x2ff   :  { %459 = vadd.xlane.f32.xlu0 %v458_v41  ;;  %v7439_v41 = vld [vmem:[#allocation12 + $0x48] ss:$16 sps:$4 sm:$0xff]  }
 0x38c   :  { %v460_v50 = vpop.xlane.xlu0 %459 }
 0x38d   :  { %8322 = vrcp.f32 %v460_v50  ;;  %v7471_v50 = vld [vmem:[#allocation12 + $0xec] ss:$16 sps:$4 sm:$0xff]  }
 0x397   :  { %v8323_v51 = vpop.eup %8322 }
 0x398   :  { %v462_v52 = vmul.f32 %v8323_v51, %v8321_v40  ;;  %v7441_v40 = vld [vmem:[#allocation12 + $0x4c] ss:$16 sps:$4 sm:$0xff]   ;;  %v7469_v51 = vld [vmem:[#allocation12 + $0xe8] ss:$16 sps:$4 sm:$0xff]  }
 0x39a   :  { %v463_v53 = vpack.c.bf16 %v462_v52, %v462_v52  ;;  %v7477_v52 = vld [vmem:[#allocation12 + $0x10c] ss:$16 sps:$4 sm:$0xff]  }
 0x39c   :  { %7370 = vmatmul.mubr.msk.bf16.vlgmr.msra.gmra.mrb[8].mxu1 %vm464_vm3, %v463_v53  ;;  %v7475_v53 = vld [vmem:[#allocation12 + $0x108] ss:$16 sps:$4 sm:$0xff]  }
 0x39d   :  { %1153 = vmatpush1.bf16.msra.mxu1 %v7424_v62  ;;  %v7498_v62 = vld [vmem:[#allocation12 + $0x184] ss:$16 sps:$4 sm:$0xff]  }
 0x39e   :  { %1154 = vmatprep.subr.bf16.mxu1 %v7432_v1  ;;  %v7499_v1 = vld [vmem:[#allocation12 + $0x188] ss:$16 sps:$4 sm:$0xff]  }
 0x3a1   :  { %1155 = vmatpush1.bf16.msra.mxu1 %v7430_v2  ;;  %v7502_v2 = vld [vmem:[#allocation12 + $0x1a0] ss:$16 sps:$4 sm:$0xff]  }
 0x3a2   :  { %1156 = vmatprep.subr.bf16.mxu1 %v7438_v3  ;;  %v7504_v3 = vld [vmem:[#allocation12 + $0x1a4] ss:$16 sps:$4 sm:$0xff]  }
 0x3a5   :  { %1157 = vmatpush1.bf16.msra.mxu1 %v7436_v4  ;;  %v7505_v4 = vld [vmem:[#allocation12 + $0x1a8] ss:$16 sps:$4 sm:$0xff]  }
 0x3a6   :  { %1158 = vmatprep.subr.bf16.mxu1 %v7444_v5  ;;  %v7507_v5 = vld [vmem:[#allocation12 + $0x1ac] ss:$16 sps:$4 sm:$0xff]  }
 0x3a9   :  { %1159 = vmatpush1.bf16.msra.mxu1 %v7442_v6  ;;  %v7510_v6 = vld [vmem:[#allocation12 + $0x1c4] ss:$16 sps:$4 sm:$0xff]  }
 0x3aa   :  { %1160 = vmatprep.subr.bf16.mxu1 %v7450_v7  ;;  %v7513_v7 = vld [vmem:[#allocation12 + $0x1cc] ss:$16 sps:$4 sm:$0xff]  }
 0x3ad   :  { %1161 = vmatpush1.bf16.msra.mxu1 %v7448_v8  ;;  %v7508_v8 = vld [vmem:[#allocation12 + $0x1c0] ss:$16 sps:$4 sm:$0xff]  }
 0x3ae   :  { %1162 = vmatprep.subr.bf16.mxu1 %v7456_v9  ;;  %v7511_v9 = vld [vmem:[#allocation12 + $0x1c8] ss:$16 sps:$4 sm:$0xff]  }
 0x3b1   :  { %1163 = vmatpush1.bf16.msra.mxu1 %v7454_v10  ;;  %v7516_v10 = vld [vmem:[#allocation12 + $0x1e4] ss:$16 sps:$4 sm:$0xff]  }
 0x3b2   :  { %1164 = vmatprep.subr.bf16.mxu1 %v7462_v11  ;;  %v7519_v11 = vld [vmem:[#allocation12 + $0x1ec] ss:$16 sps:$4 sm:$0xff]  }
 0x3b5   :  { %1165 = vmatpush1.bf16.msra.mxu1 %v7460_v12  ;;  %v7514_v12 = vld [vmem:[#allocation12 + $0x1e0] ss:$16 sps:$4 sm:$0xff]  }
 0x3b6   :  { %1166 = vmatprep.subr.bf16.mxu1 %v7468_v13  ;;  %v7517_v13 = vld [vmem:[#allocation12 + $0x1e8] ss:$16 sps:$4 sm:$0xff]  }
 0x3b9   :  { %1167 = vmatpush1.bf16.msra.mxu1 %v7466_v14  ;;  %v7522_v14 = vld [vmem:[#allocation14 + $0x4] ss:$16 sps:$4 sm:$0xff]  }
 0x3ba   :  { %1168 = vmatprep.subr.bf16.mxu1 %v7474_v15  ;;  %v7525_v15 = vld [vmem:[#allocation14 + $0xc] ss:$16 sps:$4 sm:$0xff]  }
 0x3bd   :  { %1169 = vmatpush1.bf16.msra.mxu1 %v7472_v16 }
 0x3be   :  { %1170 = vmatprep.subr.bf16.mxu1 %v7480_v17  ;;  %v6414_v17 = vld [vmem:[%s9011_s7] ss:$0 sm:$0xff] }
 0x3c1   :  { %1171 = vmatpush1.bf16.msra.mxu1 %v7478_v18 }
 0x3c2   :  { %1172 = vmatprep.subr.bf16.mxu1 %v7486_v19 }
 0x3c5   :  { %1173 = vmatpush1.bf16.msra.mxu1 %v7484_v20 }
 0x3c6   :  { %1174 = vmatprep.subr.bf16.mxu1 %v7492_v58  ;;  %v7562_v58 = vld [vmem:[#allocation14 + $0xe0] ss:$16 sps:$4 sm:$0xff]  }
 0x3c9   :  { %1175 = vmatpush1.bf16.msra.mxu1 %v7490_v60  ;;  %v7570_v60 = vld [vmem:[#allocation14 + $0x104] ss:$16 sps:$4 sm:$0xff]  }
 0x3ca   :  { %1176 = vmatprep.subr.bf16.mxu1 %v7498_v62  ;;  %v7568_v62 = vld [vmem:[#allocation14 + $0x100] ss:$16 sps:$4 sm:$0xff]  }
 0x3cd   :  { %1177 = vmatpush1.bf16.msra.mxu1 %v7496_v0  ;;  %v7576_v0 = vld [vmem:[#allocation14 + $0x124] ss:$16 sps:$4 sm:$0xff]  }
 0x3ce   :  { %1178 = vmatprep.subr.bf16.mxu1 %v7504_v3  ;;  %v7577_v3 = vld [vmem:[#allocation14 + $0x128] ss:$16 sps:$4 sm:$0xff]  }
 0x3d1   :  { %1179 = vmatpush1.bf16.msra.mxu1 %v7502_v2  ;;  %v7574_v2 = vld [vmem:[#allocation14 + $0x120] ss:$16 sps:$4 sm:$0xff]  }
 0x3d2   :  { %1180 = vmatprep.subr.bf16.mxu1 %v7510_v6  ;;  %v7580_v6 = vld [vmem:[#allocation14 + $0x140] ss:$16 sps:$4 sm:$0xff]  }
 0x3d5   :  { %1181 = vmatpush1.bf16.msra.mxu1 %v7508_v8  ;;  %v7588_v8 = vld [vmem:[#allocation14 + $0x164] ss:$16 sps:$4 sm:$0xff]  }
 0x3d6   :  { %1182 = vmatprep.subr.bf16.mxu1 %v7516_v10  ;;  %v7586_v10 = vld [vmem:[#allocation14 + $0x160] ss:$16 sps:$4 sm:$0xff]  }
 0x3d9   :  { %1183 = vmatpush1.bf16.msra.mxu1 %v7514_v12  ;;  %v7594_v12 = vld [vmem:[#allocation14 + $0x184] ss:$16 sps:$4 sm:$0xff]  }
 0x3da   :  { %1692 = vmatprep.subr.bf16.mxu1 %v7522_v14  ;;  %v7592_v14 = vld [vmem:[#allocation14 + $0x180] ss:$16 sps:$4 sm:$0xff]  }
 0x46f   :  { %v506_v21 = vpop.f32.mrb[8].mxu1 }
 0x470   :  { %v513_v22 = vpack.c.bf16 %v506_v21, %v506_v21  ;;  %v7371_v23 = vpop.f32.mrb[9].mxu1 }
 0x471   :  { %v509_v24 = vpop.f32.mrb[10].mxu1 }
 0x472   :  { %514 = vst [vmem:[#allocation2 + $0x1] sm:$0x1] %v513_v22  ;;  %v7372_v28 = vpop.f32.mrb[11].mxu1 }
 0x473   :  { %v7523_v28 = vld [vmem:[#allocation14 + $0x8] ss:$16 sps:$4 sm:$0xff]  }
 0x479   :  { %v6415_v31 = vld.sshfl [vmem:[#allocation2] sm:$0x11 pattern:$0x75316420] }
 0x47a   :  { %719 = vst [vmem:[#allocation2 + $0x1] sm:$0x1] %v8616_v33  ;;  %v563_v34 = vcombine.high %v6415_v31, %v6415_v31  ;;  %v570_v37 = vrot.slane %v6415_v31, %v8859_v32  ;;  %v7528_v31 = vld [vmem:[#allocation14 + $0x24] ss:$16 sps:$4 sm:$0xff]   ;;  %v7531_v33 = vld [vmem:[#allocation14 + $0x2c] ss:$16 sps:$4 sm:$0xff]  }
 0x47c   :  { %v577_v35 = vrot.slane %v563_v34, %v8859_v32  ;;  %v7526_v34 = vld [vmem:[#allocation14 + $0x20] ss:$16 sps:$4 sm:$0xff]  }
 0x47e   :  { %708 = vmatprep.mubr.bf16.mxu0 %v577_v35  ;;  %v7529_v35 = vld [vmem:[#allocation14 + $0x28] ss:$16 sps:$4 sm:$0xff]  }
 0x47f   :  { %709 = vmatmul.mubr.bf16.vlgmr.msra.gmra.mrb[4].mxu0 %v570_v37  ;;  %v7537_v37 = vld [vmem:[#allocation14 + $0x4c] ss:$16 sps:$4 sm:$0xff]  }
 0x480   :  { %1194 = vmatpush1.bf16.msra.mxu0 %v7427_v36  ;;  %v7534_v36 = vld [vmem:[#allocation14 + $0x44] ss:$16 sps:$4 sm:$0xff]  }
 0x481   :  { %1195 = vmatprep.subr.bf16.mxu0 %v7435_v38  ;;  %v7532_v38 = vld [vmem:[#allocation14 + $0x40] ss:$16 sps:$4 sm:$0xff]  }
 0x484   :  { %1196 = vmatpush1.bf16.msra.mxu0 %v7433_v39  ;;  %v7535_v39 = vld [vmem:[#allocation14 + $0x48] ss:$16 sps:$4 sm:$0xff]  }
 0x485   :  { %1197 = vmatprep.subr.bf16.mxu0 %v7441_v40  ;;  %v7540_v40 = vld [vmem:[#allocation14 + $0x64] ss:$16 sps:$4 sm:$0xff]  }
 0x488   :  { %1198 = vmatpush1.bf16.msra.mxu0 %v7439_v41  ;;  %v7543_v41 = vld [vmem:[#allocation14 + $0x6c] ss:$16 sps:$4 sm:$0xff]  }
 0x489   :  { %1199 = vmatprep.subr.bf16.mxu0 %v7447_v42  ;;  %v7538_v42 = vld [vmem:[#allocation14 + $0x60] ss:$16 sps:$4 sm:$0xff]  }
 0x48c   :  { %1200 = vmatpush1.bf16.msra.mxu0 %v7445_v43  ;;  %v7541_v43 = vld [vmem:[#allocation14 + $0x68] ss:$16 sps:$4 sm:$0xff]  }
 0x48d   :  { %1201 = vmatprep.subr.bf16.mxu0 %v7453_v44  ;;  %v7546_v44 = vld [vmem:[#allocation14 + $0x84] ss:$16 sps:$4 sm:$0xff]  }
 0x490   :  { %1202 = vmatpush1.bf16.msra.mxu0 %v7451_v45  ;;  %v7549_v45 = vld [vmem:[#allocation14 + $0x8c] ss:$16 sps:$4 sm:$0xff]  }
 0x491   :  { %1203 = vmatprep.subr.bf16.mxu0 %v7459_v46  ;;  %v7544_v46 = vld [vmem:[#allocation14 + $0x80] ss:$16 sps:$4 sm:$0xff]  }
 0x494   :  { %1204 = vmatpush1.bf16.msra.mxu0 %v7457_v47  ;;  %v7547_v47 = vld [vmem:[#allocation14 + $0x88] ss:$16 sps:$4 sm:$0xff]  }
 0x495   :  { %1205 = vmatprep.subr.bf16.mxu0 %v7465_v48  ;;  %v7552_v48 = vld [vmem:[#allocation14 + $0xa4] ss:$16 sps:$4 sm:$0xff]  }
 0x498   :  { %1206 = vmatpush1.bf16.msra.mxu0 %v7463_v49  ;;  %v7555_v49 = vld [vmem:[#allocation14 + $0xac] ss:$16 sps:$4 sm:$0xff]  }
 0x499   :  { %1207 = vmatprep.subr.bf16.mxu0 %v7471_v50  ;;  %v7550_v50 = vld [vmem:[#allocation14 + $0xa0] ss:$16 sps:$4 sm:$0xff]  }
 0x49c   :  { %1208 = vmatpush1.bf16.msra.mxu0 %v7469_v51  ;;  %v7553_v51 = vld [vmem:[#allocation14 + $0xa8] ss:$16 sps:$4 sm:$0xff]  }
 0x49d   :  { %1209 = vmatprep.subr.bf16.mxu0 %v7477_v52  ;;  %v7558_v52 = vld [vmem:[#allocation14 + $0xc4] ss:$16 sps:$4 sm:$0xff]  }
 0x4a0   :  { %1210 = vmatpush1.bf16.msra.mxu0 %v7475_v53  ;;  %v7561_v53 = vld [vmem:[#allocation14 + $0xcc] ss:$16 sps:$4 sm:$0xff]  }
 0x4a1   :  { %1211 = vmatprep.subr.bf16.mxu0 %v7483_v54  ;;  %v7556_v54 = vld [vmem:[#allocation14 + $0xc0] ss:$16 sps:$4 sm:$0xff]  }
 0x4a4   :  { %1212 = vmatpush1.bf16.msra.mxu0 %v7481_v55  ;;  %v7559_v55 = vld [vmem:[#allocation14 + $0xc8] ss:$16 sps:$4 sm:$0xff]  }
 0x4a5   :  { %1213 = vmatprep.subr.bf16.mxu0 %v7489_v56  ;;  %v7564_v56 = vld [vmem:[#allocation14 + $0xe4] ss:$16 sps:$4 sm:$0xff]  }
 0x4a8   :  { %1214 = vmatpush1.bf16.msra.mxu0 %v7487_v57  ;;  %v7567_v57 = vld [vmem:[#allocation14 + $0xec] ss:$16 sps:$4 sm:$0xff]  }
 0x4a9   :  { %1215 = vmatprep.subr.bf16.mxu0 %v7495_v59  ;;  %v7565_v59 = vld [vmem:[#allocation14 + $0xe8] ss:$16 sps:$4 sm:$0xff]  }
 0x4ac   :  { %1216 = vmatpush1.bf16.msra.mxu0 %v7493_v61  ;;  %v7573_v61 = vld [vmem:[#allocation14 + $0x10c] ss:$16 sps:$4 sm:$0xff]  }
 0x4ad   :  { %1217 = vmatprep.subr.bf16.mxu0 %v7501_v63  ;;  %v7571_v63 = vld [vmem:[#allocation14 + $0x108] ss:$16 sps:$4 sm:$0xff]  }
 0x4b0   :  { %1218 = vmatpush1.bf16.msra.mxu0 %v7499_v1  ;;  %v7579_v1 = vld [vmem:[#allocation14 + $0x12c] ss:$16 sps:$4 sm:$0xff]  }
 0x4b1   :  { %1219 = vmatprep.subr.bf16.mxu0 %v7507_v5  ;;  %v7585_v5 = vld [vmem:[#allocation14 + $0x14c] ss:$16 sps:$4 sm:$0xff]  }
 0x4b4   :  { %1220 = vmatpush1.bf16.msra.mxu0 %v7505_v4  ;;  %v7582_v4 = vld [vmem:[#allocation14 + $0x144] ss:$16 sps:$4 sm:$0xff]  }
 0x4b5   :  { %1221 = vmatprep.subr.bf16.mxu0 %v7513_v7  ;;  %v7583_v7 = vld [vmem:[#allocation14 + $0x148] ss:$16 sps:$4 sm:$0xff]  }
 0x4b8   :  { %1222 = vmatpush1.bf16.msra.mxu0 %v7511_v9  ;;  %v7591_v9 = vld [vmem:[#allocation14 + $0x16c] ss:$16 sps:$4 sm:$0xff]  }
 0x4b9   :  { %1223 = vmatprep.subr.bf16.mxu0 %v7519_v11  ;;  %v7589_v11 = vld [vmem:[#allocation14 + $0x168] ss:$16 sps:$4 sm:$0xff]  }
 0x4bc   :  { %1224 = vmatpush1.bf16.msra.mxu0 %v7517_v13  ;;  %v7597_v13 = vld [vmem:[#allocation14 + $0x18c] ss:$16 sps:$4 sm:$0xff]  }
 0x4bd   :  { %1733 = vmatprep.subr.bf16.mxu0 %v7525_v15  ;;  %v7595_v15 = vld [vmem:[#allocation14 + $0x188] ss:$16 sps:$4 sm:$0xff]  }
 0x552   :  { %v7140_v16 = vpop.f32.mrb[4].mxu0 }
 0x553   :  { %v7141_v18 = vpop.f32.mrb[5].mxu0 }
 0x554   :  { %v7142_v19 = vadd.f32 %v7141_v18, %v7140_v16  ;;  %v7143_v20 = vpop.f32.mrb[6].mxu0  ;;  %v7600_v16 = vld [vmem:[#allocation14 + $0x1a4] ss:$16 sps:$4 sm:$0xff]   ;;  %v7598_v18 = vld [vmem:[#allocation14 + $0x1a0] ss:$16 sps:$4 sm:$0xff]  }
 0x555   :  { %v7144_v21 = vpop.f32.mrb[7].mxu0  ;;  %v7606_v20 = vld [vmem:[#allocation14 + $0x1c4] ss:$16 sps:$4 sm:$0xff]  }
 0x556   :  { %v711_v22 = vadd.f32 %v7142_v19, %v6414_v17  ;;  %v7603_v17 = vld [vmem:[#allocation14 + $0x1ac] ss:$16 sps:$4 sm:$0xff]   ;;  %v7601_v19 = vld [vmem:[#allocation14 + $0x1a8] ss:$16 sps:$4 sm:$0xff]  }
 0x557   :  { %v7609_v21 = vld [vmem:[#allocation14 + $0x1cc] ss:$16 sps:$4 sm:$0xff]  }
 0x558   :  { %v716_v23 = vpack.c.bf16 %v711_v22, %v711_v22  ;;  %v7604_v22 = vld [vmem:[#allocation14 + $0x1c0] ss:$16 sps:$4 sm:$0xff]  }
 0x55a   :  { %717 = vst [vmem:[#allocation2] sm:$0x1] %v716_v23   ;;  %v7607_v23 = vld [vmem:[#allocation14 + $0x1c8] ss:$16 sps:$4 sm:$0xff]  }
 0x561   :  { %v6432_v24 = vld.sshfl [vmem:[#allocation2] sm:$0x11 pattern:$0x75316420] }
 0x562   :  { %v815_v25 = vcombine.high %v6432_v24, %v6432_v24  ;;  %v822_v29 = vrot.slane %v6432_v24, %v8859_v32  ;;  %v7610_v24 = vld [vmem:[#allocation14 + $0x1e0] ss:$16 sps:$4 sm:$0xff]  }
 0x564   :  { %v829_v26 = vrot.slane %v815_v25, %v8859_v32  ;;  %v7612_v25 = vld [vmem:[#allocation14 + $0x1e4] ss:$16 sps:$4 sm:$0xff]  }
 0x566   :  { %1184 = vmatprep.mubr.bf16.mxu1 %v829_v26  ;;  %1225 = vmatprep.mubr.bf16.mxu0 %v829_v26  ;;  %v7613_v26 = vld [vmem:[#allocation14 + $0x1e8] ss:$16 sps:$4 sm:$0xff]  }
 0x567   :  { %1185 = vmatmul.mubr.bf16.vlgmr.msra.gmra.mrb[12].mxu1 %v822_v29  ;;  %1226 = vmatmul.mubr.bf16.vlgmr.msra.gmra.mrb[8].mxu0 %v822_v29  ;;  %v7617_v29 = vld [vmem:[#allocation15 + $0xc0] sm:$0xff]  }
 0x568   :  { %1693 = vmatpush1.bf16.msra.mxu1 %v7520_v27  ;;  %1734 = vmatpush1.bf16.msra.mxu0 %v7523_v28  ;;  %v7615_v27 = vld [vmem:[#allocation14 + $0x1ec] ss:$16 sps:$4 sm:$0xff]   ;;  %v7616_v28 = vld [vmem:[#allocation15 + $0x40] sm:$0xff]  }
 0x569   :  { %1694 = vmatprep.subr.bf16.mxu1 %v7528_v31  ;;  %1735 = vmatprep.subr.bf16.mxu0 %v7531_v33  ;;  %v8869_v31 = vsub.s32 0, %v8856_v30  ;;  %v785_v33 = vld [vmem:[%s9013_s9] sm:$0xf] }
 0x56c   :  { %1695 = vmatpush1.bf16.msra.mxu1 %v7526_v34  ;;  %1736 = vmatpush1.bf16.msra.mxu0 %v7529_v35  ;;  %v8875_v34 = vsub.s32 1, %v8856_v30  ;;  %v790_v35 = vrot.slane %v785_v33, %v8869_v31 }
 0x56d   :  { %1696 = vmatprep.subr.bf16.mxu1 %v7534_v36  ;;  %1737 = vmatprep.subr.bf16.mxu0 %v7537_v37 }
 0x56e   :  { %v794_v36 = vrot.slane %v785_v33, %v8875_v34 }
 0x570   :  { %1697 = vmatpush1.bf16.msra.mxu1 %v7532_v38  ;;  %1738 = vmatpush1.bf16.msra.mxu0 %v7535_v39  ;;  %v8880_v39 = vsub.s32 3, %v8856_v30 }
 0x571   :  { %1698 = vmatprep.subr.bf16.mxu1 %v7540_v40  ;;  %1739 = vmatprep.subr.bf16.mxu0 %v7543_v41 }
 0x574   :  { %1699 = vmatpush1.bf16.msra.mxu1 %v7538_v42  ;;  %1740 = vmatpush1.bf16.msra.mxu0 %v7541_v43 }
 0x575   :  { %1700 = vmatprep.subr.bf16.mxu1 %v7546_v44  ;;  %1741 = vmatprep.subr.bf16.mxu0 %v7549_v45 }
 0x578   :  { %1701 = vmatpush1.bf16.msra.mxu1 %v7544_v46  ;;  %1742 = vmatpush1.bf16.msra.mxu0 %v7547_v47 }
 0x579   :  { %1702 = vmatprep.subr.bf16.mxu1 %v7552_v48  ;;  %1743 = vmatprep.subr.bf16.mxu0 %v7555_v49 }
 0x57c   :  { %1703 = vmatpush1.bf16.msra.mxu1 %v7550_v50  ;;  %1744 = vmatpush1.bf16.msra.mxu0 %v7553_v51  ;;  %v802_v50 = vrot.slane %v785_v33, %v8880_v39  ;;  %v8884_v51 = vsub.s32 2, %v8856_v30 }
 0x57d   :  { %1704 = vmatprep.subr.bf16.mxu1 %v7558_v52  ;;  %1745 = vmatprep.subr.bf16.mxu0 %v7561_v53 }
 0x57e   :  { %v798_v53 = vrot.slane %v785_v33, %v8884_v51  ;;  %v7635_v33 = vld [vmem:[#allocation15 + $0xa0] sm:$0xff]  }
 0x580   :  { %1705 = vmatpush1.bf16.msra.mxu1 %v7556_v54  ;;  %1746 = vmatpush1.bf16.msra.mxu0 %v7559_v55 }
 0x581   :  { %1706 = vmatprep.subr.bf16.mxu1 %v7564_v56  ;;  %1747 = vmatprep.subr.bf16.mxu0 %v7567_v57 }
 0x584   :  { %1707 = vmatpush1.bf16.msra.mxu1 %v7562_v58  ;;  %1748 = vmatpush1.bf16.msra.mxu0 %v7565_v59 }
 0x585   :  { %1708 = vmatprep.subr.bf16.mxu1 %v7570_v60  ;;  %1749 = vmatprep.subr.bf16.mxu0 %v7573_v61 }
 0x588   :  { %1709 = vmatpush1.bf16.msra.mxu1 %v7568_v62  ;;  %1750 = vmatpush1.bf16.msra.mxu0 %v7571_v63 }
 0x589   :  { %1710 = vmatprep.subr.bf16.mxu1 %v7576_v0  ;;  %1751 = vmatprep.subr.bf16.mxu0 %v7579_v1 }
 0x58c   :  { %1711 = vmatpush1.bf16.msra.mxu1 %v7574_v2  ;;  %1752 = vmatpush1.bf16.msra.mxu0 %v7577_v3 }
 0x58d   :  { %1712 = vmatprep.subr.bf16.mxu1 %v7582_v4  ;;  %1753 = vmatprep.subr.bf16.mxu0 %v7585_v5 }
 0x590   :  { %1713 = vmatpush1.bf16.msra.mxu1 %v7580_v6  ;;  %1754 = vmatpush1.bf16.msra.mxu0 %v7583_v7  ;;  %v2127_v7 = vld [vmem:[#allocation3 + $0x2] sm:$0x3] }
 0x591   :  { %1714 = vmatprep.subr.bf16.mxu1 %v7588_v8  ;;  %1755 = vmatprep.subr.bf16.mxu0 %v7591_v9  ;;  %v2128_v8 = vpack.c.bf16 %v2127_v7, %v2127_v7 }
 0x594   :  { %1715 = vmatpush1.bf16.msra.mxu1 %v7586_v10  ;;  %1756 = vmatpush1.bf16.msra.mxu0 %v7589_v11 }
 0x595   :  { %1716 = vmatprep.subr.bf16.mxu1 %v7594_v12  ;;  %1757 = vmatprep.subr.bf16.mxu0 %v7597_v13  ;;  %v7618_v12 = vld [vmem:[#allocation15] sm:$0xff]  }
 0x596   :  { %v7619_v13 = vld [vmem:[#allocation15 + $0x80] sm:$0xff]  }
 0x598   :  { %1717 = vmatpush1.bf16.msra.mxu1 %v7592_v14  ;;  %1758 = vmatpush1.bf16.msra.mxu0 %v7595_v15  ;;  %v7620_v15 = vld [vmem:[#allocation15 + $0x48] sm:$0xff]  }
 0x599   :  { %1718 = vmatprep.subr.bf16.mxu1 %v7600_v16  ;;  %1759 = vmatprep.subr.bf16.mxu0 %v7603_v17  ;;  %v7621_v16 = vld [vmem:[#allocation15 + $0xc8] sm:$0xff]  }
 0x59a   :  { %v7622_v17 = vld [vmem:[#allocation15 + $0x8] sm:$0xff]  }
 0x59c   :  { %1719 = vmatpush1.bf16.msra.mxu1 %v7598_v18  ;;  %1760 = vmatpush1.bf16.msra.mxu0 %v7601_v19  ;;  %v7623_v18 = vld [vmem:[#allocation15 + $0x88] sm:$0xff]   ;;  %v7624_v19 = vld [vmem:[#allocation15 + $0x50] sm:$0xff]  }
 0x59d   :  { %1720 = vmatprep.subr.bf16.mxu1 %v7606_v20  ;;  %1761 = vmatprep.subr.bf16.mxu0 %v7609_v21  ;;  %v7625_v20 = vld [vmem:[#allocation15 + $0xd0] sm:$0xff]  }
 0x59e   :  { %v7626_v21 = vld [vmem:[#allocation15 + $0x10] sm:$0xff]  }
 0x5a0   :  { %1721 = vmatpush1.bf16.msra.mxu1 %v7604_v22  ;;  %1762 = vmatpush1.bf16.msra.mxu0 %v7607_v23  ;;  %v7627_v22 = vld [vmem:[#allocation15 + $0x90] sm:$0xff]   ;;  %v7628_v23 = vld [vmem:[#allocation15 + $0x58] sm:$0xff]  }
 0x5a1   :  { %1722 = vmatprep.subr.bf16.mxu1 %v7612_v25  ;;  %1763 = vmatprep.subr.bf16.mxu0 %v7615_v27  ;;  %v7630_v25 = vld [vmem:[#allocation15 + $0x18] sm:$0xff]   ;;  %v7632_v27 = vld [vmem:[#allocation15 + $0x60] sm:$0xff]  }
 0x5a4   :  { %1723 = vmatpush1.bf16.msra.mxu1 %v7610_v24  ;;  %1764 = vmatpush1.bf16.msra.mxu0 %v7613_v26  ;;  %v7629_v24 = vld [vmem:[#allocation15 + $0xd8] sm:$0xff]  }
 0x5a5   :  { %7146 = vmatprep.subr.bf16.mxu1 %v7616_v28  ;;  %7168 = vmatprep.subr.bf16.mxu0 %v7617_v29  ;;  %v7631_v26 = vld [vmem:[#allocation15 + $0x98] sm:$0xff]   ;;  %v7633_v28 = vld [vmem:[#allocation15 + $0xe0] sm:$0xff]  }
 0x5a6   :  { %v7634_v29 = vld [vmem:[#allocation15 + $0x20] sm:$0xff]  }
 0x63a   :  { %v1186_v37 = vpop.f32.mrb[12].mxu1  ;;  %v1227_v38 = vpop.f32.mrb[8].mxu0 }
 0x63b   :  { %v1187_v40 = vadd.f32 %v1186_v37, %v790_v35  ;;  %v1188_v41 = vpop.f32.mrb[13].mxu1  ;;  %v1229_v42 = vpop.f32.mrb[9].mxu0  ;;  %v1228_v55 = vadd.f32 %v1227_v38, %v798_v53  ;;  %v7636_v35 = vld [vmem:[#allocation15 + $0x68] sm:$0xff]  }
 0x63c   :  { %v1189_v43 = vadd.f32 %v1188_v41, %v794_v36  ;;  %v1190_v44 = vpop.f32.mrb[14].mxu1  ;;  %v1231_v45 = vpop.f32.mrb[10].mxu0  ;;  %v1230_v52 = vadd.f32 %v1229_v42, %v802_v50  ;;  %v7637_v36 = vld [vmem:[#allocation15 + $0xe8] sm:$0xff]   ;;  %v7641_v41 = vld [vmem:[#allocation15 + $0xf0] sm:$0xff]   ;;  %v1325_v50 = vld [vmem:[%s9015_s11] sm:$0xf] }
 0x63d   :  { %v6497_v46 = vmul.f32 -1.442695, %v1187_v40  ;;  %v1191_v47 = vpop.f32.mrb[15].mxu1  ;;  %v1232_v48 = vpop.f32.mrb[11].mxu0  ;;  %v7638_v37 = vld [vmem:[#allocation15 + $0x28] sm:$0xff]   ;;  %v7640_v40 = vld [vmem:[#allocation15 + $0x70] sm:$0xff]   ;;  %v1338_v53 = vrot.slane %v1325_v50, %v8884_v51 }
 0x63e   :  { %v6498_v49 = vmul.f32 -1.442695, %v1189_v43  ;;  %v6499_v54 = vmul.f32 -1.442695, %v1230_v52  ;;  %v7639_v38 = vld [vmem:[#allocation15 + $0xa8] sm:$0xff]   ;;  %v7642_v42 = vld [vmem:[#allocation15 + $0x30] sm:$0xff]   ;;  %v1330_v52 = vrot.slane %v1325_v50, %v8869_v31 }
 0x63f   :  { %8324 = vpow2.f32 %v6497_v46  ;;  %v7643_v43 = vld [vmem:[#allocation15 + $0xb0] sm:$0xff]   ;;  %v7644_v44 = vld [vmem:[#allocation15 + $0x78] sm:$0xff]  }
 0x640   :  { %8326 = vpow2.f32 %v6498_v49  ;;  %v7645_v45 = vld [vmem:[#allocation15 + $0xf8] sm:$0xff]   ;;  %v7650_v48 = vld [vmem:[#allocation12 + $0x4] ss:$16 sps:$4 sm:$0xff]  }
 0x641   :  { %8328 = vpow2.f32 %v6499_v54  ;;  %v7646_v46 = vld [vmem:[#allocation15 + $0x38] sm:$0xff]   ;;  %v1334_v54 = vrot.slane %v1325_v50, %v8875_v34 }
 0x642   :  { %8330 = vtanh.f32 %v1228_v55  ;;  %v7647_v47 = vld [vmem:[#allocation15 + $0xb8] sm:$0xff]   ;;  %v1342_v55 = vrot.slane %v1325_v50, %v8880_v39  ;;  %v7698_v50 = vld [vmem:[#allocation12 + $0x104] ss:$16 sps:$4 sm:$0xff]  }
 0x643   :  { %v7653_v49 = vld [vmem:[#allocation12 + $0xc] ss:$16 sps:$4 sm:$0xff]  }
 0x649   :  { %v8325_v56 = vpop.eup %8324 }
 0x64a   :  { %v8327_v57 = vpop.eup %8326  ;;  %v1237_v58 = vadd.f32 1.0, %v8325_v56 }
 0x64b   :  { %v1243_v59 = vadd.f32 1.0, %v8327_v57  ;;  %v8329_v60 = vpop.eup %8328 }
 0x64c   :  { %8332 = vrcp.f32 %v1237_v58  ;;  %v8331_v61 = vpop.eup %8330  ;;  %v1250_v0 = vadd.f32 1.0, %v8329_v60 }
 0x64d   :  { %8334 = vrcp.f32 %v1243_v59 }
 0x64e   :  { %8336 = vrcp.f32 %v1250_v0 }
 0x656   :  { %v8333_v62 = vpop.eup %8332 }
 0x657   :  { %v8335_v63 = vpop.eup %8334  ;;  %v1254_v30 = vmul.f32 %v8333_v62, %v8331_v61 }
 0x658   :  { %v1253_v1 = vmul.f32 0.0, %v8335_v63  ;;  %v8337_v3 = vpop.eup %8336 }
 0x65a   :  { %v8887_v2 = vadd.f32 %v1254_v30, %v1253_v1 }
 0x65c   :  { %8338 = vtanh.f32 %v8887_v2 }
 0x666   :  { %v8339_v4 = vpop.eup %8338 }
 0x667   :  { %v1257_v5 = vmul.f32 %v8339_v4, %v8337_v3 }
 0x669   :  { %v1258_v6 = vpack.c.bf16 %v1257_v5, %v1257_v5 }
 0x66b   :  { %1259 = vst [vmem:[#allocation2 + $0x1] sm:$0x1] %v1258_v6 }
 0x672   :  { %v6500_v9 = vld.sshfl [vmem:[#allocation2] sm:$0x11 pattern:$0x75316420] }
 0x673   :  { %2130 = vst [vmem:[#allocation2 + $0x1] sm:$0x1] %v1258_v6  ;;  %v1355_v10 = vcombine.high %v6500_v9, %v6500_v9  ;;  %2129 = vst [vmem:[#allocation2] sm:$0x1] %v2128_v8  ;;  %v1362_v14 = vrot.slane %v6500_v9, %v8859_v32 }
 0x675   :  { %v1369_v11 = vrot.slane %v1355_v10, %v8859_v32 }
 0x677   :  { %1724 = vmatprep.mubr.bf16.mxu1 %v1369_v11  ;;  %1765 = vmatprep.mubr.bf16.mxu0 %v1369_v11 }
 0x678   :  { %1725 = vmatmul.mubr.bf16.vlgmr.msra.gmra.mrb[16].mxu1 %v1362_v14  ;;  %1766 = vmatmul.mubr.bf16.vlgmr.msra.gmra.mrb[12].mxu0 %v1362_v14 }
 0x679   :  { %7147 = vmatpush3.bf16.msra.mxu1 %v7618_v12  ;;  %7169 = vmatpush3.bf16.msra.mxu0 %v7619_v13  ;;  %v7648_v12 = vld [vmem:[#allocation12] ss:$16 sps:$4 sm:$0xff]   ;;  %v7651_v13 = vld [vmem:[#allocation12 + $0x8] ss:$16 sps:$4 sm:$0xff]  }
 0x67a   :  { %7148 = vmatprep.subr.bf16.mxu1 %v7620_v15  ;;  %7170 = vmatprep.subr.bf16.mxu0 %v7621_v16  ;;  %v8899_v1 = vld.sshfl [vmem:[#allocation2] sm:$0x11 pattern:$0x75316420]  ;;  %v7656_v16 = vld [vmem:[#allocation12 + $0x24] ss:$16 sps:$4 sm:$0xff]  }
 0x67b   :  { %v2226_v9 = vcombine.high %v8899_v1, %v8899_v1 }
 0x67d   :  { %7149 = vmatpush3.bf16.msra.mxu1 %v7622_v17  ;;  %7171 = vmatpush3.bf16.msra.mxu0 %v7623_v18  ;;  %v7659_v17 = vld [vmem:[#allocation12 + $0x2c] ss:$16 sps:$4 sm:$0xff]   ;;  %v2240_v18 = vrot.slane %v2226_v9, %v8859_v32 }
 0x67e   :  { %7150 = vmatprep.subr.bf16.mxu1 %v7624_v19  ;;  %7172 = vmatprep.subr.bf16.mxu0 %v7625_v20  ;;  %v7654_v19 = vld [vmem:[#allocation12 + $0x20] ss:$16 sps:$4 sm:$0xff]   ;;  %v7657_v20 = vld [vmem:[#allocation12 + $0x28] ss:$16 sps:$4 sm:$0xff]   ;;  %v7731_v9 = vld [vmem:[#allocation12 + $0x1ac] ss:$16 sps:$4 sm:$0xff]  }
 0x681   :  { %7151 = vmatpush3.bf16.msra.mxu1 %v7626_v21  ;;  %7173 = vmatpush3.bf16.msra.mxu0 %v7627_v22  ;;  %v7662_v21 = vld [vmem:[#allocation12 + $0x44] ss:$16 sps:$4 sm:$0xff]   ;;  %v7665_v22 = vld [vmem:[#allocation12 + $0x4c] ss:$16 sps:$4 sm:$0xff]  }
 0x682   :  { %7152 = vmatprep.subr.bf16.mxu1 %v7628_v23  ;;  %7174 = vmatprep.subr.bf16.mxu0 %v7629_v24  ;;  %v7660_v23 = vld [vmem:[#allocation12 + $0x40] ss:$16 sps:$4 sm:$0xff]   ;;  %v7663_v24 = vld [vmem:[#allocation12 + $0x48] ss:$16 sps:$4 sm:$0xff]  }
 0x685   :  { %7153 = vmatpush3.bf16.msra.mxu1 %v7630_v25  ;;  %7175 = vmatpush3.bf16.msra.mxu0 %v7631_v26  ;;  %v7668_v25 = vld [vmem:[#allocation12 + $0x64] ss:$16 sps:$4 sm:$0xff]   ;;  %v7671_v26 = vld [vmem:[#allocation12 + $0x6c] ss:$16 sps:$4 sm:$0xff]  }
 0x686   :  { %7154 = vmatprep.subr.bf16.mxu1 %v7632_v27  ;;  %7176 = vmatprep.subr.bf16.mxu0 %v7633_v28  ;;  %v7666_v27 = vld [vmem:[#allocation12 + $0x60] ss:$16 sps:$4 sm:$0xff]   ;;  %v7669_v28 = vld [vmem:[#allocation12 + $0x68] ss:$16 sps:$4 sm:$0xff]  }
 0x689   :  { %7155 = vmatpush3.bf16.msra.mxu1 %v7634_v29  ;;  %7177 = vmatpush3.bf16.msra.mxu0 %v7635_v33  ;;  %v7674_v29 = vld [vmem:[#allocation12 + $0x84] ss:$16 sps:$4 sm:$0xff]   ;;  %v7677_v33 = vld [vmem:[#allocation12 + $0x8c] ss:$16 sps:$4 sm:$0xff]  }
 0x68a   :  { %7156 = vmatprep.subr.bf16.mxu1 %v7636_v35  ;;  %7178 = vmatprep.subr.bf16.mxu0 %v7637_v36  ;;  %v7672_v35 = vld [vmem:[#allocation12 + $0x80] ss:$16 sps:$4 sm:$0xff]   ;;  %v7675_v36 = vld [vmem:[#allocation12 + $0x88] ss:$16 sps:$4 sm:$0xff]  }
 0x68d   :  { %7157 = vmatpush3.bf16.msra.mxu1 %v7638_v37  ;;  %7179 = vmatpush3.bf16.msra.mxu0 %v7639_v38  ;;  %v7680_v37 = vld [vmem:[#allocation12 + $0xa4] ss:$16 sps:$4 sm:$0xff]   ;;  %v7683_v38 = vld [vmem:[#allocation12 + $0xac] ss:$16 sps:$4 sm:$0xff]  }
 0x68e   :  { %7158 = vmatprep.subr.bf16.mxu1 %v7640_v40  ;;  %7180 = vmatprep.subr.bf16.mxu0 %v7641_v41  ;;  %v7678_v40 = vld [vmem:[#allocation12 + $0xa0] ss:$16 sps:$4 sm:$0xff]   ;;  %v7681_v41 = vld [vmem:[#allocation12 + $0xa8] ss:$16 sps:$4 sm:$0xff]  }
 0x691   :  { %7159 = vmatpush3.bf16.msra.mxu1 %v7642_v42  ;;  %7181 = vmatpush3.bf16.msra.mxu0 %v7643_v43  ;;  %v7686_v42 = vld [vmem:[#allocation12 + $0xc4] ss:$16 sps:$4 sm:$0xff]   ;;  %v7689_v43 = vld [vmem:[#allocation12 + $0xcc] ss:$16 sps:$4 sm:$0xff]  }
 0x692   :  { %7160 = vmatprep.subr.bf16.mxu1 %v7644_v44  ;;  %7182 = vmatprep.subr.bf16.mxu0 %v7645_v45  ;;  %v7684_v44 = vld [vmem:[#allocation12 + $0xc0] ss:$16 sps:$4 sm:$0xff]   ;;  %v7687_v45 = vld [vmem:[#allocation12 + $0xc8] ss:$16 sps:$4 sm:$0xff]  }
 0x695   :  { %7161 = vmatpush3.bf16.msra.mxu1 %v7646_v46  ;;  %7183 = vmatpush3.bf16.msra.mxu0 %v7647_v47  ;;  %v7692_v46 = vld [vmem:[#allocation12 + $0xe4] ss:$16 sps:$4 sm:$0xff]   ;;  %v7695_v47 = vld [vmem:[#allocation12 + $0xec] ss:$16 sps:$4 sm:$0xff]  }
 0x696   :  { %2563 = vmatprep.subr.bf16.mxu1 %v7650_v48  ;;  %2604 = vmatprep.subr.bf16.mxu0 %v7653_v49  ;;  %v7690_v48 = vld [vmem:[#allocation12 + $0xe0] ss:$16 sps:$4 sm:$0xff]   ;;  %v7693_v49 = vld [vmem:[#allocation12 + $0xe8] ss:$16 sps:$4 sm:$0xff]  }
 0x74b   :  { %v1726_v56 = vpop.f32.mrb[16].mxu1  ;;  %v1767_v57 = vpop.f32.mrb[12].mxu0 }
 0x74c   :  { %v1727_v58 = vadd.f32 %v1726_v56, %v1330_v52  ;;  %v1768_v59 = vadd.f32 %v1767_v57, %v1338_v53  ;;  %v1728_v60 = vpop.f32.mrb[17].mxu1  ;;  %v1769_v61 = vpop.f32.mrb[13].mxu0  ;;  %v7701_v52 = vld [vmem:[#allocation12 + $0x10c] ss:$16 sps:$4 sm:$0xff]   ;;  %v7696_v53 = vld [vmem:[#allocation12 + $0x100] ss:$16 sps:$4 sm:$0xff]  }
 0x74d   :  { %v1729_v62 = vadd.f32 %v1728_v60, %v1334_v54  ;;  %v1770_v63 = vadd.f32 %v1769_v61, %v1342_v55  ;;  %v1730_v30 = vpop.f32.mrb[18].mxu1  ;;  %v1771_v0 = vpop.f32.mrb[14].mxu0  ;;  %v7699_v54 = vld [vmem:[#allocation12 + $0x108] ss:$16 sps:$4 sm:$0xff]   ;;  %v7704_v55 = vld [vmem:[#allocation12 + $0x124] ss:$16 sps:$4 sm:$0xff]  }
 0x74e   :  { %v1774_v3 = vmax.f32 %v1727_v58, 0.0  ;;  %v1776_v4 = vmax.f32 %v1768_v59, 0.0  ;;  %v1731_v5 = vpop.f32.mrb[19].mxu1  ;;  %v1772_v6 = vpop.f32.mrb[15].mxu0  ;;  %v7707_v56 = vld [vmem:[#allocation12 + $0x12c] ss:$16 sps:$4 sm:$0xff]  }
 0x74f   :  { %v1775_v7 = vmax.f32 %v1729_v62, 0.0  ;;  %v1777_v8 = vmax.f32 %v1770_v63, 0.0  ;;  %v7702_v57 = vld [vmem:[#allocation12 + $0x120] ss:$16 sps:$4 sm:$0xff]   ;;  %v7705_v58 = vld [vmem:[#allocation12 + $0x128] ss:$16 sps:$4 sm:$0xff]  }
 0x750   :  { %v1778_v14 = vpack.c.bf16 %v1774_v3, %v1774_v3  ;;  %v1780_v15 = vpack.c.bf16 %v1776_v4, %v1776_v4  ;;  %v7710_v59 = vld [vmem:[#allocation12 + $0x144] ss:$16 sps:$4 sm:$0xff]   ;;  %v7713_v60 = vld [vmem:[#allocation12 + $0x14c] ss:$16 sps:$4 sm:$0xff]   ;;  %v7708_v61 = vld [vmem:[#allocation12 + $0x140] ss:$16 sps:$4 sm:$0xff]  }
 0x751   :  { %v1779_v10 = vpack.c.bf16 %v1775_v7, %v1775_v7  ;;  %v1781_v11 = vpack.c.bf16 %v1777_v8, %v1777_v8  ;;  %v7711_v62 = vld [vmem:[#allocation12 + $0x148] ss:$16 sps:$4 sm:$0xff]   ;;  %v7716_v63 = vld [vmem:[#allocation12 + $0x164] ss:$16 sps:$4 sm:$0xff]   ;;  %v7719_v30 = vld [vmem:[#allocation12 + $0x16c] ss:$16 sps:$4 sm:$0xff]  }
 0x752   :  { %v7714_v0 = vld [vmem:[#allocation12 + $0x160] ss:$16 sps:$4 sm:$0xff]   ;;  %v7717_v3 = vld [vmem:[#allocation12 + $0x168] ss:$16 sps:$4 sm:$0xff]   ;;  %v7722_v4 = vld [vmem:[#allocation12 + $0x184] ss:$16 sps:$4 sm:$0xff]  }
 0x753   :  { %2077 = vmatprep.mubr.bf16.mxu1 %v1779_v10  ;;  %2117 = vmatprep.mubr.bf16.mxu0 %v1781_v11  ;;  %v7725_v5 = vld [vmem:[#allocation12 + $0x18c] ss:$16 sps:$4 sm:$0xff]   ;;  %v7720_v6 = vld [vmem:[#allocation12 + $0x180] ss:$16 sps:$4 sm:$0xff]   ;;  %v7723_v7 = vld [vmem:[#allocation12 + $0x188] ss:$16 sps:$4 sm:$0xff]  }
 0x754   :  { %2078 = vmatmul.mubr.bf16.vlgmr.msra.gmra.mrb[20].mxu1 %v1778_v14  ;;  %2118 = vmatmul.mubr.bf16.vlgmr.msra.gmra.mrb[16].mxu0 %v1780_v15  ;;  %v7728_v8 = vld [vmem:[#allocation12 + $0x1a4] ss:$16 sps:$4 sm:$0xff]   ;;  %v7726_v10 = vld [vmem:[#allocation12 + $0x1a0] ss:$16 sps:$4 sm:$0xff]   ;;  %v7729_v11 = vld [vmem:[#allocation12 + $0x1a8] ss:$16 sps:$4 sm:$0xff]  }
 0x755   :  { %2564 = vmatpush1.bf16.msra.mxu1 %v7648_v12  ;;  %2605 = vmatpush1.bf16.msra.mxu0 %v7651_v13  ;;  %v7734_v12 = vld [vmem:[#allocation12 + $0x1c4] ss:$16 sps:$4 sm:$0xff]   ;;  %v7737_v13 = vld [vmem:[#allocation12 + $0x1cc] ss:$16 sps:$4 sm:$0xff]   ;;  %v7732_v14 = vld [vmem:[#allocation12 + $0x1c0] ss:$16 sps:$4 sm:$0xff]  }
 0x756   :  { %2595 = vmatprep.mubr.bf16.mxu1 %v2240_v18  ;;  %2636 = vmatprep.mubr.bf16.mxu0 %v2240_v18  ;;  %v7735_v15 = vld [vmem:[#allocation12 + $0x1c8] ss:$16 sps:$4 sm:$0xff]   ;;  %v7738_v18 = vld [vmem:[#allocation12 + $0x1e0] ss:$16 sps:$4 sm:$0xff]  }
 0x757   :  { %2565 = vmatprep.subr.bf16.mxu1 %v7656_v16  ;;  %2606 = vmatprep.subr.bf16.mxu0 %v7659_v17  ;;  %v7740_v16 = vld [vmem:[#allocation12 + $0x1e4] ss:$16 sps:$4 sm:$0xff]   ;;  %v7743_v17 = vld [vmem:[#allocation12 + $0x1ec] ss:$16 sps:$4 sm:$0xff]  }
 0x759   :  { %2566 = vmatpush1.bf16.msra.mxu1 %v7654_v19  ;;  %2607 = vmatpush1.bf16.msra.mxu0 %v7657_v20  ;;  %v7741_v19 = vld [vmem:[#allocation12 + $0x1e8] ss:$16 sps:$4 sm:$0xff]   ;;  %v2233_v20 = vrot.slane %v8899_v1, %v8859_v32  ;;  %v7761_v1 = vld [vmem:[#allocation14 + $0x24c] ss:$16 sps:$4 sm:$0xff]  }
 0x75a   :  { %2567 = vmatprep.subr.bf16.mxu1 %v7662_v21  ;;  %2608 = vmatprep.subr.bf16.mxu0 %v7665_v22  ;;  %v7744_v21 = vld [vmem:[#allocation14 + $0x200] ss:$16 sps:$4 sm:$0xff]   ;;  %v7746_v22 = vld [vmem:[#allocation14 + $0x204] ss:$16 sps:$4 sm:$0xff]  }
 0x75d   :  { %2568 = vmatpush1.bf16.msra.mxu1 %v7660_v23  ;;  %2609 = vmatpush1.bf16.msra.mxu0 %v7663_v24  ;;  %v7747_v23 = vld [vmem:[#allocation14 + $0x208] ss:$16 sps:$4 sm:$0xff]   ;;  %v7749_v24 = vld [vmem:[#allocation14 + $0x20c] ss:$16 sps:$4 sm:$0xff]  }
 0x75e   :  { %2569 = vmatprep.subr.bf16.mxu1 %v7668_v25  ;;  %2610 = vmatprep.subr.bf16.mxu0 %v7671_v26  ;;  %v7752_v25 = vld [vmem:[#allocation14 + $0x224] ss:$16 sps:$4 sm:$0xff]   ;;  %v7755_v26 = vld [vmem:[#allocation14 + $0x22c] ss:$16 sps:$4 sm:$0xff]  }
 0x761   :  { %2570 = vmatpush1.bf16.msra.mxu1 %v7666_v27  ;;  %2611 = vmatpush1.bf16.msra.mxu0 %v7669_v28  ;;  %v7750_v27 = vld [vmem:[#allocation14 + $0x220] ss:$16 sps:$4 sm:$0xff]   ;;  %v7753_v28 = vld [vmem:[#allocation14 + $0x228] ss:$16 sps:$4 sm:$0xff]  }
 0x762   :  { %2571 = vmatprep.subr.bf16.mxu1 %v7674_v29  ;;  %2612 = vmatprep.subr.bf16.mxu0 %v7677_v33  ;;  %v7758_v29 = vld [vmem:[#allocation14 + $0x244] ss:$16 sps:$4 sm:$0xff]   ;;  %v7756_v33 = vld [vmem:[#allocation14 + $0x240] ss:$16 sps:$4 sm:$0xff]  }
 0x765   :  { %2572 = vmatpush1.bf16.msra.mxu1 %v7672_v35  ;;  %2613 = vmatpush1.bf16.msra.mxu0 %v7675_v36  ;;  %v7759_v35 = vld [vmem:[#allocation14 + $0x248] ss:$16 sps:$4 sm:$0xff]   ;;  %v7764_v36 = vld [vmem:[#allocation14 + $0x264] ss:$16 sps:$4 sm:$0xff]  }
 0x766   :  { %2573 = vmatprep.subr.bf16.mxu1 %v7680_v37  ;;  %2614 = vmatprep.subr.bf16.mxu0 %v7683_v38  ;;  %v7767_v37 = vld [vmem:[#allocation14 + $0x26c] ss:$16 sps:$4 sm:$0xff]   ;;  %v7762_v38 = vld [vmem:[#allocation14 + $0x260] ss:$16 sps:$4 sm:$0xff]  }
 0x769   :  { %2574 = vmatpush1.bf16.msra.mxu1 %v7678_v40  ;;  %2615 = vmatpush1.bf16.msra.mxu0 %v7681_v41  ;;  %v7765_v40 = vld [vmem:[#allocation14 + $0x268] ss:$16 sps:$4 sm:$0xff]   ;;  %v7770_v41 = vld [vmem:[#allocation14 + $0x284] ss:$16 sps:$4 sm:$0xff]  }
 0x76a   :  { %2575 = vmatprep.subr.bf16.mxu1 %v7686_v42  ;;  %2616 = vmatprep.subr.bf16.mxu0 %v7689_v43  ;;  %v7773_v42 = vld [vmem:[#allocation14 + $0x28c] ss:$16 sps:$4 sm:$0xff]   ;;  %v7768_v43 = vld [vmem:[#allocation14 + $0x280] ss:$16 sps:$4 sm:$0xff]  }
 0x76d   :  { %2576 = vmatpush1.bf16.msra.mxu1 %v7684_v44  ;;  %2617 = vmatpush1.bf16.msra.mxu0 %v7687_v45  ;;  %v7771_v44 = vld [vmem:[#allocation14 + $0x288] ss:$16 sps:$4 sm:$0xff]   ;;  %v7776_v45 = vld [vmem:[#allocation14 + $0x2a4] ss:$16 sps:$4 sm:$0xff]  }
 0x76e   :  { %2577 = vmatprep.subr.bf16.mxu1 %v7692_v46  ;;  %2618 = vmatprep.subr.bf16.mxu0 %v7695_v47  ;;  %v7779_v46 = vld [vmem:[#allocation14 + $0x2ac] ss:$16 sps:$4 sm:$0xff]   ;;  %v7774_v47 = vld [vmem:[#allocation14 + $0x2a0] ss:$16 sps:$4 sm:$0xff]  }
 0x771   :  { %2578 = vmatpush1.bf16.msra.mxu1 %v7690_v48  ;;  %2619 = vmatpush1.bf16.msra.mxu0 %v7693_v49  ;;  %v7777_v48 = vld [vmem:[#allocation14 + $0x2a8] ss:$16 sps:$4 sm:$0xff]   ;;  %v7782_v49 = vld [vmem:[#allocation14 + $0x2c4] ss:$16 sps:$4 sm:$0xff]  }
 0x772   :  { %2579 = vmatprep.subr.bf16.mxu1 %v7698_v50  ;;  %2620 = vmatprep.subr.bf16.mxu0 %v7701_v52  ;;  %v7785_v50 = vld [vmem:[#allocation14 + $0x2cc] ss:$16 sps:$4 sm:$0xff]   ;;  %v7780_v52 = vld [vmem:[#allocation14 + $0x2c0] ss:$16 sps:$4 sm:$0xff]  }
 0x775   :  { %2580 = vmatpush1.bf16.msra.mxu1 %v7696_v53  ;;  %2621 = vmatpush1.bf16.msra.mxu0 %v7699_v54  ;;  %v7783_v53 = vld [vmem:[#allocation14 + $0x2c8] ss:$16 sps:$4 sm:$0xff]   ;;  %v7788_v54 = vld [vmem:[#allocation14 + $0x2e4] ss:$16 sps:$4 sm:$0xff]  }
 0x776   :  { %2581 = vmatprep.subr.bf16.mxu1 %v7704_v55  ;;  %2622 = vmatprep.subr.bf16.mxu0 %v7707_v56  ;;  %v7791_v55 = vld [vmem:[#allocation14 + $0x2ec] ss:$16 sps:$4 sm:$0xff]   ;;  %v7786_v56 = vld [vmem:[#allocation14 + $0x2e0] ss:$16 sps:$4 sm:$0xff]  }
 0x779   :  { %2582 = vmatpush1.bf16.msra.mxu1 %v7702_v57  ;;  %2623 = vmatpush1.bf16.msra.mxu0 %v7705_v58  ;;  %v7789_v57 = vld [vmem:[#allocation14 + $0x2e8] ss:$16 sps:$4 sm:$0xff]   ;;  %v7794_v58 = vld [vmem:[#allocation14 + $0x304] ss:$16 sps:$4 sm:$0xff]  }
 0x77a   :  { %2583 = vmatprep.subr.bf16.mxu1 %v7710_v59  ;;  %2624 = vmatprep.subr.bf16.mxu0 %v7713_v60  ;;  %v7797_v59 = vld [vmem:[#allocation14 + $0x30c] ss:$16 sps:$4 sm:$0xff]   ;;  %v7792_v60 = vld [vmem:[#allocation14 + $0x300] ss:$16 sps:$4 sm:$0xff]  }
 0x77d   :  { %2584 = vmatpush1.bf16.msra.mxu1 %v7708_v61  ;;  %2625 = vmatpush1.bf16.msra.mxu0 %v7711_v62  ;;  %v7795_v61 = vld [vmem:[#allocation14 + $0x308] ss:$16 sps:$4 sm:$0xff]   ;;  %v7800_v62 = vld [vmem:[#allocation14 + $0x324] ss:$16 sps:$4 sm:$0xff]  }
 0x77e   :  { %2585 = vmatprep.subr.bf16.mxu1 %v7716_v63  ;;  %2626 = vmatprep.subr.bf16.mxu0 %v7719_v30  ;;  %v7803_v63 = vld [vmem:[#allocation14 + $0x32c] ss:$16 sps:$4 sm:$0xff]   ;;  %v7798_v30 = vld [vmem:[#allocation14 + $0x320] ss:$16 sps:$4 sm:$0xff]  }
 0x781   :  { %2586 = vmatpush1.bf16.msra.mxu1 %v7714_v0  ;;  %2627 = vmatpush1.bf16.msra.mxu0 %v7717_v3  ;;  %v7801_v0 = vld [vmem:[#allocation14 + $0x328] ss:$16 sps:$4 sm:$0xff]   ;;  %v7806_v3 = vld [vmem:[#allocation14 + $0x344] ss:$16 sps:$4 sm:$0xff]  }
 0x782   :  { %2587 = vmatprep.subr.bf16.mxu1 %v7722_v4  ;;  %2628 = vmatprep.subr.bf16.mxu0 %v7725_v5  ;;  %v7809_v4 = vld [vmem:[#allocation14 + $0x34c] ss:$16 sps:$4 sm:$0xff]   ;;  %v7804_v5 = vld [vmem:[#allocation14 + $0x340] ss:$16 sps:$4 sm:$0xff]  }
 0x785   :  { %2588 = vmatpush1.bf16.msra.mxu1 %v7720_v6  ;;  %2629 = vmatpush1.bf16.msra.mxu0 %v7723_v7  ;;  %v7807_v6 = vld [vmem:[#allocation14 + $0x348] ss:$16 sps:$4 sm:$0xff]   ;;  %v7812_v7 = vld [vmem:[#allocation14 + $0x364] ss:$16 sps:$4 sm:$0xff]  }
 0x786   :  { %2589 = vmatprep.subr.bf16.mxu1 %v7728_v8  ;;  %2630 = vmatprep.subr.bf16.mxu0 %v7731_v9  ;;  %v7815_v8 = vld [vmem:[#allocation14 + $0x36c] ss:$16 sps:$4 sm:$0xff]   ;;  %v7810_v9 = vld [vmem:[#allocation14 + $0x360] ss:$16 sps:$4 sm:$0xff]  }
 0x789   :  { %2590 = vmatpush1.bf16.msra.mxu1 %v7726_v10  ;;  %2631 = vmatpush1.bf16.msra.mxu0 %v7729_v11  ;;  %v7813_v10 = vld [vmem:[#allocation14 + $0x368] ss:$16 sps:$4 sm:$0xff]   ;;  %v7818_v11 = vld [vmem:[#allocation14 + $0x384] ss:$16 sps:$4 sm:$0xff]  }
 0x78a   :  { %2591 = vmatprep.subr.bf16.mxu1 %v7734_v12  ;;  %2632 = vmatprep.subr.bf16.mxu0 %v7737_v13  ;;  %v7821_v12 = vld [vmem:[#allocation14 + $0x38c] ss:$16 sps:$4 sm:$0xff]   ;;  %v7816_v13 = vld [vmem:[#allocation14 + $0x380] ss:$16 sps:$4 sm:$0xff]  }
 0x78d   :  { %2592 = vmatpush1.bf16.msra.mxu1 %v7732_v14  ;;  %2633 = vmatpush1.bf16.msra.mxu0 %v7735_v15  ;;  %v7819_v14 = vld [vmem:[#allocation14 + $0x388] ss:$16 sps:$4 sm:$0xff]   ;;  %v7822_v15 = vld [vmem:[#allocation14 + $0x3a0] ss:$16 sps:$4 sm:$0xff]  }
 0x78e   :  { %2593 = vmatprep.subr.bf16.mxu1 %v7740_v16  ;;  %2634 = vmatprep.subr.bf16.mxu0 %v7743_v17  ;;  %v7824_v16 = vld [vmem:[#allocation14 + $0x3a4] ss:$16 sps:$4 sm:$0xff]   ;;  %v7825_v17 = vld [vmem:[#allocation14 + $0x3a8] ss:$16 sps:$4 sm:$0xff]  }
 0x791   :  { %2594 = vmatpush1.bf16.msra.mxu1 %v7738_v18  ;;  %2635 = vmatpush1.bf16.msra.mxu0 %v7741_v19  ;;  %v7827_v18 = vld [vmem:[#allocation14 + $0x3ac] ss:$16 sps:$4 sm:$0xff]   ;;  %v7830_v19 = vld [vmem:[#allocation14 + $0x3c4] ss:$16 sps:$4 sm:$0xff]  }
 0x792   :  { %3105 = vmatprep.subr.bf16.mxu1 %v7746_v22  ;;  %3146 = vmatprep.subr.bf16.mxu0 %v7749_v24  ;;  %v7831_v22 = vld [vmem:[#allocation14 + $0x3c8] ss:$16 sps:$4 sm:$0xff]   ;;  %v7839_v24 = vld [vmem:[#allocation14 + $0x3ec] ss:$16 sps:$4 sm:$0xff]  }
 0x794   :  { %2596 = vmatmul.mubr.bf16.vlgmr.msra.gmra.mrb[24].mxu1 %v2233_v20  ;;  %2637 = vmatmul.mubr.bf16.vlgmr.msra.gmra.mrb[20].mxu0 %v2233_v20  ;;  %v7833_v20 = vld [vmem:[#allocation14 + $0x3cc] ss:$16 sps:$4 sm:$0xff]  }
 0x795   :  { %3106 = vmatpush1.bf16.msra.mxu1 %v7744_v21  ;;  %3147 = vmatpush1.bf16.msra.mxu0 %v7747_v23  ;;  %v7828_v21 = vld [vmem:[#allocation14 + $0x3c0] ss:$16 sps:$4 sm:$0xff]   ;;  %v7836_v23 = vld [vmem:[#allocation14 + $0x3e4] ss:$16 sps:$4 sm:$0xff]  }
 0x796   :  { %3107 = vmatprep.subr.bf16.mxu1 %v7752_v25  ;;  %3148 = vmatprep.subr.bf16.mxu0 %v7755_v26  ;;  %v7834_v25 = vld [vmem:[#allocation14 + $0x3e0] ss:$16 sps:$4 sm:$0xff]   ;;  %v7837_v26 = vld [vmem:[#allocation14 + $0x3e8] ss:$16 sps:$4 sm:$0xff]  }
 0x799   :  { %3108 = vmatpush1.bf16.msra.mxu1 %v7750_v27  ;;  %3149 = vmatpush1.bf16.msra.mxu0 %v7753_v28  ;;  %v7840_v27 = vld [vmem:[#allocation15 + $0x140] sm:$0xff]  }
 0x79a   :  { %3109 = vmatprep.subr.bf16.mxu1 %v7758_v29  ;;  %3150 = vmatprep.subr.bf16.mxu0 %v7761_v1  ;;  %v7841_v28 = vld [vmem:[#allocation15 + $0x1c0] sm:$0xff]  }
 0x79d   :  { %3110 = vmatpush1.bf16.msra.mxu1 %v7756_v33  ;;  %3151 = vmatpush1.bf16.msra.mxu0 %v7759_v35  ;;  %v6565_v33 = vld [vmem:[%s9017_s13] ss:$0 sm:$0xff] }
 0x79e   :  { %3111 = vmatprep.subr.bf16.mxu1 %v7764_v36  ;;  %3152 = vmatprep.subr.bf16.mxu0 %v7767_v37 }
 0x7a1   :  { %3112 = vmatpush1.bf16.msra.mxu1 %v7762_v38  ;;  %3153 = vmatpush1.bf16.msra.mxu0 %v7765_v40 }
 0x7a2   :  { %3113 = vmatprep.subr.bf16.mxu1 %v7770_v41  ;;  %3154 = vmatprep.subr.bf16.mxu0 %v7773_v42 }
 0x7a5   :  { %3114 = vmatpush1.bf16.msra.mxu1 %v7768_v43  ;;  %3155 = vmatpush1.bf16.msra.mxu0 %v7771_v44 }
 0x7a6   :  { %3115 = vmatprep.subr.bf16.mxu1 %v7776_v45  ;;  %3156 = vmatprep.subr.bf16.mxu0 %v7779_v46  ;;  %v2196_v46 = vld [vmem:[%s9013_s9] sm:$0xf] }
 0x7a9   :  { %3116 = vmatpush1.bf16.msra.mxu1 %v7774_v47  ;;  %3157 = vmatpush1.bf16.msra.mxu0 %v7777_v48  ;;  %v2201_v47 = vrot.slane %v2196_v46, %v8869_v31  ;;  %v2205_v48 = vrot.slane %v2196_v46, %v8875_v34 }
 0x7aa   :  { %3117 = vmatprep.subr.bf16.mxu1 %v7782_v49  ;;  %3158 = vmatprep.subr.bf16.mxu0 %v7785_v50 }
 0x7ad   :  { %3118 = vmatpush1.bf16.msra.mxu1 %v7780_v52  ;;  %3159 = vmatpush1.bf16.msra.mxu0 %v7783_v53 }
 0x7ae   :  { %3119 = vmatprep.subr.bf16.mxu1 %v7788_v54  ;;  %3160 = vmatprep.subr.bf16.mxu0 %v7791_v55 }
 0x7b1   :  { %3120 = vmatpush1.bf16.msra.mxu1 %v7786_v56  ;;  %3161 = vmatpush1.bf16.msra.mxu0 %v7789_v57 }
 0x7b2   :  { %3121 = vmatprep.subr.bf16.mxu1 %v7794_v58  ;;  %3162 = vmatprep.subr.bf16.mxu0 %v7797_v59 }
 0x7b5   :  { %3122 = vmatpush1.bf16.msra.mxu1 %v7792_v60  ;;  %3163 = vmatpush1.bf16.msra.mxu0 %v7795_v61 }
 0x7b6   :  { %3123 = vmatprep.subr.bf16.mxu1 %v7800_v62  ;;  %3164 = vmatprep.subr.bf16.mxu0 %v7803_v63  ;;  %v2213_v62 = vrot.slane %v2196_v46, %v8880_v39 }
 0x7b9   :  { %3124 = vmatpush1.bf16.msra.mxu1 %v7798_v30  ;;  %3165 = vmatpush1.bf16.msra.mxu0 %v7801_v0  ;;  %v2209_v30 = vrot.slane %v2196_v46, %v8884_v51  ;;  %v7859_v46 = vld [vmem:[#allocation15 + $0x1a0] sm:$0xff]  }
 0x7ba   :  { %3125 = vmatprep.subr.bf16.mxu1 %v7806_v3  ;;  %3166 = vmatprep.subr.bf16.mxu0 %v7809_v4 }
 0x7bd   :  { %3126 = vmatpush1.bf16.msra.mxu1 %v7804_v5  ;;  %3167 = vmatpush1.bf16.msra.mxu0 %v7807_v6 }
 0x7be   :  { %3127 = vmatprep.subr.bf16.mxu1 %v7812_v7  ;;  %3168 = vmatprep.subr.bf16.mxu0 %v7815_v8 }
 0x7c1   :  { %3128 = vmatpush1.bf16.msra.mxu1 %v7810_v9  ;;  %3169 = vmatpush1.bf16.msra.mxu0 %v7813_v10 }
 0x7c2   :  { %3129 = vmatprep.subr.bf16.mxu1 %v7818_v11  ;;  %3170 = vmatprep.subr.bf16.mxu0 %v7821_v12 }
 0x7c5   :  { %3130 = vmatpush1.bf16.msra.mxu1 %v7816_v13  ;;  %3171 = vmatpush1.bf16.msra.mxu0 %v7819_v14 }
 0x7c6   :  { %3131 = vmatprep.subr.bf16.mxu1 %v7824_v16  ;;  %3172 = vmatprep.subr.bf16.mxu0 %v7827_v18 }
 0x7c9   :  { %3132 = vmatpush1.bf16.msra.mxu1 %v7822_v15  ;;  %3173 = vmatpush1.bf16.msra.mxu0 %v7825_v17 }
 0x7ca   :  { %3133 = vmatprep.subr.bf16.mxu1 %v7830_v19  ;;  %3174 = vmatprep.subr.bf16.mxu0 %v7833_v20  ;;  %v3543_v20 = vld [vmem:[#allocation3 + $0x4] sm:$0x3] }
 0x7cd   :  { %3134 = vmatpush1.bf16.msra.mxu1 %v7828_v21  ;;  %3175 = vmatpush1.bf16.msra.mxu0 %v7831_v22  ;;  %v3544_v21 = vpack.c.bf16 %v3543_v20, %v3543_v20 }
 0x7ce   :  { %3135 = vmatprep.subr.bf16.mxu1 %v7836_v23  ;;  %3176 = vmatprep.subr.bf16.mxu0 %v7839_v24 }
 0x7d1   :  { %3136 = vmatpush1.bf16.msra.mxu1 %v7834_v25  ;;  %3177 = vmatpush1.bf16.msra.mxu0 %v7837_v26  ;;  %v7842_v25 = vld [vmem:[#allocation15 + $0x100] sm:$0xff]  }
 0x7d2   :  { %7190 = vmatprep.subr.bf16.mxu1 %v7840_v27  ;;  %7212 = vmatprep.subr.bf16.mxu0 %v7841_v28  ;;  %v7844_v27 = vld [vmem:[#allocation15 + $0x148] sm:$0xff]  }
 0x7d3   :  { %v7845_v28 = vld [vmem:[#allocation15 + $0x1c8] sm:$0xff]  }
 0x827   :  { %v7162_v29 = vpop.f32.mrb[20].mxu1  ;;  %v7184_v1 = vpop.f32.mrb[16].mxu0 }
 0x828   :  { %v7163_v35 = vpop.f32.mrb[21].mxu1  ;;  %v7185_v36 = vpop.f32.mrb[17].mxu0 }
 0x829   :  { %v7164_v37 = vadd.f32 %v7163_v35, %v7162_v29  ;;  %v7186_v38 = vadd.f32 %v7185_v36, %v7184_v1  ;;  %v7165_v40 = vpop.f32.mrb[22].mxu1  ;;  %v7187_v41 = vpop.f32.mrb[18].mxu0  ;;  %v7846_v29 = vld [vmem:[#allocation15 + $0x108] sm:$0xff]   ;;  %v7849_v35 = vld [vmem:[#allocation15 + $0x1d0] sm:$0xff]  }
 0x82a   :  { %v7166_v42 = vpop.f32.mrb[23].mxu1  ;;  %v7188_v43 = vpop.f32.mrb[19].mxu0  ;;  %v7847_v1 = vld [vmem:[#allocation15 + $0x188] sm:$0xff]   ;;  %v7850_v36 = vld [vmem:[#allocation15 + $0x110] sm:$0xff]   ;;  %v7853_v40 = vld [vmem:[#allocation15 + $0x1d8] sm:$0xff]  }
 0x82b   :  { %v2080_v44 = vadd.f32 %v7164_v37, %v6565_v33  ;;  %v7848_v33 = vld [vmem:[#allocation15 + $0x150] sm:$0xff]   ;;  %v7854_v41 = vld [vmem:[#allocation15 + $0x118] sm:$0xff]   ;;  %v7856_v43 = vld [vmem:[#allocation15 + $0x160] sm:$0xff]  }
 0x82c   :  { %v7851_v37 = vld [vmem:[#allocation15 + $0x190] sm:$0xff]   ;;  %v7855_v42 = vld [vmem:[#allocation15 + $0x198] sm:$0xff]  }
 0x82d   :  { %v2120_v45 = vadd.f32 %v7186_v38, %v2080_v44  ;;  %v7852_v38 = vld [vmem:[#allocation15 + $0x158] sm:$0xff]   ;;  %v7857_v44 = vld [vmem:[#allocation15 + $0x1e0] sm:$0xff]  }
 0x82f   :  { %2125 = vst [vmem:[#allocation17] sm:$0x3] %v2120_v45  ;;  %v7858_v45 = vld [vmem:[#allocation15 + $0x120] sm:$0xff]  }
 0x867   :  { %v2597_v49 = vpop.f32.mrb[24].mxu1  ;;  %v2638_v50 = vpop.f32.mrb[20].mxu0 }
 0x868   :  { %v2598_v52 = vadd.f32 %v2597_v49, %v2201_v47  ;;  %v2599_v53 = vpop.f32.mrb[25].mxu1  ;;  %v2640_v54 = vpop.f32.mrb[21].mxu0  ;;  %v2639_v3 = vadd.f32 %v2638_v50, %v2209_v30  ;;  %v7860_v47 = vld [vmem:[#allocation15 + $0x168] sm:$0xff]  }
 0x869   :  { %v2600_v55 = vadd.f32 %v2599_v53, %v2205_v48  ;;  %v2601_v56 = vpop.f32.mrb[26].mxu1  ;;  %v2642_v57 = vpop.f32.mrb[22].mxu0  ;;  %v2641_v63 = vadd.f32 %v2640_v54, %v2213_v62  ;;  %v7861_v48 = vld [vmem:[#allocation15 + $0x1e8] sm:$0xff]   ;;  %v7865_v53 = vld [vmem:[#allocation15 + $0x1f0] sm:$0xff]  }
 0x86a   :  { %v6663_v58 = vmul.f32 -1.442695, %v2598_v52  ;;  %v2602_v59 = vpop.f32.mrb[27].mxu1  ;;  %v2643_v60 = vpop.f32.mrb[23].mxu0  ;;  %v7862_v49 = vld [vmem:[#allocation15 + $0x128] sm:$0xff]   ;;  %v7864_v52 = vld [vmem:[#allocation15 + $0x170] sm:$0xff]  }
 0x86b   :  { %v6664_v61 = vmul.f32 -1.442695, %v2600_v55  ;;  %v6665_v0 = vmul.f32 -1.442695, %v2641_v63  ;;  %v7863_v50 = vld [vmem:[#allocation15 + $0x1a8] sm:$0xff]   ;;  %v7866_v54 = vld [vmem:[#allocation15 + $0x130] sm:$0xff]  }
 0x86c   :  { %8340 = vpow2.f32 %v6663_v58  ;;  %v7867_v55 = vld [vmem:[#allocation15 + $0x1b0] sm:$0xff]   ;;  %v7868_v56 = vld [vmem:[#allocation15 + $0x178] sm:$0xff]   ;;  %v6666_v62 = vld [vmem:[%s9015_s11 + $0x4] sm:$0xf] }
 0x86d   :  { %8342 = vpow2.f32 %v6664_v61  ;;  %v7869_v57 = vld [vmem:[#allocation15 + $0x1f8] sm:$0xff]   ;;  %v7874_v60 = vld [vmem:[#allocation12 + $0x4] ss:$16 sps:$4 sm:$0xff]   ;;  %v2743_v63 = vrot.slane %v6666_v62, %v8869_v31  ;;  %v2751_v30 = vrot.slane %v6666_v62, %v8884_v51 }
 0x86e   :  { %8344 = vpow2.f32 %v6665_v0  ;;  %v7870_v58 = vld [vmem:[#allocation15 + $0x138] sm:$0xff]   ;;  %v2747_v0 = vrot.slane %v6666_v62, %v8875_v34 }
 0x86f   :  { %8346 = vtanh.f32 %v2639_v3  ;;  %v7871_v59 = vld [vmem:[#allocation15 + $0x1b8] sm:$0xff]   ;;  %v2755_v3 = vrot.slane %v6666_v62, %v8880_v39  ;;  %v7922_v62 = vld [vmem:[#allocation12 + $0x104] ss:$16 sps:$4 sm:$0xff]  }
 0x870   :  { %v7877_v61 = vld [vmem:[#allocation12 + $0xc] ss:$16 sps:$4 sm:$0xff]  }
 0x876   :  { %v8341_v4 = vpop.eup %8340 }
 0x877   :  { %v8343_v5 = vpop.eup %8342  ;;  %v2648_v6 = vadd.f32 1.0, %v8341_v4 }
 0x878   :  { %v2654_v7 = vadd.f32 1.0, %v8343_v5  ;;  %v8345_v8 = vpop.eup %8344 }
 0x879   :  { %8348 = vrcp.f32 %v2648_v6  ;;  %v8347_v9 = vpop.eup %8346  ;;  %v2661_v13 = vadd.f32 1.0, %v8345_v8 }
 0x87a   :  { %8350 = vrcp.f32 %v2654_v7 }
 0x87b   :  { %8352 = vrcp.f32 %v2661_v13 }
 0x883   :  { %v8349_v10 = vpop.eup %8348 }
 0x884   :  { %v8351_v11 = vpop.eup %8350  ;;  %v2665_v12 = vmul.f32 %v8349_v10, %v8347_v9 }
 0x885   :  { %v2664_v14 = vmul.f32 %v8351_v11, %v8887_v2  ;;  %v8353_v16 = vpop.eup %8352  ;;  %v7843_v2 = vld [vmem:[#allocation15 + $0x180] sm:$0xff]  }
 0x887   :  { %v8917_v15 = vadd.f32 %v2665_v12, %v2664_v14 }
 0x889   :  { %8354 = vtanh.f32 %v8917_v15 }
 0x893   :  { %v8355_v17 = vpop.eup %8354 }
 0x894   :  { %v2668_v18 = vmul.f32 %v8355_v17, %v8353_v16 }
 0x896   :  { %v2669_v19 = vpack.c.bf16 %v2668_v18, %v2668_v18 }
 0x898   :  { %2670 = vst [vmem:[#allocation2 + $0x1] sm:$0x1] %v2669_v19 }
 0x89f   :  { %v6667_v22 = vld.sshfl [vmem:[#allocation2] sm:$0x11 pattern:$0x75316420] }
 0x8a0   :  { %v2768_v23 = vcombine.high %v6667_v22, %v6667_v22  ;;  %3545 = vst [vmem:[#allocation2] sm:$0x1] %v3544_v21  ;;  %3546 = vst [vmem:[#allocation2 + $0x1] sm:$0x1] %v2669_v19  ;;  %v2775_v26 = vrot.slane %v6667_v22, %v8859_v32 }
 0x8a2   :  { %v2782_v24 = vrot.slane %v2768_v23, %v8859_v32 }
 0x8a4   :  { %3137 = vmatprep.mubr.bf16.mxu1 %v2782_v24  ;;  %3178 = vmatprep.mubr.bf16.mxu0 %v2782_v24 }
 0x8a5   :  { %3138 = vmatmul.mubr.bf16.vlgmr.msra.gmra.mrb[28].mxu1 %v2775_v26  ;;  %3179 = vmatmul.mubr.bf16.vlgmr.msra.gmra.mrb[24].mxu0 %v2775_v26 }
 0x8a6   :  { %7191 = vmatpush3.bf16.msra.mxu1 %v7842_v25  ;;  %7213 = vmatpush3.bf16.msra.mxu0 %v7843_v2  ;;  %v7872_v25 = vld [vmem:[#allocation12] ss:$16 sps:$4 sm:$0xff]   ;;  %v7875_v2 = vld [vmem:[#allocation12 + $0x8] ss:$16 sps:$4 sm:$0xff]  }
 0x8a7   :  { %7192 = vmatprep.subr.bf16.mxu1 %v7844_v27  ;;  %7214 = vmatprep.subr.bf16.mxu0 %v7845_v28  ;;  %v8929_v14 = vld.sshfl [vmem:[#allocation2] sm:$0x11 pattern:$0x75316420]  ;;  %v7880_v28 = vld [vmem:[#allocation12 + $0x24] ss:$16 sps:$4 sm:$0xff]  }
 0x8a8   :  { %v3642_v22 = vcombine.high %v8929_v14, %v8929_v14 }
 0x8aa   :  { %7193 = vmatpush3.bf16.msra.mxu1 %v7846_v29  ;;  %7215 = vmatpush3.bf16.msra.mxu0 %v7847_v1  ;;  %v7883_v29 = vld [vmem:[#allocation12 + $0x2c] ss:$16 sps:$4 sm:$0xff]   ;;  %v3656_v1 = vrot.slane %v3642_v22, %v8859_v32 }
 0x8ab   :  { %7194 = vmatprep.subr.bf16.mxu1 %v7848_v33  ;;  %7216 = vmatprep.subr.bf16.mxu0 %v7849_v35  ;;  %v7878_v33 = vld [vmem:[#allocation12 + $0x20] ss:$16 sps:$4 sm:$0xff]   ;;  %v7881_v35 = vld [vmem:[#allocation12 + $0x28] ss:$16 sps:$4 sm:$0xff]   ;;  %v7955_v22 = vld [vmem:[#allocation12 + $0x1ac] ss:$16 sps:$4 sm:$0xff]  }
 0x8ae   :  { %7195 = vmatpush3.bf16.msra.mxu1 %v7850_v36  ;;  %7217 = vmatpush3.bf16.msra.mxu0 %v7851_v37  ;;  %v7886_v36 = vld [vmem:[#allocation12 + $0x44] ss:$16 sps:$4 sm:$0xff]   ;;  %v7889_v37 = vld [vmem:[#allocation12 + $0x4c] ss:$16 sps:$4 sm:$0xff]  }
 0x8af   :  { %7196 = vmatprep.subr.bf16.mxu1 %v7852_v38  ;;  %7218 = vmatprep.subr.bf16.mxu0 %v7853_v40  ;;  %v7884_v38 = vld [vmem:[#allocation12 + $0x40] ss:$16 sps:$4 sm:$0xff]   ;;  %v7887_v40 = vld [vmem:[#allocation12 + $0x48] ss:$16 sps:$4 sm:$0xff]  }
 0x8b2   :  { %7197 = vmatpush3.bf16.msra.mxu1 %v7854_v41  ;;  %7219 = vmatpush3.bf16.msra.mxu0 %v7855_v42  ;;  %v7892_v41 = vld [vmem:[#allocation12 + $0x64] ss:$16 sps:$4 sm:$0xff]   ;;  %v7895_v42 = vld [vmem:[#allocation12 + $0x6c] ss:$16 sps:$4 sm:$0xff]  }
 0x8b3   :  { %7198 = vmatprep.subr.bf16.mxu1 %v7856_v43  ;;  %7220 = vmatprep.subr.bf16.mxu0 %v7857_v44  ;;  %v7890_v43 = vld [vmem:[#allocation12 + $0x60] ss:$16 sps:$4 sm:$0xff]   ;;  %v7893_v44 = vld [vmem:[#allocation12 + $0x68] ss:$16 sps:$4 sm:$0xff]  }
 0x8b6   :  { %7199 = vmatpush3.bf16.msra.mxu1 %v7858_v45  ;;  %7221 = vmatpush3.bf16.msra.mxu0 %v7859_v46  ;;  %v7898_v45 = vld [vmem:[#allocation12 + $0x84] ss:$16 sps:$4 sm:$0xff]   ;;  %v7901_v46 = vld [vmem:[#allocation12 + $0x8c] ss:$16 sps:$4 sm:$0xff]  }
 0x8b7   :  { %7200 = vmatprep.subr.bf16.mxu1 %v7860_v47  ;;  %7222 = vmatprep.subr.bf16.mxu0 %v7861_v48  ;;  %v7896_v47 = vld [vmem:[#allocation12 + $0x80] ss:$16 sps:$4 sm:$0xff]   ;;  %v7899_v48 = vld [vmem:[#allocation12 + $0x88] ss:$16 sps:$4 sm:$0xff]  }
 0x8ba   :  { %7201 = vmatpush3.bf16.msra.mxu1 %v7862_v49  ;;  %7223 = vmatpush3.bf16.msra.mxu0 %v7863_v50  ;;  %v7904_v49 = vld [vmem:[#allocation12 + $0xa4] ss:$16 sps:$4 sm:$0xff]   ;;  %v7907_v50 = vld [vmem:[#allocation12 + $0xac] ss:$16 sps:$4 sm:$0xff]  }
 0x8bb   :  { %7202 = vmatprep.subr.bf16.mxu1 %v7864_v52  ;;  %7224 = vmatprep.subr.bf16.mxu0 %v7865_v53  ;;  %v7902_v52 = vld [vmem:[#allocation12 + $0xa0] ss:$16 sps:$4 sm:$0xff]   ;;  %v7905_v53 = vld [vmem:[#allocation12 + $0xa8] ss:$16 sps:$4 sm:$0xff]  }
 0x8be   :  { %7203 = vmatpush3.bf16.msra.mxu1 %v7866_v54  ;;  %7225 = vmatpush3.bf16.msra.mxu0 %v7867_v55  ;;  %v7910_v54 = vld [vmem:[#allocation12 + $0xc4] ss:$16 sps:$4 sm:$0xff]   ;;  %v7913_v55 = vld [vmem:[#allocation12 + $0xcc] ss:$16 sps:$4 sm:$0xff]  }
 0x8bf   :  { %7204 = vmatprep.subr.bf16.mxu1 %v7868_v56  ;;  %7226 = vmatprep.subr.bf16.mxu0 %v7869_v57  ;;  %v7908_v56 = vld [vmem:[#allocation12 + $0xc0] ss:$16 sps:$4 sm:$0xff]   ;;  %v7911_v57 = vld [vmem:[#allocation12 + $0xc8] ss:$16 sps:$4 sm:$0xff]  }
 0x8c2   :  { %7205 = vmatpush3.bf16.msra.mxu1 %v7870_v58  ;;  %7227 = vmatpush3.bf16.msra.mxu0 %v7871_v59  ;;  %v7916_v58 = vld [vmem:[#allocation12 + $0xe4] ss:$16 sps:$4 sm:$0xff]   ;;  %v7919_v59 = vld [vmem:[#allocation12 + $0xec] ss:$16 sps:$4 sm:$0xff]  }
 0x8c3   :  { %3979 = vmatprep.subr.bf16.mxu1 %v7874_v60  ;;  %4020 = vmatprep.subr.bf16.mxu0 %v7877_v61  ;;  %v7914_v60 = vld [vmem:[#allocation12 + $0xe0] ss:$16 sps:$4 sm:$0xff]   ;;  %v7917_v61 = vld [vmem:[#allocation12 + $0xe8] ss:$16 sps:$4 sm:$0xff]  }
 0x978   :  { %v3139_v4 = vpop.f32.mrb[28].mxu1  ;;  %v3180_v5 = vpop.f32.mrb[24].mxu0 }
 0x979   :  { %v3140_v6 = vadd.f32 %v3139_v4, %v2743_v63  ;;  %v3181_v7 = vadd.f32 %v3180_v5, %v2751_v30  ;;  %v3141_v8 = vpop.f32.mrb[29].mxu1  ;;  %v3182_v9 = vpop.f32.mrb[25].mxu0  ;;  %v7925_v63 = vld [vmem:[#allocation12 + $0x10c] ss:$16 sps:$4 sm:$0xff]   ;;  %v7920_v30 = vld [vmem:[#allocation12 + $0x100] ss:$16 sps:$4 sm:$0xff]  }
 0x97a   :  { %v3142_v10 = vadd.f32 %v3141_v8, %v2747_v0  ;;  %v3183_v11 = vadd.f32 %v3182_v9, %v2755_v3  ;;  %v3143_v12 = vpop.f32.mrb[30].mxu1  ;;  %v3184_v13 = vpop.f32.mrb[26].mxu0  ;;  %v7923_v0 = vld [vmem:[#allocation12 + $0x108] ss:$16 sps:$4 sm:$0xff]   ;;  %v7928_v3 = vld [vmem:[#allocation12 + $0x124] ss:$16 sps:$4 sm:$0xff]  }
 0x97b   :  { %v3187_v16 = vmax.f32 %v3140_v6, 0.0  ;;  %v3189_v17 = vmax.f32 %v3181_v7, 0.0  ;;  %v3144_v18 = vpop.f32.mrb[31].mxu1  ;;  %v3185_v19 = vpop.f32.mrb[27].mxu0  ;;  %v7931_v4 = vld [vmem:[#allocation12 + $0x12c] ss:$16 sps:$4 sm:$0xff]  }
 0x97c   :  { %v3188_v20 = vmax.f32 %v3142_v10, 0.0  ;;  %v3190_v21 = vmax.f32 %v3183_v11, 0.0  ;;  %v7926_v5 = vld [vmem:[#allocation12 + $0x120] ss:$16 sps:$4 sm:$0xff]   ;;  %v7929_v6 = vld [vmem:[#allocation12 + $0x128] ss:$16 sps:$4 sm:$0xff]  }
 0x97d   :  { %v3191_v26 = vpack.c.bf16 %v3187_v16, %v3187_v16  ;;  %v3193_v27 = vpack.c.bf16 %v3189_v17, %v3189_v17  ;;  %v7934_v7 = vld [vmem:[#allocation12 + $0x144] ss:$16 sps:$4 sm:$0xff]   ;;  %v7937_v8 = vld [vmem:[#allocation12 + $0x14c] ss:$16 sps:$4 sm:$0xff]   ;;  %v7932_v9 = vld [vmem:[#allocation12 + $0x140] ss:$16 sps:$4 sm:$0xff]  }
 0x97e   :  { %v3192_v23 = vpack.c.bf16 %v3188_v20, %v3188_v20  ;;  %v3194_v24 = vpack.c.bf16 %v3190_v21, %v3190_v21  ;;  %v7935_v10 = vld [vmem:[#allocation12 + $0x148] ss:$16 sps:$4 sm:$0xff]   ;;  %v7940_v11 = vld [vmem:[#allocation12 + $0x164] ss:$16 sps:$4 sm:$0xff]   ;;  %v7943_v12 = vld [vmem:[#allocation12 + $0x16c] ss:$16 sps:$4 sm:$0xff]  }
 0x97f   :  { %v7938_v13 = vld [vmem:[#allocation12 + $0x160] ss:$16 sps:$4 sm:$0xff]   ;;  %v7941_v16 = vld [vmem:[#allocation12 + $0x168] ss:$16 sps:$4 sm:$0xff]   ;;  %v7946_v17 = vld [vmem:[#allocation12 + $0x184] ss:$16 sps:$4 sm:$0xff]  }
 0x980   :  { %3492 = vmatprep.mubr.bf16.mxu1 %v3192_v23  ;;  %3532 = vmatprep.mubr.bf16.mxu0 %v3194_v24  ;;  %v7949_v18 = vld [vmem:[#allocation12 + $0x18c] ss:$16 sps:$4 sm:$0xff]   ;;  %v7944_v19 = vld [vmem:[#allocation12 + $0x180] ss:$16 sps:$4 sm:$0xff]   ;;  %v7947_v20 = vld [vmem:[#allocation12 + $0x188] ss:$16 sps:$4 sm:$0xff]  }
 0x981   :  { %3493 = vmatmul.mubr.bf16.vlgmr.msra.gmra.mrb[32].mxu1 %v3191_v26  ;;  %3533 = vmatmul.mubr.bf16.vlgmr.msra.gmra.mrb[28].mxu0 %v3193_v27  ;;  %v7952_v21 = vld [vmem:[#allocation12 + $0x1a4] ss:$16 sps:$4 sm:$0xff]   ;;  %v7950_v23 = vld [vmem:[#allocation12 + $0x1a0] ss:$16 sps:$4 sm:$0xff]   ;;  %v7953_v24 = vld [vmem:[#allocation12 + $0x1a8] ss:$16 sps:$4 sm:$0xff]  }
 0x982   :  { %3980 = vmatpush1.bf16.msra.mxu1 %v7872_v25  ;;  %4021 = vmatpush1.bf16.msra.mxu0 %v7875_v2  ;;  %v7958_v25 = vld [vmem:[#allocation12 + $0x1c4] ss:$16 sps:$4 sm:$0xff]   ;;  %v7961_v2 = vld [vmem:[#allocation12 + $0x1cc] ss:$16 sps:$4 sm:$0xff]   ;;  %v7956_v26 = vld [vmem:[#allocation12 + $0x1c0] ss:$16 sps:$4 sm:$0xff]  }
 0x983   :  { %4011 = vmatprep.mubr.bf16.mxu1 %v3656_v1  ;;  %4052 = vmatprep.mubr.bf16.mxu0 %v3656_v1  ;;  %v7959_v27 = vld [vmem:[#allocation12 + $0x1c8] ss:$16 sps:$4 sm:$0xff]   ;;  %v7962_v1 = vld [vmem:[#allocation12 + $0x1e0] ss:$16 sps:$4 sm:$0xff]  }
 0x984   :  { %3981 = vmatprep.subr.bf16.mxu1 %v7880_v28  ;;  %4022 = vmatprep.subr.bf16.mxu0 %v7883_v29  ;;  %v7964_v28 = vld [vmem:[#allocation12 + $0x1e4] ss:$16 sps:$4 sm:$0xff]   ;;  %v7967_v29 = vld [vmem:[#allocation12 + $0x1ec] ss:$16 sps:$4 sm:$0xff]  }
 0x986   :  { %3982 = vmatpush1.bf16.msra.mxu1 %v7878_v33  ;;  %4023 = vmatpush1.bf16.msra.mxu0 %v7881_v35  ;;  %v7965_v33 = vld [vmem:[#allocation12 + $0x1e8] ss:$16 sps:$4 sm:$0xff]   ;;  %v3649_v35 = vrot.slane %v8929_v14, %v8859_v32  ;;  %v7985_v14 = vld [vmem:[#allocation14 + $0x44c] ss:$16 sps:$4 sm:$0xff]  }
 0x987   :  { %3983 = vmatprep.subr.bf16.mxu1 %v7886_v36  ;;  %4024 = vmatprep.subr.bf16.mxu0 %v7889_v37  ;;  %v7968_v36 = vld [vmem:[#allocation14 + $0x400] ss:$16 sps:$4 sm:$0xff]   ;;  %v7970_v37 = vld [vmem:[#allocation14 + $0x404] ss:$16 sps:$4 sm:$0xff]  }
 0x98a   :  { %3984 = vmatpush1.bf16.msra.mxu1 %v7884_v38  ;;  %4025 = vmatpush1.bf16.msra.mxu0 %v7887_v40  ;;  %v7971_v38 = vld [vmem:[#allocation14 + $0x408] ss:$16 sps:$4 sm:$0xff]   ;;  %v7973_v40 = vld [vmem:[#allocation14 + $0x40c] ss:$16 sps:$4 sm:$0xff]  }
 0x98b   :  { %3985 = vmatprep.subr.bf16.mxu1 %v7892_v41  ;;  %4026 = vmatprep.subr.bf16.mxu0 %v7895_v42  ;;  %v7976_v41 = vld [vmem:[#allocation14 + $0x424] ss:$16 sps:$4 sm:$0xff]   ;;  %v7979_v42 = vld [vmem:[#allocation14 + $0x42c] ss:$16 sps:$4 sm:$0xff]  }
 0x98e   :  { %3986 = vmatpush1.bf16.msra.mxu1 %v7890_v43  ;;  %4027 = vmatpush1.bf16.msra.mxu0 %v7893_v44  ;;  %v7974_v43 = vld [vmem:[#allocation14 + $0x420] ss:$16 sps:$4 sm:$0xff]   ;;  %v7977_v44 = vld [vmem:[#allocation14 + $0x428] ss:$16 sps:$4 sm:$0xff]  }
 0x98f   :  { %3987 = vmatprep.subr.bf16.mxu1 %v7898_v45  ;;  %4028 = vmatprep.subr.bf16.mxu0 %v7901_v46  ;;  %v7982_v45 = vld [vmem:[#allocation14 + $0x444] ss:$16 sps:$4 sm:$0xff]   ;;  %v7980_v46 = vld [vmem:[#allocation14 + $0x440] ss:$16 sps:$4 sm:$0xff]  }
 0x992   :  { %3988 = vmatpush1.bf16.msra.mxu1 %v7896_v47  ;;  %4029 = vmatpush1.bf16.msra.mxu0 %v7899_v48  ;;  %v7983_v47 = vld [vmem:[#allocation14 + $0x448] ss:$16 sps:$4 sm:$0xff]   ;;  %v7988_v48 = vld [vmem:[#allocation14 + $0x464] ss:$16 sps:$4 sm:$0xff]  }
 0x993   :  { %3989 = vmatprep.subr.bf16.mxu1 %v7904_v49  ;;  %4030 = vmatprep.subr.bf16.mxu0 %v7907_v50  ;;  %v7991_v49 = vld [vmem:[#allocation14 + $0x46c] ss:$16 sps:$4 sm:$0xff]   ;;  %v7986_v50 = vld [vmem:[#allocation14 + $0x460] ss:$16 sps:$4 sm:$0xff]  }
 0x996   :  { %3990 = vmatpush1.bf16.msra.mxu1 %v7902_v52  ;;  %4031 = vmatpush1.bf16.msra.mxu0 %v7905_v53  ;;  %v7989_v52 = vld [vmem:[#allocation14 + $0x468] ss:$16 sps:$4 sm:$0xff]   ;;  %v7994_v53 = vld [vmem:[#allocation14 + $0x484] ss:$16 sps:$4 sm:$0xff]  }
 0x997   :  { %3991 = vmatprep.subr.bf16.mxu1 %v7910_v54  ;;  %4032 = vmatprep.subr.bf16.mxu0 %v7913_v55  ;;  %v7997_v54 = vld [vmem:[#allocation14 + $0x48c] ss:$16 sps:$4 sm:$0xff]   ;;  %v7992_v55 = vld [vmem:[#allocation14 + $0x480] ss:$16 sps:$4 sm:$0xff]  }
 0x99a   :  { %3992 = vmatpush1.bf16.msra.mxu1 %v7908_v56  ;;  %4033 = vmatpush1.bf16.msra.mxu0 %v7911_v57  ;;  %v7995_v56 = vld [vmem:[#allocation14 + $0x488] ss:$16 sps:$4 sm:$0xff]   ;;  %v8000_v57 = vld [vmem:[#allocation14 + $0x4a4] ss:$16 sps:$4 sm:$0xff]  }
 0x99b   :  { %3993 = vmatprep.subr.bf16.mxu1 %v7916_v58  ;;  %4034 = vmatprep.subr.bf16.mxu0 %v7919_v59  ;;  %v8003_v58 = vld [vmem:[#allocation14 + $0x4ac] ss:$16 sps:$4 sm:$0xff]   ;;  %v7998_v59 = vld [vmem:[#allocation14 + $0x4a0] ss:$16 sps:$4 sm:$0xff]  }
 0x99e   :  { %3994 = vmatpush1.bf16.msra.mxu1 %v7914_v60  ;;  %4035 = vmatpush1.bf16.msra.mxu0 %v7917_v61  ;;  %v8001_v60 = vld [vmem:[#allocation14 + $0x4a8] ss:$16 sps:$4 sm:$0xff]   ;;  %v8006_v61 = vld [vmem:[#allocation14 + $0x4c4] ss:$16 sps:$4 sm:$0xff]  }
 0x99f   :  { %3995 = vmatprep.subr.bf16.mxu1 %v7922_v62  ;;  %4036 = vmatprep.subr.bf16.mxu0 %v7925_v63  ;;  %v8009_v62 = vld [vmem:[#allocation14 + $0x4cc] ss:$16 sps:$4 sm:$0xff]   ;;  %v8004_v63 = vld [vmem:[#allocation14 + $0x4c0] ss:$16 sps:$4 sm:$0xff]  }
 0x9a2   :  { %3996 = vmatpush1.bf16.msra.mxu1 %v7920_v30  ;;  %4037 = vmatpush1.bf16.msra.mxu0 %v7923_v0  ;;  %v8007_v30 = vld [vmem:[#allocation14 + $0x4c8] ss:$16 sps:$4 sm:$0xff]   ;;  %v8012_v0 = vld [vmem:[#allocation14 + $0x4e4] ss:$16 sps:$4 sm:$0xff]  }
 0x9a3   :  { %3997 = vmatprep.subr.bf16.mxu1 %v7928_v3  ;;  %4038 = vmatprep.subr.bf16.mxu0 %v7931_v4  ;;  %v8015_v3 = vld [vmem:[#allocation14 + $0x4ec] ss:$16 sps:$4 sm:$0xff]   ;;  %v8010_v4 = vld [vmem:[#allocation14 + $0x4e0] ss:$16 sps:$4 sm:$0xff]  }
 0x9a6   :  { %3998 = vmatpush1.bf16.msra.mxu1 %v7926_v5  ;;  %4039 = vmatpush1.bf16.msra.mxu0 %v7929_v6  ;;  %v8013_v5 = vld [vmem:[#allocation14 + $0x4e8] ss:$16 sps:$4 sm:$0xff]   ;;  %v8018_v6 = vld [vmem:[#allocation14 + $0x504] ss:$16 sps:$4 sm:$0xff]  }
 0x9a7   :  { %3999 = vmatprep.subr.bf16.mxu1 %v7934_v7  ;;  %4040 = vmatprep.subr.bf16.mxu0 %v7937_v8  ;;  %v8021_v7 = vld [vmem:[#allocation14 + $0x50c] ss:$16 sps:$4 sm:$0xff]   ;;  %v8016_v8 = vld [vmem:[#allocation14 + $0x500] ss:$16 sps:$4 sm:$0xff]  }
 0x9aa   :  { %4000 = vmatpush1.bf16.msra.mxu1 %v7932_v9  ;;  %4041 = vmatpush1.bf16.msra.mxu0 %v7935_v10  ;;  %v8019_v9 = vld [vmem:[#allocation14 + $0x508] ss:$16 sps:$4 sm:$0xff]   ;;  %v8024_v10 = vld [vmem:[#allocation14 + $0x524] ss:$16 sps:$4 sm:$0xff]  }
 0x9ab   :  { %4001 = vmatprep.subr.bf16.mxu1 %v7940_v11  ;;  %4042 = vmatprep.subr.bf16.mxu0 %v7943_v12  ;;  %v8027_v11 = vld [vmem:[#allocation14 + $0x52c] ss:$16 sps:$4 sm:$0xff]   ;;  %v8022_v12 = vld [vmem:[#allocation14 + $0x520] ss:$16 sps:$4 sm:$0xff]  }
 0x9ae   :  { %4002 = vmatpush1.bf16.msra.mxu1 %v7938_v13  ;;  %4043 = vmatpush1.bf16.msra.mxu0 %v7941_v16  ;;  %v8025_v13 = vld [vmem:[#allocation14 + $0x528] ss:$16 sps:$4 sm:$0xff]   ;;  %v8030_v16 = vld [vmem:[#allocation14 + $0x544] ss:$16 sps:$4 sm:$0xff]  }
 0x9af   :  { %4003 = vmatprep.subr.bf16.mxu1 %v7946_v17  ;;  %4044 = vmatprep.subr.bf16.mxu0 %v7949_v18  ;;  %v8033_v17 = vld [vmem:[#allocation14 + $0x54c] ss:$16 sps:$4 sm:$0xff]   ;;  %v8028_v18 = vld [vmem:[#allocation14 + $0x540] ss:$16 sps:$4 sm:$0xff]  }
 0x9b2   :  { %4004 = vmatpush1.bf16.msra.mxu1 %v7944_v19  ;;  %4045 = vmatpush1.bf16.msra.mxu0 %v7947_v20  ;;  %v8031_v19 = vld [vmem:[#allocation14 + $0x548] ss:$16 sps:$4 sm:$0xff]   ;;  %v8036_v20 = vld [vmem:[#allocation14 + $0x564] ss:$16 sps:$4 sm:$0xff]  }
 0x9b3   :  { %4005 = vmatprep.subr.bf16.mxu1 %v7952_v21  ;;  %4046 = vmatprep.subr.bf16.mxu0 %v7955_v22  ;;  %v8039_v21 = vld [vmem:[#allocation14 + $0x56c] ss:$16 sps:$4 sm:$0xff]   ;;  %v8034_v22 = vld [vmem:[#allocation14 + $0x560] ss:$16 sps:$4 sm:$0xff]  }
 0x9b6   :  { %4006 = vmatpush1.bf16.msra.mxu1 %v7950_v23  ;;  %4047 = vmatpush1.bf16.msra.mxu0 %v7953_v24  ;;  %v8037_v23 = vld [vmem:[#allocation14 + $0x568] ss:$16 sps:$4 sm:$0xff]   ;;  %v8042_v24 = vld [vmem:[#allocation14 + $0x584] ss:$16 sps:$4 sm:$0xff]  }
 0x9b7   :  { %4007 = vmatprep.subr.bf16.mxu1 %v7958_v25  ;;  %4048 = vmatprep.subr.bf16.mxu0 %v7961_v2  ;;  %v8045_v25 = vld [vmem:[#allocation14 + $0x58c] ss:$16 sps:$4 sm:$0xff]   ;;  %v8040_v2 = vld [vmem:[#allocation14 + $0x580] ss:$16 sps:$4 sm:$0xff]  }
 0x9ba   :  { %4008 = vmatpush1.bf16.msra.mxu1 %v7956_v26  ;;  %4049 = vmatpush1.bf16.msra.mxu0 %v7959_v27  ;;  %v8043_v26 = vld [vmem:[#allocation14 + $0x588] ss:$16 sps:$4 sm:$0xff]   ;;  %v8046_v27 = vld [vmem:[#allocation14 + $0x5a0] ss:$16 sps:$4 sm:$0xff]  }
 0x9bb   :  { %4009 = vmatprep.subr.bf16.mxu1 %v7964_v28  ;;  %4050 = vmatprep.subr.bf16.mxu0 %v7967_v29  ;;  %v8048_v28 = vld [vmem:[#allocation14 + $0x5a4] ss:$16 sps:$4 sm:$0xff]   ;;  %v8049_v29 = vld [vmem:[#allocation14 + $0x5a8] ss:$16 sps:$4 sm:$0xff]  }
 0x9be   :  { %4010 = vmatpush1.bf16.msra.mxu1 %v7962_v1  ;;  %4051 = vmatpush1.bf16.msra.mxu0 %v7965_v33  ;;  %v8051_v1 = vld [vmem:[#allocation14 + $0x5ac] ss:$16 sps:$4 sm:$0xff]   ;;  %v8054_v33 = vld [vmem:[#allocation14 + $0x5c4] ss:$16 sps:$4 sm:$0xff]  }
 0x9bf   :  { %4521 = vmatprep.subr.bf16.mxu1 %v7970_v37  ;;  %4562 = vmatprep.subr.bf16.mxu0 %v7973_v40  ;;  %v8055_v37 = vld [vmem:[#allocation14 + $0x5c8] ss:$16 sps:$4 sm:$0xff]   ;;  %v8063_v40 = vld [vmem:[#allocation14 + $0x5ec] ss:$16 sps:$4 sm:$0xff]  }
 0x9c1   :  { %4012 = vmatmul.mubr.bf16.vlgmr.msra.gmra.mrb[36].mxu1 %v3649_v35  ;;  %4053 = vmatmul.mubr.bf16.vlgmr.msra.gmra.mrb[32].mxu0 %v3649_v35  ;;  %v8057_v35 = vld [vmem:[#allocation14 + $0x5cc] ss:$16 sps:$4 sm:$0xff]  }
 0x9c2   :  { %4522 = vmatpush1.bf16.msra.mxu1 %v7968_v36  ;;  %4563 = vmatpush1.bf16.msra.mxu0 %v7971_v38  ;;  %v8052_v36 = vld [vmem:[#allocation14 + $0x5c0] ss:$16 sps:$4 sm:$0xff]   ;;  %v8060_v38 = vld [vmem:[#allocation14 + $0x5e4] ss:$16 sps:$4 sm:$0xff]  }
 0x9c3   :  { %4523 = vmatprep.subr.bf16.mxu1 %v7976_v41  ;;  %4564 = vmatprep.subr.bf16.mxu0 %v7979_v42  ;;  %v8058_v41 = vld [vmem:[#allocation14 + $0x5e0] ss:$16 sps:$4 sm:$0xff]   ;;  %v8061_v42 = vld [vmem:[#allocation14 + $0x5e8] ss:$16 sps:$4 sm:$0xff]  }
 0x9c6   :  { %4524 = vmatpush1.bf16.msra.mxu1 %v7974_v43  ;;  %4565 = vmatpush1.bf16.msra.mxu0 %v7977_v44  ;;  %v8064_v43 = vld [vmem:[#allocation15 + $0x240] sm:$0xff]  }
 0x9c7   :  { %4525 = vmatprep.subr.bf16.mxu1 %v7982_v45  ;;  %4566 = vmatprep.subr.bf16.mxu0 %v7985_v14  ;;  %v8065_v44 = vld [vmem:[#allocation15 + $0x2c0] sm:$0xff]  }
 0x9ca   :  { %4526 = vmatpush1.bf16.msra.mxu1 %v7980_v46  ;;  %4567 = vmatpush1.bf16.msra.mxu0 %v7983_v47  ;;  %v6733_v46 = vld [vmem:[%s9017_s13 + $0x1] ss:$0 sm:$0xff] }
 0x9cb   :  { %4527 = vmatprep.subr.bf16.mxu1 %v7988_v48  ;;  %4568 = vmatprep.subr.bf16.mxu0 %v7991_v49 }
 0x9ce   :  { %4528 = vmatpush1.bf16.msra.mxu1 %v7986_v50  ;;  %4569 = vmatpush1.bf16.msra.mxu0 %v7989_v52 }
 0x9cf   :  { %4529 = vmatprep.subr.bf16.mxu1 %v7994_v53  ;;  %4570 = vmatprep.subr.bf16.mxu0 %v7997_v54 }
 0x9d2   :  { %4530 = vmatpush1.bf16.msra.mxu1 %v7992_v55  ;;  %4571 = vmatpush1.bf16.msra.mxu0 %v7995_v56 }
 0x9d3   :  { %4531 = vmatprep.subr.bf16.mxu1 %v8000_v57  ;;  %4572 = vmatprep.subr.bf16.mxu0 %v8003_v58  ;;  %v3612_v58 = vld [vmem:[%s9013_s9] sm:$0xf] }
 0x9d6   :  { %4532 = vmatpush1.bf16.msra.mxu1 %v7998_v59  ;;  %4573 = vmatpush1.bf16.msra.mxu0 %v8001_v60  ;;  %v3617_v59 = vrot.slane %v3612_v58, %v8869_v31  ;;  %v3621_v60 = vrot.slane %v3612_v58, %v8875_v34 }
 0x9d7   :  { %4533 = vmatprep.subr.bf16.mxu1 %v8006_v61  ;;  %4574 = vmatprep.subr.bf16.mxu0 %v8009_v62 }
 0x9da   :  { %4534 = vmatpush1.bf16.msra.mxu1 %v8004_v63  ;;  %4575 = vmatpush1.bf16.msra.mxu0 %v8007_v30 }
 0x9db   :  { %4535 = vmatprep.subr.bf16.mxu1 %v8012_v0  ;;  %4576 = vmatprep.subr.bf16.mxu0 %v8015_v3 }
 0x9de   :  { %4536 = vmatpush1.bf16.msra.mxu1 %v8010_v4  ;;  %4577 = vmatpush1.bf16.msra.mxu0 %v8013_v5 }
 0x9df   :  { %4537 = vmatprep.subr.bf16.mxu1 %v8018_v6  ;;  %4578 = vmatprep.subr.bf16.mxu0 %v8021_v7 }
 0x9e2   :  { %4538 = vmatpush1.bf16.msra.mxu1 %v8016_v8  ;;  %4579 = vmatpush1.bf16.msra.mxu0 %v8019_v9 }
 0x9e3   :  { %4539 = vmatprep.subr.bf16.mxu1 %v8024_v10  ;;  %4580 = vmatprep.subr.bf16.mxu0 %v8027_v11  ;;  %v3629_v10 = vrot.slane %v3612_v58, %v8880_v39 }
 0x9e6   :  { %4540 = vmatpush1.bf16.msra.mxu1 %v8022_v12  ;;  %4581 = vmatpush1.bf16.msra.mxu0 %v8025_v13  ;;  %v3625_v12 = vrot.slane %v3612_v58, %v8884_v51  ;;  %v8083_v58 = vld [vmem:[#allocation15 + $0x2a0] sm:$0xff]  }
 0x9e7   :  { %4541 = vmatprep.subr.bf16.mxu1 %v8030_v16  ;;  %4582 = vmatprep.subr.bf16.mxu0 %v8033_v17 }
 0x9ea   :  { %4542 = vmatpush1.bf16.msra.mxu1 %v8028_v18  ;;  %4583 = vmatpush1.bf16.msra.mxu0 %v8031_v19 }
 0x9eb   :  { %4543 = vmatprep.subr.bf16.mxu1 %v8036_v20  ;;  %4584 = vmatprep.subr.bf16.mxu0 %v8039_v21 }
 0x9ee   :  { %4544 = vmatpush1.bf16.msra.mxu1 %v8034_v22  ;;  %4585 = vmatpush1.bf16.msra.mxu0 %v8037_v23 }
 0x9ef   :  { %4545 = vmatprep.subr.bf16.mxu1 %v8042_v24  ;;  %4586 = vmatprep.subr.bf16.mxu0 %v8045_v25 }
 0x9f2   :  { %4546 = vmatpush1.bf16.msra.mxu1 %v8040_v2  ;;  %4587 = vmatpush1.bf16.msra.mxu0 %v8043_v26 }
 0x9f3   :  { %4547 = vmatprep.subr.bf16.mxu1 %v8048_v28  ;;  %4588 = vmatprep.subr.bf16.mxu0 %v8051_v1 }
 0x9f6   :  { %4548 = vmatpush1.bf16.msra.mxu1 %v8046_v27  ;;  %4589 = vmatpush1.bf16.msra.mxu0 %v8049_v29 }
 0x9f7   :  { %4549 = vmatprep.subr.bf16.mxu1 %v8054_v33  ;;  %4590 = vmatprep.subr.bf16.mxu0 %v8057_v35  ;;  %v4959_v35 = vld [vmem:[#allocation3 + $0x6] sm:$0x3] }
 0x9fa   :  { %4550 = vmatpush1.bf16.msra.mxu1 %v8052_v36  ;;  %4591 = vmatpush1.bf16.msra.mxu0 %v8055_v37  ;;  %v4960_v36 = vpack.c.bf16 %v4959_v35, %v4959_v35 }
 0x9fb   :  { %4551 = vmatprep.subr.bf16.mxu1 %v8060_v38  ;;  %4592 = vmatprep.subr.bf16.mxu0 %v8063_v40 }
 0x9fe   :  { %4552 = vmatpush1.bf16.msra.mxu1 %v8058_v41  ;;  %4593 = vmatpush1.bf16.msra.mxu0 %v8061_v42  ;;  %v8066_v41 = vld [vmem:[#allocation15 + $0x200] sm:$0xff]  }
 0x9ff   :  { %7234 = vmatprep.subr.bf16.mxu1 %v8064_v43  ;;  %7256 = vmatprep.subr.bf16.mxu0 %v8065_v44  ;;  %v8068_v43 = vld [vmem:[#allocation15 + $0x248] sm:$0xff]  }
 0xa00   :  { %v8069_v44 = vld [vmem:[#allocation15 + $0x2c8] sm:$0xff]  }
 0xa54   :  { %v7206_v45 = vpop.f32.mrb[32].mxu1  ;;  %v7228_v14 = vpop.f32.mrb[28].mxu0 }
 0xa55   :  { %v7207_v47 = vpop.f32.mrb[33].mxu1  ;;  %v7229_v48 = vpop.f32.mrb[29].mxu0 }
 0xa56   :  { %v7208_v49 = vadd.f32 %v7207_v47, %v7206_v45  ;;  %v7230_v50 = vadd.f32 %v7229_v48, %v7228_v14  ;;  %v7209_v52 = vpop.f32.mrb[34].mxu1  ;;  %v7231_v53 = vpop.f32.mrb[30].mxu0  ;;  %v8070_v45 = vld [vmem:[#allocation15 + $0x208] sm:$0xff]   ;;  %v8073_v47 = vld [vmem:[#allocation15 + $0x2d0] sm:$0xff]  }
 0xa57   :  { %v7210_v54 = vpop.f32.mrb[35].mxu1  ;;  %v7232_v55 = vpop.f32.mrb[31].mxu0  ;;  %v8071_v14 = vld [vmem:[#allocation15 + $0x288] sm:$0xff]   ;;  %v8074_v48 = vld [vmem:[#allocation15 + $0x210] sm:$0xff]   ;;  %v8077_v52 = vld [vmem:[#allocation15 + $0x2d8] sm:$0xff]  }
 0xa58   :  { %v3495_v56 = vadd.f32 %v7208_v49, %v6733_v46  ;;  %v8072_v46 = vld [vmem:[#allocation15 + $0x250] sm:$0xff]   ;;  %v8078_v53 = vld [vmem:[#allocation15 + $0x218] sm:$0xff]   ;;  %v8080_v55 = vld [vmem:[#allocation15 + $0x260] sm:$0xff]  }
 0xa59   :  { %v8075_v49 = vld [vmem:[#allocation15 + $0x290] sm:$0xff]   ;;  %v8079_v54 = vld [vmem:[#allocation15 + $0x298] sm:$0xff]  }
 0xa5a   :  { %v3535_v57 = vadd.f32 %v7230_v50, %v3495_v56  ;;  %v8076_v50 = vld [vmem:[#allocation15 + $0x258] sm:$0xff]   ;;  %v8081_v56 = vld [vmem:[#allocation15 + $0x2e0] sm:$0xff]  }
 0xa5c   :  { %3541 = vst [vmem:[#allocation17 + $0x2] sm:$0x3] %v3535_v57  ;;  %v8082_v57 = vld [vmem:[#allocation15 + $0x220] sm:$0xff]  }
 0xa94   :  { %v4013_v61 = vpop.f32.mrb[36].mxu1  ;;  %v4054_v62 = vpop.f32.mrb[32].mxu0 }
 0xa95   :  { %v4014_v63 = vadd.f32 %v4013_v61, %v3617_v59  ;;  %v4015_v30 = vpop.f32.mrb[37].mxu1  ;;  %v4056_v0 = vpop.f32.mrb[33].mxu0  ;;  %v4055_v16 = vadd.f32 %v4054_v62, %v3625_v12  ;;  %v8084_v59 = vld [vmem:[#allocation15 + $0x268] sm:$0xff]  }
 0xa96   :  { %v4016_v3 = vadd.f32 %v4015_v30, %v3621_v60  ;;  %v4017_v4 = vpop.f32.mrb[38].mxu1  ;;  %v4058_v5 = vpop.f32.mrb[34].mxu0  ;;  %v4057_v11 = vadd.f32 %v4056_v0, %v3629_v10  ;;  %v8085_v60 = vld [vmem:[#allocation15 + $0x2e8] sm:$0xff]   ;;  %v8089_v30 = vld [vmem:[#allocation15 + $0x2f0] sm:$0xff]  }
 0xa97   :  { %v6831_v6 = vmul.f32 -1.442695, %v4014_v63  ;;  %v4018_v7 = vpop.f32.mrb[39].mxu1  ;;  %v4059_v8 = vpop.f32.mrb[35].mxu0  ;;  %v8086_v61 = vld [vmem:[#allocation15 + $0x228] sm:$0xff]   ;;  %v8088_v63 = vld [vmem:[#allocation15 + $0x270] sm:$0xff]  }
 0xa98   :  { %v6832_v9 = vmul.f32 -1.442695, %v4016_v3  ;;  %v6833_v13 = vmul.f32 -1.442695, %v4057_v11  ;;  %v8087_v62 = vld [vmem:[#allocation15 + $0x2a8] sm:$0xff]   ;;  %v8090_v0 = vld [vmem:[#allocation15 + $0x230] sm:$0xff]  }
 0xa99   :  { %8356 = vpow2.f32 %v6831_v6  ;;  %v8091_v3 = vld [vmem:[#allocation15 + $0x2b0] sm:$0xff]   ;;  %v8092_v4 = vld [vmem:[#allocation15 + $0x278] sm:$0xff]   ;;  %v6834_v10 = vld [vmem:[%s9015_s11 + $0x8] sm:$0xf] }
 0xa9a   :  { %8358 = vpow2.f32 %v6832_v9  ;;  %v8093_v5 = vld [vmem:[#allocation15 + $0x2f8] sm:$0xff]   ;;  %v8098_v8 = vld [vmem:[#allocation12 + $0x4] ss:$16 sps:$4 sm:$0xff]   ;;  %v4159_v11 = vrot.slane %v6834_v10, %v8869_v31  ;;  %v4167_v12 = vrot.slane %v6834_v10, %v8884_v51 }
 0xa9b   :  { %8360 = vpow2.f32 %v6833_v13  ;;  %v8094_v6 = vld [vmem:[#allocation15 + $0x238] sm:$0xff]   ;;  %v4163_v13 = vrot.slane %v6834_v10, %v8875_v34 }
 0xa9c   :  { %8362 = vtanh.f32 %v4055_v16  ;;  %v8095_v7 = vld [vmem:[#allocation15 + $0x2b8] sm:$0xff]   ;;  %v4171_v16 = vrot.slane %v6834_v10, %v8880_v39  ;;  %v8146_v10 = vld [vmem:[#allocation12 + $0x104] ss:$16 sps:$4 sm:$0xff]  }
 0xa9d   :  { %v8101_v9 = vld [vmem:[#allocation12 + $0xc] ss:$16 sps:$4 sm:$0xff]  }
 0xaa3   :  { %v8357_v17 = vpop.eup %8356 }
 0xaa4   :  { %v8359_v18 = vpop.eup %8358  ;;  %v4064_v19 = vadd.f32 1.0, %v8357_v17 }
 0xaa5   :  { %v4070_v20 = vadd.f32 1.0, %v8359_v18  ;;  %v8361_v21 = vpop.eup %8360 }
 0xaa6   :  { %8364 = vrcp.f32 %v4064_v19  ;;  %v8363_v22 = vpop.eup %8362  ;;  %v4077_v2 = vadd.f32 1.0, %v8361_v21 }
 0xaa7   :  { %8366 = vrcp.f32 %v4070_v20 }
 0xaa8   :  { %8368 = vrcp.f32 %v4077_v2 }
 0xab0   :  { %v8365_v23 = vpop.eup %8364 }
 0xab1   :  { %v8367_v24 = vpop.eup %8366  ;;  %v4081_v25 = vmul.f32 %v8365_v23, %v8363_v22 }
 0xab2   :  { %v4080_v26 = vmul.f32 %v8367_v24, %v8917_v15  ;;  %v8369_v28 = vpop.eup %8368  ;;  %v8067_v15 = vld [vmem:[#allocation15 + $0x280] sm:$0xff]  }
 0xab4   :  { %v8947_v27 = vadd.f32 %v4081_v25, %v4080_v26 }
 0xab6   :  { %8370 = vtanh.f32 %v8947_v27 }
 0xac0   :  { %v8371_v29 = vpop.eup %8370 }
 0xac1   :  { %v4084_v1 = vmul.f32 %v8371_v29, %v8369_v28 }
 0xac3   :  { %v4085_v33 = vpack.c.bf16 %v4084_v1, %v4084_v1 }
 0xac5   :  { %4086 = vst [vmem:[#allocation2 + $0x1] sm:$0x1] %v4085_v33 }
 0xacc   :  { %v6835_v37 = vld.sshfl [vmem:[#allocation2] sm:$0x11 pattern:$0x75316420] }
 0xacd   :  { %v4184_v38 = vcombine.high %v6835_v37, %v6835_v37  ;;  %4961 = vst [vmem:[#allocation2] sm:$0x1] %v4960_v36  ;;  %4962 = vst [vmem:[#allocation2 + $0x1] sm:$0x1] %v4085_v33  ;;  %v4191_v42 = vrot.slane %v6835_v37, %v8859_v32 }
 0xacf   :  { %v4198_v40 = vrot.slane %v4184_v38, %v8859_v32 }
 0xad1   :  { %4553 = vmatprep.mubr.bf16.mxu1 %v4198_v40  ;;  %4594 = vmatprep.mubr.bf16.mxu0 %v4198_v40 }
 0xad2   :  { %4554 = vmatmul.mubr.bf16.vlgmr.msra.gmra.mrb[40].mxu1 %v4191_v42  ;;  %4595 = vmatmul.mubr.bf16.vlgmr.msra.gmra.mrb[36].mxu0 %v4191_v42 }
 0xad3   :  { %7235 = vmatpush3.bf16.msra.mxu1 %v8066_v41  ;;  %7257 = vmatpush3.bf16.msra.mxu0 %v8067_v15  ;;  %v8096_v41 = vld [vmem:[#allocation12] ss:$16 sps:$4 sm:$0xff]   ;;  %v8099_v15 = vld [vmem:[#allocation12 + $0x8] ss:$16 sps:$4 sm:$0xff]  }
 0xad4   :  { %7236 = vmatprep.subr.bf16.mxu1 %v8068_v43  ;;  %7258 = vmatprep.subr.bf16.mxu0 %v8069_v44  ;;  %v8959_v26 = vld.sshfl [vmem:[#allocation2] sm:$0x11 pattern:$0x75316420]  ;;  %v8104_v44 = vld [vmem:[#allocation12 + $0x24] ss:$16 sps:$4 sm:$0xff]  }
 0xad5   :  { %v5058_v37 = vcombine.high %v8959_v26, %v8959_v26 }
 0xad7   :  { %7237 = vmatpush3.bf16.msra.mxu1 %v8070_v45  ;;  %7259 = vmatpush3.bf16.msra.mxu0 %v8071_v14  ;;  %v8107_v45 = vld [vmem:[#allocation12 + $0x2c] ss:$16 sps:$4 sm:$0xff]   ;;  %v5072_v14 = vrot.slane %v5058_v37, %v8859_v32 }
 0xad8   :  { %7238 = vmatprep.subr.bf16.mxu1 %v8072_v46  ;;  %7260 = vmatprep.subr.bf16.mxu0 %v8073_v47  ;;  %v8102_v46 = vld [vmem:[#allocation12 + $0x20] ss:$16 sps:$4 sm:$0xff]   ;;  %v8105_v47 = vld [vmem:[#allocation12 + $0x28] ss:$16 sps:$4 sm:$0xff]   ;;  %v8179_v37 = vld [vmem:[#allocation12 + $0x1ac] ss:$16 sps:$4 sm:$0xff]  }
 0xadb   :  { %7239 = vmatpush3.bf16.msra.mxu1 %v8074_v48  ;;  %7261 = vmatpush3.bf16.msra.mxu0 %v8075_v49  ;;  %v8110_v48 = vld [vmem:[#allocation12 + $0x44] ss:$16 sps:$4 sm:$0xff]   ;;  %v8113_v49 = vld [vmem:[#allocation12 + $0x4c] ss:$16 sps:$4 sm:$0xff]  }
 0xadc   :  { %7240 = vmatprep.subr.bf16.mxu1 %v8076_v50  ;;  %7262 = vmatprep.subr.bf16.mxu0 %v8077_v52  ;;  %v8108_v50 = vld [vmem:[#allocation12 + $0x40] ss:$16 sps:$4 sm:$0xff]   ;;  %v8111_v52 = vld [vmem:[#allocation12 + $0x48] ss:$16 sps:$4 sm:$0xff]  }
 0xadf   :  { %7241 = vmatpush3.bf16.msra.mxu1 %v8078_v53  ;;  %7263 = vmatpush3.bf16.msra.mxu0 %v8079_v54  ;;  %v8116_v53 = vld [vmem:[#allocation12 + $0x64] ss:$16 sps:$4 sm:$0xff]   ;;  %v8119_v54 = vld [vmem:[#allocation12 + $0x6c] ss:$16 sps:$4 sm:$0xff]  }
 0xae0   :  { %7242 = vmatprep.subr.bf16.mxu1 %v8080_v55  ;;  %7264 = vmatprep.subr.bf16.mxu0 %v8081_v56  ;;  %v8114_v55 = vld [vmem:[#allocation12 + $0x60] ss:$16 sps:$4 sm:$0xff]   ;;  %v8117_v56 = vld [vmem:[#allocation12 + $0x68] ss:$16 sps:$4 sm:$0xff]  }
 0xae3   :  { %7243 = vmatpush3.bf16.msra.mxu1 %v8082_v57  ;;  %7265 = vmatpush3.bf16.msra.mxu0 %v8083_v58  ;;  %v8122_v57 = vld [vmem:[#allocation12 + $0x84] ss:$16 sps:$4 sm:$0xff]   ;;  %v8125_v58 = vld [vmem:[#allocation12 + $0x8c] ss:$16 sps:$4 sm:$0xff]  }
 0xae4   :  { %7244 = vmatprep.subr.bf16.mxu1 %v8084_v59  ;;  %7266 = vmatprep.subr.bf16.mxu0 %v8085_v60  ;;  %v8120_v59 = vld [vmem:[#allocation12 + $0x80] ss:$16 sps:$4 sm:$0xff]   ;;  %v8123_v60 = vld [vmem:[#allocation12 + $0x88] ss:$16 sps:$4 sm:$0xff]  }
 0xae7   :  { %7245 = vmatpush3.bf16.msra.mxu1 %v8086_v61  ;;  %7267 = vmatpush3.bf16.msra.mxu0 %v8087_v62  ;;  %v8128_v61 = vld [vmem:[#allocation12 + $0xa4] ss:$16 sps:$4 sm:$0xff]   ;;  %v8131_v62 = vld [vmem:[#allocation12 + $0xac] ss:$16 sps:$4 sm:$0xff]  }
 0xae8   :  { %7246 = vmatprep.subr.bf16.mxu1 %v8088_v63  ;;  %7268 = vmatprep.subr.bf16.mxu0 %v8089_v30  ;;  %v8126_v63 = vld [vmem:[#allocation12 + $0xa0] ss:$16 sps:$4 sm:$0xff]   ;;  %v8129_v30 = vld [vmem:[#allocation12 + $0xa8] ss:$16 sps:$4 sm:$0xff]  }
 0xaeb   :  { %7247 = vmatpush3.bf16.msra.mxu1 %v8090_v0  ;;  %7269 = vmatpush3.bf16.msra.mxu0 %v8091_v3  ;;  %v8134_v0 = vld [vmem:[#allocation12 + $0xc4] ss:$16 sps:$4 sm:$0xff]   ;;  %v8137_v3 = vld [vmem:[#allocation12 + $0xcc] ss:$16 sps:$4 sm:$0xff]  }
 0xaec   :  { %7248 = vmatprep.subr.bf16.mxu1 %v8092_v4  ;;  %7270 = vmatprep.subr.bf16.mxu0 %v8093_v5  ;;  %v8132_v4 = vld [vmem:[#allocation12 + $0xc0] ss:$16 sps:$4 sm:$0xff]   ;;  %v8135_v5 = vld [vmem:[#allocation12 + $0xc8] ss:$16 sps:$4 sm:$0xff]  }
 0xaef   :  { %7249 = vmatpush3.bf16.msra.mxu1 %v8094_v6  ;;  %7271 = vmatpush3.bf16.msra.mxu0 %v8095_v7  ;;  %v8140_v6 = vld [vmem:[#allocation12 + $0xe4] ss:$16 sps:$4 sm:$0xff]   ;;  %v8143_v7 = vld [vmem:[#allocation12 + $0xec] ss:$16 sps:$4 sm:$0xff]  }
 0xaf0   :  { %5395 = vmatprep.subr.bf16.mxu1 %v8098_v8  ;;  %5436 = vmatprep.subr.bf16.mxu0 %v8101_v9  ;;  %v8138_v8 = vld [vmem:[#allocation12 + $0xe0] ss:$16 sps:$4 sm:$0xff]   ;;  %v8141_v9 = vld [vmem:[#allocation12 + $0xe8] ss:$16 sps:$4 sm:$0xff]  }
 0xba5   :  { %v4555_v17 = vpop.f32.mrb[40].mxu1  ;;  %v4596_v18 = vpop.f32.mrb[36].mxu0 }
 0xba6   :  { %v4556_v19 = vadd.f32 %v4555_v17, %v4159_v11  ;;  %v4597_v20 = vadd.f32 %v4596_v18, %v4167_v12  ;;  %v4557_v21 = vpop.f32.mrb[41].mxu1  ;;  %v4598_v22 = vpop.f32.mrb[37].mxu0  ;;  %v8149_v11 = vld [vmem:[#allocation12 + $0x10c] ss:$16 sps:$4 sm:$0xff]   ;;  %v8144_v12 = vld [vmem:[#allocation12 + $0x100] ss:$16 sps:$4 sm:$0xff]  }
 0xba7   :  { %v4558_v23 = vadd.f32 %v4557_v21, %v4163_v13  ;;  %v4599_v24 = vadd.f32 %v4598_v22, %v4171_v16  ;;  %v4559_v25 = vpop.f32.mrb[42].mxu1  ;;  %v4600_v2 = vpop.f32.mrb[38].mxu0  ;;  %v8147_v13 = vld [vmem:[#allocation12 + $0x108] ss:$16 sps:$4 sm:$0xff]   ;;  %v8152_v16 = vld [vmem:[#allocation12 + $0x124] ss:$16 sps:$4 sm:$0xff]  }
 0xba8   :  { %v4603_v28 = vmax.f32 %v4556_v19, 0.0  ;;  %v4605_v29 = vmax.f32 %v4597_v20, 0.0  ;;  %v4560_v1 = vpop.f32.mrb[43].mxu1  ;;  %v4601_v33 = vpop.f32.mrb[39].mxu0  ;;  %v8155_v17 = vld [vmem:[#allocation12 + $0x12c] ss:$16 sps:$4 sm:$0xff]  }
 0xba9   :  { %v4604_v35 = vmax.f32 %v4558_v23, 0.0  ;;  %v4606_v36 = vmax.f32 %v4599_v24, 0.0  ;;  %v8150_v18 = vld [vmem:[#allocation12 + $0x120] ss:$16 sps:$4 sm:$0xff]   ;;  %v8153_v19 = vld [vmem:[#allocation12 + $0x128] ss:$16 sps:$4 sm:$0xff]  }
 0xbaa   :  { %v4607_v42 = vpack.c.bf16 %v4603_v28, %v4603_v28  ;;  %v4609_v43 = vpack.c.bf16 %v4605_v29, %v4605_v29  ;;  %v8158_v20 = vld [vmem:[#allocation12 + $0x144] ss:$16 sps:$4 sm:$0xff]   ;;  %v8161_v21 = vld [vmem:[#allocation12 + $0x14c] ss:$16 sps:$4 sm:$0xff]   ;;  %v8156_v22 = vld [vmem:[#allocation12 + $0x140] ss:$16 sps:$4 sm:$0xff]  }
 0xbab   :  { %v4608_v38 = vpack.c.bf16 %v4604_v35, %v4604_v35  ;;  %v4610_v40 = vpack.c.bf16 %v4606_v36, %v4606_v36  ;;  %v8159_v23 = vld [vmem:[#allocation12 + $0x148] ss:$16 sps:$4 sm:$0xff]   ;;  %v8164_v24 = vld [vmem:[#allocation12 + $0x164] ss:$16 sps:$4 sm:$0xff]   ;;  %v8167_v25 = vld [vmem:[#allocation12 + $0x16c] ss:$16 sps:$4 sm:$0xff]  }
 0xbac   :  { %v8162_v2 = vld [vmem:[#allocation12 + $0x160] ss:$16 sps:$4 sm:$0xff]   ;;  %v8165_v28 = vld [vmem:[#allocation12 + $0x168] ss:$16 sps:$4 sm:$0xff]   ;;  %v8170_v29 = vld [vmem:[#allocation12 + $0x184] ss:$16 sps:$4 sm:$0xff]  }
 0xbad   :  { %4908 = vmatprep.mubr.bf16.mxu1 %v4608_v38  ;;  %4948 = vmatprep.mubr.bf16.mxu0 %v4610_v40  ;;  %v8173_v1 = vld [vmem:[#allocation12 + $0x18c] ss:$16 sps:$4 sm:$0xff]   ;;  %v8168_v33 = vld [vmem:[#allocation12 + $0x180] ss:$16 sps:$4 sm:$0xff]   ;;  %v8171_v35 = vld [vmem:[#allocation12 + $0x188] ss:$16 sps:$4 sm:$0xff]  }
 0xbae   :  { %4909 = vmatmul.mubr.bf16.vlgmr.msra.gmra.mrb[44].mxu1 %v4607_v42  ;;  %4949 = vmatmul.mubr.bf16.vlgmr.msra.gmra.mrb[40].mxu0 %v4609_v43  ;;  %v8176_v36 = vld [vmem:[#allocation12 + $0x1a4] ss:$16 sps:$4 sm:$0xff]   ;;  %v8174_v38 = vld [vmem:[#allocation12 + $0x1a0] ss:$16 sps:$4 sm:$0xff]   ;;  %v8177_v40 = vld [vmem:[#allocation12 + $0x1a8] ss:$16 sps:$4 sm:$0xff]  }
 0xbaf   :  { %5396 = vmatpush1.bf16.msra.mxu1 %v8096_v41  ;;  %5437 = vmatpush1.bf16.msra.mxu0 %v8099_v15  ;;  %v8182_v41 = vld [vmem:[#allocation12 + $0x1c4] ss:$16 sps:$4 sm:$0xff]   ;;  %v8185_v15 = vld [vmem:[#allocation12 + $0x1cc] ss:$16 sps:$4 sm:$0xff]   ;;  %v8180_v42 = vld [vmem:[#allocation12 + $0x1c0] ss:$16 sps:$4 sm:$0xff]  }
 0xbb0   :  { %5427 = vmatprep.mubr.bf16.mxu1 %v5072_v14  ;;  %5468 = vmatprep.mubr.bf16.mxu0 %v5072_v14  ;;  %v8183_v43 = vld [vmem:[#allocation12 + $0x1c8] ss:$16 sps:$4 sm:$0xff]   ;;  %v8186_v14 = vld [vmem:[#allocation12 + $0x1e0] ss:$16 sps:$4 sm:$0xff]  }
 0xbb1   :  { %5397 = vmatprep.subr.bf16.mxu1 %v8104_v44  ;;  %5438 = vmatprep.subr.bf16.mxu0 %v8107_v45  ;;  %v8188_v44 = vld [vmem:[#allocation12 + $0x1e4] ss:$16 sps:$4 sm:$0xff]   ;;  %v8191_v45 = vld [vmem:[#allocation12 + $0x1ec] ss:$16 sps:$4 sm:$0xff]  }
 0xbb3   :  { %5398 = vmatpush1.bf16.msra.mxu1 %v8102_v46  ;;  %5439 = vmatpush1.bf16.msra.mxu0 %v8105_v47  ;;  %v8189_v46 = vld [vmem:[#allocation12 + $0x1e8] ss:$16 sps:$4 sm:$0xff]   ;;  %v5065_v47 = vrot.slane %v8959_v26, %v8859_v32  ;;  %v8209_v26 = vld [vmem:[#allocation14 + $0x64c] ss:$16 sps:$4 sm:$0xff]  }
 0xbb4   :  { %5399 = vmatprep.subr.bf16.mxu1 %v8110_v48  ;;  %5440 = vmatprep.subr.bf16.mxu0 %v8113_v49  ;;  %v8192_v48 = vld [vmem:[#allocation14 + $0x600] ss:$16 sps:$4 sm:$0xff]   ;;  %v8194_v49 = vld [vmem:[#allocation14 + $0x604] ss:$16 sps:$4 sm:$0xff]  }
 0xbb7   :  { %5400 = vmatpush1.bf16.msra.mxu1 %v8108_v50  ;;  %5441 = vmatpush1.bf16.msra.mxu0 %v8111_v52  ;;  %v8195_v50 = vld [vmem:[#allocation14 + $0x608] ss:$16 sps:$4 sm:$0xff]   ;;  %v8197_v52 = vld [vmem:[#allocation14 + $0x60c] ss:$16 sps:$4 sm:$0xff]  }
 0xbb8   :  { %5401 = vmatprep.subr.bf16.mxu1 %v8116_v53  ;;  %5442 = vmatprep.subr.bf16.mxu0 %v8119_v54  ;;  %v8200_v53 = vld [vmem:[#allocation14 + $0x624] ss:$16 sps:$4 sm:$0xff]   ;;  %v8203_v54 = vld [vmem:[#allocation14 + $0x62c] ss:$16 sps:$4 sm:$0xff]  }
 0xbbb   :  { %5402 = vmatpush1.bf16.msra.mxu1 %v8114_v55  ;;  %5443 = vmatpush1.bf16.msra.mxu0 %v8117_v56  ;;  %v8198_v55 = vld [vmem:[#allocation14 + $0x620] ss:$16 sps:$4 sm:$0xff]   ;;  %v8201_v56 = vld [vmem:[#allocation14 + $0x628] ss:$16 sps:$4 sm:$0xff]  }
 0xbbc   :  { %5403 = vmatprep.subr.bf16.mxu1 %v8122_v57  ;;  %5444 = vmatprep.subr.bf16.mxu0 %v8125_v58  ;;  %v8206_v57 = vld [vmem:[#allocation14 + $0x644] ss:$16 sps:$4 sm:$0xff]   ;;  %v8204_v58 = vld [vmem:[#allocation14 + $0x640] ss:$16 sps:$4 sm:$0xff]  }
 0xbbf   :  { %5404 = vmatpush1.bf16.msra.mxu1 %v8120_v59  ;;  %5445 = vmatpush1.bf16.msra.mxu0 %v8123_v60  ;;  %v8207_v59 = vld [vmem:[#allocation14 + $0x648] ss:$16 sps:$4 sm:$0xff]   ;;  %v8212_v60 = vld [vmem:[#allocation14 + $0x664] ss:$16 sps:$4 sm:$0xff]  }
 0xbc0   :  { %5405 = vmatprep.subr.bf16.mxu1 %v8128_v61  ;;  %5446 = vmatprep.subr.bf16.mxu0 %v8131_v62  ;;  %v8215_v61 = vld [vmem:[#allocation14 + $0x66c] ss:$16 sps:$4 sm:$0xff]   ;;  %v8210_v62 = vld [vmem:[#allocation14 + $0x660] ss:$16 sps:$4 sm:$0xff]  }
 0xbc3   :  { %5406 = vmatpush1.bf16.msra.mxu1 %v8126_v63  ;;  %5447 = vmatpush1.bf16.msra.mxu0 %v8129_v30  ;;  %v8213_v63 = vld [vmem:[#allocation14 + $0x668] ss:$16 sps:$4 sm:$0xff]   ;;  %v8218_v30 = vld [vmem:[#allocation14 + $0x684] ss:$16 sps:$4 sm:$0xff]  }
 0xbc4   :  { %5407 = vmatprep.subr.bf16.mxu1 %v8134_v0  ;;  %5448 = vmatprep.subr.bf16.mxu0 %v8137_v3  ;;  %v8221_v0 = vld [vmem:[#allocation14 + $0x68c] ss:$16 sps:$4 sm:$0xff]   ;;  %v8216_v3 = vld [vmem:[#allocation14 + $0x680] ss:$16 sps:$4 sm:$0xff]  }
 0xbc7   :  { %5408 = vmatpush1.bf16.msra.mxu1 %v8132_v4  ;;  %5449 = vmatpush1.bf16.msra.mxu0 %v8135_v5  ;;  %v8219_v4 = vld [vmem:[#allocation14 + $0x688] ss:$16 sps:$4 sm:$0xff]   ;;  %v8224_v5 = vld [vmem:[#allocation14 + $0x6a4] ss:$16 sps:$4 sm:$0xff]  }
 0xbc8   :  { %5409 = vmatprep.subr.bf16.mxu1 %v8140_v6  ;;  %5450 = vmatprep.subr.bf16.mxu0 %v8143_v7  ;;  %v8227_v6 = vld [vmem:[#allocation14 + $0x6ac] ss:$16 sps:$4 sm:$0xff]   ;;  %v8222_v7 = vld [vmem:[#allocation14 + $0x6a0] ss:$16 sps:$4 sm:$0xff]  }
 0xbcb   :  { %5410 = vmatpush1.bf16.msra.mxu1 %v8138_v8  ;;  %5451 = vmatpush1.bf16.msra.mxu0 %v8141_v9  ;;  %v8225_v8 = vld [vmem:[#allocation14 + $0x6a8] ss:$16 sps:$4 sm:$0xff]   ;;  %v8230_v9 = vld [vmem:[#allocation14 + $0x6c4] ss:$16 sps:$4 sm:$0xff]  }
 0xbcc   :  { %5411 = vmatprep.subr.bf16.mxu1 %v8146_v10  ;;  %5452 = vmatprep.subr.bf16.mxu0 %v8149_v11  ;;  %v8233_v10 = vld [vmem:[#allocation14 + $0x6cc] ss:$16 sps:$4 sm:$0xff]   ;;  %v8228_v11 = vld [vmem:[#allocation14 + $0x6c0] ss:$16 sps:$4 sm:$0xff]  }
 0xbcf   :  { %5412 = vmatpush1.bf16.msra.mxu1 %v8144_v12  ;;  %5453 = vmatpush1.bf16.msra.mxu0 %v8147_v13  ;;  %v8231_v12 = vld [vmem:[#allocation14 + $0x6c8] ss:$16 sps:$4 sm:$0xff]   ;;  %v8236_v13 = vld [vmem:[#allocation14 + $0x6e4] ss:$16 sps:$4 sm:$0xff]  }
 0xbd0   :  { %5413 = vmatprep.subr.bf16.mxu1 %v8152_v16  ;;  %5454 = vmatprep.subr.bf16.mxu0 %v8155_v17  ;;  %v8239_v16 = vld [vmem:[#allocation14 + $0x6ec] ss:$16 sps:$4 sm:$0xff]   ;;  %v8234_v17 = vld [vmem:[#allocation14 + $0x6e0] ss:$16 sps:$4 sm:$0xff]  }
 0xbd3   :  { %5414 = vmatpush1.bf16.msra.mxu1 %v8150_v18  ;;  %5455 = vmatpush1.bf16.msra.mxu0 %v8153_v19  ;;  %v8237_v18 = vld [vmem:[#allocation14 + $0x6e8] ss:$16 sps:$4 sm:$0xff]   ;;  %v8242_v19 = vld [vmem:[#allocation14 + $0x704] ss:$16 sps:$4 sm:$0xff]  }
 0xbd4   :  { %5415 = vmatprep.subr.bf16.mxu1 %v8158_v20  ;;  %5456 = vmatprep.subr.bf16.mxu0 %v8161_v21  ;;  %v8245_v20 = vld [vmem:[#allocation14 + $0x70c] ss:$16 sps:$4 sm:$0xff]   ;;  %v8240_v21 = vld [vmem:[#allocation14 + $0x700] ss:$16 sps:$4 sm:$0xff]  }
 0xbd7   :  { %5416 = vmatpush1.bf16.msra.mxu1 %v8156_v22  ;;  %5457 = vmatpush1.bf16.msra.mxu0 %v8159_v23  ;;  %v8243_v22 = vld [vmem:[#allocation14 + $0x708] ss:$16 sps:$4 sm:$0xff]   ;;  %v8248_v23 = vld [vmem:[#allocation14 + $0x724] ss:$16 sps:$4 sm:$0xff]  }
 0xbd8   :  { %5417 = vmatprep.subr.bf16.mxu1 %v8164_v24  ;;  %5458 = vmatprep.subr.bf16.mxu0 %v8167_v25  ;;  %v8251_v24 = vld [vmem:[#allocation14 + $0x72c] ss:$16 sps:$4 sm:$0xff]   ;;  %v8246_v25 = vld [vmem:[#allocation14 + $0x720] ss:$16 sps:$4 sm:$0xff]  }
 0xbdb   :  { %5418 = vmatpush1.bf16.msra.mxu1 %v8162_v2  ;;  %5459 = vmatpush1.bf16.msra.mxu0 %v8165_v28  ;;  %v8249_v2 = vld [vmem:[#allocation14 + $0x728] ss:$16 sps:$4 sm:$0xff]   ;;  %v8254_v28 = vld [vmem:[#allocation14 + $0x744] ss:$16 sps:$4 sm:$0xff]  }
 0xbdc   :  { %5419 = vmatprep.subr.bf16.mxu1 %v8170_v29  ;;  %5460 = vmatprep.subr.bf16.mxu0 %v8173_v1  ;;  %v8257_v29 = vld [vmem:[#allocation14 + $0x74c] ss:$16 sps:$4 sm:$0xff]   ;;  %v8252_v1 = vld [vmem:[#allocation14 + $0x740] ss:$16 sps:$4 sm:$0xff]  }
 0xbdf   :  { %5420 = vmatpush1.bf16.msra.mxu1 %v8168_v33  ;;  %5461 = vmatpush1.bf16.msra.mxu0 %v8171_v35  ;;  %v8255_v33 = vld [vmem:[#allocation14 + $0x748] ss:$16 sps:$4 sm:$0xff]   ;;  %v8260_v35 = vld [vmem:[#allocation14 + $0x764] ss:$16 sps:$4 sm:$0xff]  }
 0xbe0   :  { %5421 = vmatprep.subr.bf16.mxu1 %v8176_v36  ;;  %5462 = vmatprep.subr.bf16.mxu0 %v8179_v37  ;;  %v8263_v36 = vld [vmem:[#allocation14 + $0x76c] ss:$16 sps:$4 sm:$0xff]   ;;  %v8258_v37 = vld [vmem:[#allocation14 + $0x760] ss:$16 sps:$4 sm:$0xff]  }
 0xbe3   :  { %5422 = vmatpush1.bf16.msra.mxu1 %v8174_v38  ;;  %5463 = vmatpush1.bf16.msra.mxu0 %v8177_v40  ;;  %v8261_v38 = vld [vmem:[#allocation14 + $0x768] ss:$16 sps:$4 sm:$0xff]   ;;  %v8266_v40 = vld [vmem:[#allocation14 + $0x784] ss:$16 sps:$4 sm:$0xff]  }
 0xbe4   :  { %5423 = vmatprep.subr.bf16.mxu1 %v8182_v41  ;;  %5464 = vmatprep.subr.bf16.mxu0 %v8185_v15  ;;  %v8269_v41 = vld [vmem:[#allocation14 + $0x78c] ss:$16 sps:$4 sm:$0xff]   ;;  %v8264_v15 = vld [vmem:[#allocation14 + $0x780] ss:$16 sps:$4 sm:$0xff]  }
 0xbe7   :  { %5424 = vmatpush1.bf16.msra.mxu1 %v8180_v42  ;;  %5465 = vmatpush1.bf16.msra.mxu0 %v8183_v43  ;;  %v8267_v42 = vld [vmem:[#allocation14 + $0x788] ss:$16 sps:$4 sm:$0xff]   ;;  %v8270_v43 = vld [vmem:[#allocation14 + $0x7a0] ss:$16 sps:$4 sm:$0xff]  }
 0xbe8   :  { %5425 = vmatprep.subr.bf16.mxu1 %v8188_v44  ;;  %5466 = vmatprep.subr.bf16.mxu0 %v8191_v45  ;;  %v8272_v44 = vld [vmem:[#allocation14 + $0x7a4] ss:$16 sps:$4 sm:$0xff]   ;;  %v8273_v45 = vld [vmem:[#allocation14 + $0x7a8] ss:$16 sps:$4 sm:$0xff]  }
 0xbeb   :  { %5426 = vmatpush1.bf16.msra.mxu1 %v8186_v14  ;;  %5467 = vmatpush1.bf16.msra.mxu0 %v8189_v46  ;;  %v8275_v14 = vld [vmem:[#allocation14 + $0x7ac] ss:$16 sps:$4 sm:$0xff]   ;;  %v8278_v46 = vld [vmem:[#allocation14 + $0x7c4] ss:$16 sps:$4 sm:$0xff]  }
 0xbec   :  { %5937 = vmatprep.subr.bf16.mxu1 %v8194_v49  ;;  %5978 = vmatprep.subr.bf16.mxu0 %v8197_v52  ;;  %v8279_v49 = vld [vmem:[#allocation14 + $0x7c8] ss:$16 sps:$4 sm:$0xff]   ;;  %v8287_v52 = vld [vmem:[#allocation14 + $0x7ec] ss:$16 sps:$4 sm:$0xff]  }
 0xbee   :  { %5428 = vmatmul.mubr.bf16.vlgmr.msra.gmra.mrb[48].mxu1 %v5065_v47  ;;  %5469 = vmatmul.mubr.bf16.vlgmr.msra.gmra.mrb[44].mxu0 %v5065_v47  ;;  %v8281_v47 = vld [vmem:[#allocation14 + $0x7cc] ss:$16 sps:$4 sm:$0xff]  }
 0xbef   :  { %5938 = vmatpush1.bf16.msra.mxu1 %v8192_v48  ;;  %5979 = vmatpush1.bf16.msra.mxu0 %v8195_v50  ;;  %v8276_v48 = vld [vmem:[#allocation14 + $0x7c0] ss:$16 sps:$4 sm:$0xff]   ;;  %v8284_v50 = vld [vmem:[#allocation14 + $0x7e4] ss:$16 sps:$4 sm:$0xff]  }
 0xbf0   :  { %5939 = vmatprep.subr.bf16.mxu1 %v8200_v53  ;;  %5980 = vmatprep.subr.bf16.mxu0 %v8203_v54  ;;  %v8282_v53 = vld [vmem:[#allocation14 + $0x7e0] ss:$16 sps:$4 sm:$0xff]   ;;  %v8285_v54 = vld [vmem:[#allocation14 + $0x7e8] ss:$16 sps:$4 sm:$0xff]  }
 0xbf3   :  { %5940 = vmatpush1.bf16.msra.mxu1 %v8198_v55  ;;  %5981 = vmatpush1.bf16.msra.mxu0 %v8201_v56  ;;  %v8288_v55 = vld [vmem:[#allocation15 + $0x340] sm:$0xff]  }
 0xbf4   :  { %5941 = vmatprep.subr.bf16.mxu1 %v8206_v57  ;;  %5982 = vmatprep.subr.bf16.mxu0 %v8209_v26  ;;  %v8289_v56 = vld [vmem:[#allocation15 + $0x3c0] sm:$0xff]  }
 0xbf7   :  { %5942 = vmatpush1.bf16.msra.mxu1 %v8204_v58  ;;  %5983 = vmatpush1.bf16.msra.mxu0 %v8207_v59  ;;  %v6901_v58 = vld [vmem:[%s9017_s13 + $0x2] ss:$0 sm:$0xff] }
 0xbf8   :  { %5943 = vmatprep.subr.bf16.mxu1 %v8212_v60  ;;  %5984 = vmatprep.subr.bf16.mxu0 %v8215_v61 }
 0xbfb   :  { %5944 = vmatpush1.bf16.msra.mxu1 %v8210_v62  ;;  %5985 = vmatpush1.bf16.msra.mxu0 %v8213_v63 }
 0xbfc   :  { %5945 = vmatprep.subr.bf16.mxu1 %v8218_v30  ;;  %5986 = vmatprep.subr.bf16.mxu0 %v8221_v0 }
 0xbff   :  { %5946 = vmatpush1.bf16.msra.mxu1 %v8216_v3  ;;  %5987 = vmatpush1.bf16.msra.mxu0 %v8219_v4 }
 0xc00   :  { %5947 = vmatprep.subr.bf16.mxu1 %v8224_v5  ;;  %5988 = vmatprep.subr.bf16.mxu0 %v8227_v6  ;;  %v5028_v6 = vld [vmem:[%s9013_s9] sm:$0xf] }
 0xc03   :  { %5948 = vmatpush1.bf16.msra.mxu1 %v8222_v7  ;;  %5989 = vmatpush1.bf16.msra.mxu0 %v8225_v8  ;;  %v5033_v7 = vrot.slane %v5028_v6, %v8869_v31  ;;  %v5037_v8 = vrot.slane %v5028_v6, %v8875_v34 }
 0xc04   :  { %5949 = vmatprep.subr.bf16.mxu1 %v8230_v9  ;;  %5990 = vmatprep.subr.bf16.mxu0 %v8233_v10 }
 0xc07   :  { %5950 = vmatpush1.bf16.msra.mxu1 %v8228_v11  ;;  %5991 = vmatpush1.bf16.msra.mxu0 %v8231_v12 }
 0xc08   :  { %5951 = vmatprep.subr.bf16.mxu1 %v8236_v13  ;;  %5992 = vmatprep.subr.bf16.mxu0 %v8239_v16 }
 0xc0b   :  { %5952 = vmatpush1.bf16.msra.mxu1 %v8234_v17  ;;  %5993 = vmatpush1.bf16.msra.mxu0 %v8237_v18 }
 0xc0c   :  { %5953 = vmatprep.subr.bf16.mxu1 %v8242_v19  ;;  %5994 = vmatprep.subr.bf16.mxu0 %v8245_v20 }
 0xc0f   :  { %5954 = vmatpush1.bf16.msra.mxu1 %v8240_v21  ;;  %5995 = vmatpush1.bf16.msra.mxu0 %v8243_v22 }
 0xc10   :  { %5955 = vmatprep.subr.bf16.mxu1 %v8248_v23  ;;  %5996 = vmatprep.subr.bf16.mxu0 %v8251_v24  ;;  %v5045_v23 = vrot.slane %v5028_v6, %v8880_v39 }
 0xc13   :  { %5956 = vmatpush1.bf16.msra.mxu1 %v8246_v25  ;;  %5997 = vmatpush1.bf16.msra.mxu0 %v8249_v2  ;;  %v5041_v25 = vrot.slane %v5028_v6, %v8884_v51  ;;  %v8310_v6 = vld [vmem:[#allocation15 + $0x328] sm:$0xff]  }
 0xc14   :  { %5957 = vmatprep.subr.bf16.mxu1 %v8254_v28  ;;  %5998 = vmatprep.subr.bf16.mxu0 %v8257_v29 }
 0xc17   :  { %5958 = vmatpush1.bf16.msra.mxu1 %v8252_v1  ;;  %5999 = vmatpush1.bf16.msra.mxu0 %v8255_v33 }
 0xc18   :  { %5959 = vmatprep.subr.bf16.mxu1 %v8260_v35  ;;  %6000 = vmatprep.subr.bf16.mxu0 %v8263_v36 }
 0xc1b   :  { %5960 = vmatpush1.bf16.msra.mxu1 %v8258_v37  ;;  %6001 = vmatpush1.bf16.msra.mxu0 %v8261_v38 }
 0xc1c   :  { %5961 = vmatprep.subr.bf16.mxu1 %v8266_v40  ;;  %6002 = vmatprep.subr.bf16.mxu0 %v8269_v41 }
 0xc1f   :  { %5962 = vmatpush1.bf16.msra.mxu1 %v8264_v15  ;;  %6003 = vmatpush1.bf16.msra.mxu0 %v8267_v42 }
 0xc20   :  { %5963 = vmatprep.subr.bf16.mxu1 %v8272_v44  ;;  %6004 = vmatprep.subr.bf16.mxu0 %v8275_v14 }
 0xc23   :  { %5964 = vmatpush1.bf16.msra.mxu1 %v8270_v43  ;;  %6005 = vmatpush1.bf16.msra.mxu0 %v8273_v45 }
 0xc24   :  { %5965 = vmatprep.subr.bf16.mxu1 %v8278_v46  ;;  %6006 = vmatprep.subr.bf16.mxu0 %v8281_v47 }
 0xc27   :  { %5966 = vmatpush1.bf16.msra.mxu1 %v8276_v48  ;;  %6007 = vmatpush1.bf16.msra.mxu0 %v8279_v49 }
 0xc28   :  { %5967 = vmatprep.subr.bf16.mxu1 %v8284_v50  ;;  %6008 = vmatprep.subr.bf16.mxu0 %v8287_v52  ;;  %v8290_v50 = vld [vmem:[#allocation15 + $0x300] sm:$0xff]  }
 0xc29   :  { %v8291_v52 = vld [vmem:[#allocation15 + $0x380] sm:$0xff]  }
 0xc2b   :  { %5968 = vmatpush1.bf16.msra.mxu1 %v8282_v53  ;;  %6009 = vmatpush1.bf16.msra.mxu0 %v8285_v54  ;;  %v8292_v54 = vld [vmem:[#allocation15 + $0x348] sm:$0xff]  }
 0xc2c   :  { %7278 = vmatprep.subr.bf16.mxu1 %v8288_v55  ;;  %7300 = vmatprep.subr.bf16.mxu0 %v8289_v56  ;;  %v8293_v55 = vld [vmem:[#allocation15 + $0x3c8] sm:$0xff]  }
 0xc2d   :  { %v8295_v56 = vld [vmem:[#allocation15 + $0x388] sm:$0xff]  }
 0xc81   :  { %v7250_v57 = vpop.f32.mrb[44].mxu1  ;;  %v7272_v26 = vpop.f32.mrb[40].mxu0 }
 0xc82   :  { %v7251_v59 = vpop.f32.mrb[45].mxu1  ;;  %v7273_v60 = vpop.f32.mrb[41].mxu0 }
 0xc83   :  { %v7252_v61 = vadd.f32 %v7251_v59, %v7250_v57  ;;  %v7274_v62 = vadd.f32 %v7273_v60, %v7272_v26  ;;  %v7253_v63 = vpop.f32.mrb[46].mxu1  ;;  %v7275_v30 = vpop.f32.mrb[42].mxu0  ;;  %v8296_v57 = vld [vmem:[#allocation15 + $0x350] sm:$0xff]   ;;  %v8301_v60 = vld [vmem:[#allocation15 + $0x3d8] sm:$0xff]  }
 0xc84   :  { %v7254_v0 = vpop.f32.mrb[47].mxu1  ;;  %v7276_v3 = vpop.f32.mrb[43].mxu0  ;;  %v8297_v26 = vld [vmem:[#allocation15 + $0x3d0] sm:$0xff]   ;;  %v8304_v63 = vld [vmem:[#allocation15 + $0x360] sm:$0xff]  }
 0xc85   :  { %v4911_v4 = vadd.f32 %v7252_v61, %v6901_v58  ;;  %v8298_v58 = vld [vmem:[#allocation15 + $0x310] sm:$0xff]   ;;  %v8302_v61 = vld [vmem:[#allocation15 + $0x318] sm:$0xff]   ;;  %v8305_v30 = vld [vmem:[#allocation15 + $0x3e0] sm:$0xff]  }
 0xc86   :  { %v8299_v59 = vld [vmem:[#allocation15 + $0x390] sm:$0xff]   ;;  %v8306_v0 = vld [vmem:[#allocation15 + $0x320] sm:$0xff]  }
 0xc87   :  { %v4951_v5 = vadd.f32 %v7274_v62, %v4911_v4  ;;  %v8303_v62 = vld [vmem:[#allocation15 + $0x398] sm:$0xff]   ;;  %v8307_v3 = vld [vmem:[#allocation15 + $0x3a0] sm:$0xff]   ;;  %v8308_v4 = vld [vmem:[#allocation15 + $0x368] sm:$0xff]  }
 0xc89   :  { %4957 = vst [vmem:[#allocation17 + $0x4] sm:$0x3] %v4951_v5  ;;  %v8309_v5 = vld [vmem:[#allocation15 + $0x3e8] sm:$0xff]  }
 0xcc1   :  { %v5429_v9 = vpop.f32.mrb[48].mxu1  ;;  %v5470_v10 = vpop.f32.mrb[44].mxu0 }
 0xcc2   :  { %v5430_v11 = vadd.f32 %v5429_v9, %v5033_v7  ;;  %v5431_v12 = vpop.f32.mrb[49].mxu1  ;;  %v5472_v13 = vpop.f32.mrb[45].mxu0  ;;  %v5471_v28 = vadd.f32 %v5470_v10, %v5041_v25  ;;  %v8311_v7 = vld [vmem:[#allocation15 + $0x3a8] sm:$0xff]   ;;  %v8313_v9 = vld [vmem:[#allocation15 + $0x3f0] sm:$0xff]  }
 0xcc3   :  { %v5432_v16 = vadd.f32 %v5431_v12, %v5037_v8  ;;  %v5433_v17 = vpop.f32.mrb[50].mxu1  ;;  %v5474_v18 = vpop.f32.mrb[46].mxu0  ;;  %v5473_v24 = vadd.f32 %v5472_v13, %v5045_v23  ;;  %v8312_v8 = vld [vmem:[#allocation15 + $0x370] sm:$0xff]   ;;  %v8316_v12 = vld [vmem:[#allocation15 + $0x378] sm:$0xff]  }
 0xcc4   :  { %v6999_v19 = vmul.f32 -1.442695, %v5430_v11  ;;  %v5434_v20 = vpop.f32.mrb[51].mxu1  ;;  %v5475_v21 = vpop.f32.mrb[47].mxu0  ;;  %v8314_v10 = vld [vmem:[#allocation15 + $0x330] sm:$0xff]   ;;  %v8317_v13 = vld [vmem:[#allocation15 + $0x3f8] sm:$0xff]  }
 0xcc5   :  { %v7000_v22 = vmul.f32 -1.442695, %v5432_v16  ;;  %v7001_v2 = vmul.f32 -1.442695, %v5473_v24  ;;  %v8315_v11 = vld [vmem:[#allocation15 + $0x3b0] sm:$0xff]   ;;  %v8318_v16 = vld [vmem:[#allocation15 + $0x338] sm:$0xff]  }
 0xcc6   :  { %8372 = vpow2.f32 %v6999_v19  ;;  %v8319_v17 = vld [vmem:[#allocation15 + $0x3b8] sm:$0xff]   ;;  %v7002_v18 = vld [vmem:[%s9015_s11 + $0xc] sm:$0xf] }
 0xcc7   :  { %8374 = vpow2.f32 %v7000_v22  ;;  %v5575_v19 = vrot.slane %v7002_v18, %v8869_v31  ;;  %v5583_v20 = vrot.slane %v7002_v18, %v8884_v51  ;;  %v5579_v21 = vrot.slane %v7002_v18, %v8875_v34 }
 0xcc8   :  { %8376 = vpow2.f32 %v7001_v2  ;;  %v5587_v22 = vrot.slane %v7002_v18, %v8880_v39 }
 0xcc9   :  { %8378 = vtanh.f32 %v5471_v28 }
 0xcd0   :  { %v8373_v29 = vpop.eup %8372 }
 0xcd1   :  { %v8375_v1 = vpop.eup %8374  ;;  %v5480_v33 = vadd.f32 1.0, %v8373_v29 }
 0xcd2   :  { %v5486_v35 = vadd.f32 1.0, %v8375_v1  ;;  %v8377_v36 = vpop.eup %8376 }
 0xcd3   :  { %8380 = vrcp.f32 %v5480_v33  ;;  %v8379_v37 = vpop.eup %8378  ;;  %v5493_v15 = vadd.f32 1.0, %v8377_v36 }
 0xcd4   :  { %8382 = vrcp.f32 %v5486_v35 }
 0xcd5   :  { %8384 = vrcp.f32 %v5493_v15 }
 0xcdd   :  { %v8381_v38 = vpop.eup %8380 }
 0xcde   :  { %v8383_v40 = vpop.eup %8382  ;;  %v5497_v41 = vmul.f32 %v8381_v38, %v8379_v37 }
 0xcdf   :  { %v5496_v42 = vmul.f32 %v8383_v40, %v8947_v27  ;;  %v8385_v44 = vpop.eup %8384  ;;  %v8294_v27 = vld [vmem:[#allocation15 + $0x308] sm:$0xff]  }
 0xce1   :  { %v5498_v43 = vadd.f32 %v5497_v41, %v5496_v42 }
 0xce3   :  { %8386 = vtanh.f32 %v5498_v43 }
 0xced   :  { %v8387_v45 = vpop.eup %8386 }
 0xcee   :  { %v5500_v14 = vmul.f32 %v8387_v45, %v8385_v44  ;;  %v7069_v45 = vld [vmem:[%s9017_s13 + $0x3] ss:$0 sm:$0xff] }
 0xcf0   :  { %v5501_v46 = vpack.c.bf16 %v5500_v14, %v5500_v14 }
 0xcf2   :  { %5502 = vst [vmem:[#allocation2 + $0x1] sm:$0x1] %v5501_v46 }
 0xcf9   :  { %v7003_v47 = vld.sshfl [vmem:[#allocation2] sm:$0x11 pattern:$0x75316420] }
 0xcfa   :  { %v5600_v48 = vcombine.high %v7003_v47, %v7003_v47  ;;  %v5607_v53 = vrot.slane %v7003_v47, %v8859_v32 }
 0xcfc   :  { %v5614_v49 = vrot.slane %v5600_v48, %v8859_v32  ;;  %v8300_v32 = vld [vmem:[#allocation15 + $0x358] sm:$0xff]  }
 0xcfe   :  { %5969 = vmatprep.mubr.bf16.mxu1 %v5614_v49  ;;  %6010 = vmatprep.mubr.bf16.mxu0 %v5614_v49 }
 0xcff   :  { %5970 = vmatmul.mubr.bf16.vlgmr.msra.gmra.mrb[52].mxu1 %v5607_v53  ;;  %6011 = vmatmul.mubr.bf16.vlgmr.msra.gmra.mrb[48].mxu0 %v5607_v53 }
 0xd00   :  { %7279 = vmatpush3.bf16.msra.mxu1 %v8290_v50  ;;  %7301 = vmatpush3.bf16.msra.mxu0 %v8291_v52 }
 0xd01   :  { %7280 = vmatprep.subr.bf16.mxu1 %v8292_v54  ;;  %7302 = vmatprep.subr.bf16.mxu0 %v8293_v55 }
 0xd04   :  { %7281 = vmatpush3.bf16.msra.mxu1 %v8294_v27  ;;  %7303 = vmatpush3.bf16.msra.mxu0 %v8295_v56 }
 0xd05   :  { %7282 = vmatprep.subr.bf16.mxu1 %v8296_v57  ;;  %7304 = vmatprep.subr.bf16.mxu0 %v8297_v26 }
 0xd08   :  { %7283 = vmatpush3.bf16.msra.mxu1 %v8298_v58  ;;  %7305 = vmatpush3.bf16.msra.mxu0 %v8299_v59 }
 0xd09   :  { %7284 = vmatprep.subr.bf16.mxu1 %v8300_v32  ;;  %7306 = vmatprep.subr.bf16.mxu0 %v8301_v60 }
 0xd0c   :  { %7285 = vmatpush3.bf16.msra.mxu1 %v8302_v61  ;;  %7307 = vmatpush3.bf16.msra.mxu0 %v8303_v62 }
 0xd0d   :  { %7286 = vmatprep.subr.bf16.mxu1 %v8304_v63  ;;  %7308 = vmatprep.subr.bf16.mxu0 %v8305_v30 }
 0xd10   :  { %7287 = vmatpush3.bf16.msra.mxu1 %v8306_v0  ;;  %7309 = vmatpush3.bf16.msra.mxu0 %v8307_v3 }
 0xd11   :  { %7288 = vmatprep.subr.bf16.mxu1 %v8308_v4  ;;  %7310 = vmatprep.subr.bf16.mxu0 %v8309_v5 }
 0xd14   :  { %7289 = vmatpush3.bf16.msra.mxu1 %v8310_v6  ;;  %7311 = vmatpush3.bf16.msra.mxu0 %v8311_v7 }
 0xd15   :  { %7290 = vmatprep.subr.bf16.mxu1 %v8312_v8  ;;  %7312 = vmatprep.subr.bf16.mxu0 %v8313_v9 }
 0xd18   :  { %7291 = vmatpush3.bf16.msra.mxu1 %v8314_v10  ;;  %7313 = vmatpush3.bf16.msra.mxu0 %v8315_v11 }
 0xd19   :  { %7292 = vmatprep.subr.bf16.mxu1 %v8316_v12  ;;  %7314 = vmatprep.subr.bf16.mxu0 %v8317_v13 }
 0xd1c   :  { %7293 = vmatpush3.bf16.msra.mxu1 %v8318_v16  ;;  %7315 = vmatpush3.bf16.msra.mxu0 %v8319_v17 }
 0xdd2   :  { %v5971_v23 = vpop.f32.mrb[52].mxu1  ;;  %v6012_v24 = vpop.f32.mrb[48].mxu0 }
 0xdd3   :  { %v5972_v25 = vadd.f32 %v5971_v23, %v5575_v19  ;;  %v6013_v2 = vadd.f32 %v6012_v24, %v5583_v20  ;;  %v5973_v28 = vpop.f32.mrb[53].mxu1  ;;  %v6014_v29 = vpop.f32.mrb[49].mxu0 }
 0xdd4   :  { %v5974_v1 = vadd.f32 %v5973_v28, %v5579_v21  ;;  %v6015_v33 = vadd.f32 %v6014_v29, %v5587_v22  ;;  %v5975_v35 = vpop.f32.mrb[54].mxu1  ;;  %v6016_v36 = vpop.f32.mrb[50].mxu0 }
 0xdd5   :  { %v6019_v37 = vmax.f32 %v5972_v25, 0.0  ;;  %v6021_v38 = vmax.f32 %v6013_v2, 0.0  ;;  %v5976_v40 = vpop.f32.mrb[55].mxu1  ;;  %v6017_v31 = vpop.f32.mrb[51].mxu0 }
 0xdd6   :  { %v6020_v41 = vmax.f32 %v5974_v1, 0.0  ;;  %v6022_v51 = vmax.f32 %v6015_v33, 0.0 }
 0xdd7   :  { %v6023_v42 = vpack.c.bf16 %v6019_v37, %v6019_v37  ;;  %v6025_v39 = vpack.c.bf16 %v6021_v38, %v6021_v38 }
 0xdd8   :  { %v6024_v15 = vpack.c.bf16 %v6020_v41, %v6020_v41  ;;  %v6026_v34 = vpack.c.bf16 %v6022_v51, %v6022_v51 }
 0xdda   :  { %6324 = vmatprep.mubr.bf16.mxu1 %v6024_v15  ;;  %6364 = vmatprep.mubr.bf16.mxu0 %v6026_v34 }
 0xddb   :  { %6325 = vmatmul.mubr.bf16.vlgmr.msra.gmra.mrb[56].mxu1 %v6023_v42  ;;  %6365 = vmatmul.mubr.bf16.vlgmr.msra.gmra.mrb[52].mxu0 %v6025_v39 }
 0xeae   :  { %v7294_v43 = vpop.f32.mrb[56].mxu1  ;;  %v7316_v44 = vpop.f32.mrb[52].mxu0 }
 0xeaf   :  { %v7295_v14 = vpop.f32.mrb[57].mxu1  ;;  %v7317_v46 = vpop.f32.mrb[53].mxu0 }
 0xeb0   :  { %v7296_v47 = vadd.f32 %v7295_v14, %v7294_v43  ;;  %v7318_v48 = vadd.f32 %v7317_v46, %v7316_v44  ;;  %v7297_v49 = vpop.f32.mrb[58].mxu1  ;;  %v7319_v50 = vpop.f32.mrb[54].mxu0 }
 0xeb1   :  { %v7298_v52 = vpop.f32.mrb[59].mxu1  ;;  %v7320_v53 = vpop.f32.mrb[55].mxu0 }
 0xeb2   :  { %v6327_v54 = vadd.f32 %v7296_v47, %v7069_v45 }
 0xeb4   :  { %v6367_v55 = vadd.f32 %v7318_v48, %v6327_v54 }
 0xeb6   :  { %6373 = vst [vmem:[#allocation17 + $0x6] sm:$0x3] %v6367_v55 }
 0xeb7   :  { %8576 = shalt.err (!%p8573_p12)
}
 0xeb8   :  { %s8577_s22 = scalar_lea.hbm %s9018_s14, 128 }
 0xeb9   :  { %p8578_p13 = scmp.ne.s32.totalorder %s9018_s14, %s8577_s22  ;;  %p8581_p0 = scmp.lt.u32.totalorder %s8577_s22, %s9018_s14 }
 0xebb   :  { %p8583_p1 = pnand %p8581_p0, %p8578_p13 }
 0xebd   :  { %8586 = shalt.err (!%p8583_p1)
}
 0xebe   :  { %6385 = dma.vmem_to_hbm [thread:$0]  %s6380_s3, 128, %s9018_s14, [#allocation5], %s8607_s8, %s8607_s8, %s8608_s28  }
 0xebf   :  { %8597 = dma.done.wait [#allocation5], 128  }
 0xec0   :  { %8598 = vsyncadd [#allocation5], 4294967168 }
 0xec1   :  { %6389 = vsyncpa [#allocation4], 1 }
 0xec2   :  { %6390 = vsyncpa [#allocation7], 1 }
 0xec3   :  { %6391 = vsyncpa [#allocation10], 1 }
 0xec4   :  { %6392 = vsyncpa [#allocation13], 1 }
 0xec5   :  { %6393 = vsyncpa [#allocation16], 1 }
 0xec6   :  { %6394 = vsyncpa [#allocation5], 1 }

</bundles_post_ra>
